<compile_context>
chip_gen: v5e
topology: v5e:2x2
jax: 0.10.0
libtpu: 0.0.40
codegen_flags: <defaults>
</compile_context>

<pallas_src>
import functools

import jax
import jax.numpy as jnp
from jax.experimental import pallas as pl
from jax.experimental.pallas import tpu as pltpu

_LANE = 128


def _mlp_kernel(x0_ref, x1_ref, w10_ref, w11_ref, b1_ref, w2_ref, b2_ref, o_ref,
                *, hidden, strip):
    # x0_ref / x1_ref / o_ref : (tile_rows, 128) f32 VMEM blocks (batch planes)
    # w10/w11/b1/w2           : (H,) f32 in SMEM   (flattened 1-D)
    # b2                      : (1,) f32 in SMEM
    tile_rows, lane = o_ref.shape
    n_strips = tile_rows // strip

    @pl.loop(0, n_strips)
    def _(s):
        r0 = pl.multiple_of(s * strip, strip)
        x0 = x0_ref[pl.ds(r0, strip), :]          # (strip, 128) held in vregs
        x1 = x1_ref[pl.ds(r0, strip), :]
        acc0 = jnp.full((strip, lane), b2_ref[0], dtype=jnp.float32)

        def unit(j, acc):
            # scalar(SMEM)-broadcast FMAs on the VPU; ReLU; weighted accumulate
            z = w10_ref[j] * x0 + w11_ref[j] * x1 + b1_ref[j]
            return acc + w2_ref[j] * jnp.maximum(z, 0.0)

        acc = jax.lax.fori_loop(0, hidden, unit, acc0, unroll=True)
        o_ref[pl.ds(r0, strip), :] = acc.astype(o_ref.dtype)


def lambda_approximator_forward(x, w1, b1, w2, b2, *, tile_rows=512, strip_rows=32):
    """Forward pass of Linear(2,50)->ReLU->Linear(50,1).

    x  : (B, 2)   float32
    w1 : (50, 2)  float32   (torch layout)
    b1 : (50,)    float32
    w2 : (1, 50)  float32   (torch layout)
    b2 : (1,)     float32
    returns (B, 1) float32
    """
    B, F = x.shape
    assert F == 2
    H = w1.shape[0]
    strip = int(strip_rows)
    assert strip > 0 and strip % 8 == 0

    # Pad batch to a multiple of (strip * 128) so the dense-plane reshape and the
    # in-kernel strip loop need no edge handling; padding is zeros and the tail
    # of the output is sliced off below.
    chunk = strip * _LANE
    b_pad = pl.cdiv(B, chunk) * chunk
    rows_pad = b_pad // _LANE
    pad = b_pad - B

    # Feature columns as dense (rows, 128) planes (batch on lanes + sublanes).
    x0 = jnp.pad(x[:, 0], (0, pad)).reshape(rows_pad, _LANE)
    x1 = jnp.pad(x[:, 1], (0, pad)).reshape(rows_pad, _LANE)

    # Tiny params, flattened 1-D, destined for SMEM.
    w10 = jnp.asarray(w1[:, 0], jnp.float32).reshape(H)
    w11 = jnp.asarray(w1[:, 1], jnp.float32).reshape(H)
    b1f = jnp.asarray(b1, jnp.float32).reshape(H)
    w2f = jnp.asarray(w2, jnp.float32).reshape(H)
    b2f = jnp.asarray(b2, jnp.float32).reshape(1)

    # Row-tile size: big enough to amortize per-step overhead, multiple of the
    # strip, and capped at ~half the rows so a 2-TC chip (v7x) gets >=2 blocks.
    tr = min(int(tile_rows), rows_pad)
    tr = max(strip, (tr // strip) * strip)
    if rows_pad >= 2 * strip:
        tr = min(tr, max(strip, (rows_pad // (2 * strip)) * strip))
    num_blocks = pl.cdiv(rows_pad, tr)

    smem = pl.BlockSpec(memory_space=pltpu.MemorySpace.SMEM)
    out = pl.pallas_call(
        functools.partial(_mlp_kernel, hidden=H, strip=strip),
        out_shape=jax.ShapeDtypeStruct((rows_pad, _LANE), jnp.float32),
        grid_spec=pltpu.PrefetchScalarGridSpec(
            num_scalar_prefetch=0,
            grid=(num_blocks,),
            in_specs=[
                pl.BlockSpec((tr, _LANE), lambda i: (i, 0)),   # x0 plane tile
                pl.BlockSpec((tr, _LANE), lambda i: (i, 0)),   # x1 plane tile
                smem, smem, smem, smem, smem,                  # w10,w11,b1,w2,b2
            ],
            out_specs=pl.BlockSpec((tr, _LANE), lambda i: (i, 0)),
        ),
        compiler_params=pltpu.CompilerParams(
            dimension_semantics=("parallel",),
            vmem_limit_bytes=32 * 1024 * 1024,
        ),
    )(x0, x1, w10, w11, b1f, w2f, b2f)

    # Back to (B, 1), dropping the batch padding.
    return out.reshape(rows_pad * _LANE)[:B].reshape(B, 1)


def init_params(key):
    """PyTorch nn.Linear default init (uniform +/- 1/sqrt(fan_in)), torch layouts."""
    k1, k2, k3, k4 = jax.random.split(key, 4)
    bound1 = 1.0 / jnp.sqrt(2.0)
    bound2 = 1.0 / jnp.sqrt(50.0)
    w1 = jax.random.uniform(k1, (50, 2), jnp.float32, -bound1, bound1)
    b1 = jax.random.uniform(k2, (50,), jnp.float32, -bound1, bound1)
    w2 = jax.random.uniform(k3, (1, 50), jnp.float32, -bound2, bound2)
    b2 = jax.random.uniform(k4, (1,), jnp.float32, -bound2, bound2)
    return w1, b1, w2, b2


def _reference(x, w1, b1, w2, b2):
    # torch semantics: x @ W^T + b
    return jnp.maximum(x @ w1.T + b1[None, :], 0.0) @ w2.T + b2[None, :]


if __name__ == "__main__":
    key = jax.random.PRNGKey(0)
    kx, kp = jax.random.split(key)
    w1, b1, w2, b2 = init_params(kp)

    # Small batch (single block, single strip).
    batch = 8
    x = jax.random.normal(kx, (batch, 2), dtype=jnp.float32)
    out = jax.block_until_ready(lambda_approximator_forward(x, w1, b1, w2, b2))
    ref = _reference(x, w1, b1, w2, b2)
    assert out.shape == (batch, 1)
    assert jnp.allclose(out, ref, atol=2e-5, rtol=1e-5)

    # Larger batch: 3 grid blocks including a partial final block.
    big = 17000
    xb = jax.random.normal(kx, (big, 2), dtype=jnp.float32)
    outb = jax.block_until_ready(lambda_approximator_forward(xb, w1, b1, w2, b2))
    refb = _reference(xb, w1, b1, w2, b2)
    assert outb.shape == (big, 1)
    assert jnp.allclose(outb, refb, atol=2e-5, rtol=1e-5)

    print("KERNEL_OK")
</pallas_src>

<mosaic_0001>
module attributes {stable_mosaic.version = 11 : i64} {
  func.func @_mlp_kernel(%arg0: i32, %arg1: memref<32x128xf32, #tpu.memory_space<vmem>>, %arg2: memref<32x128xf32, #tpu.memory_space<vmem>>, %arg3: memref<50xf32, #tpu.memory_space<smem>>, %arg4: memref<50xf32, #tpu.memory_space<smem>>, %arg5: memref<50xf32, #tpu.memory_space<smem>>, %arg6: memref<50xf32, #tpu.memory_space<smem>>, %arg7: memref<1xf32, #tpu.memory_space<smem>>, %arg8: memref<32x128xf32, #tpu.memory_space<vmem>>) attributes {dimension_semantics = [#tpu.dimension_semantics<parallel>], iteration_bounds = array<i64: 1>, scalar_prefetch = 0 : i64, scratch_operands = 0 : i64, tpu.core_type = #tpu.core_type<tc>, window_params = [{transform_indices = @transform_0, window_bounds = array<i64: 32, 128>}, {transform_indices = @transform_1, window_bounds = array<i64: 32, 128>}, {transform_indices = @transform_2, window_bounds = array<i64: 50>}, {transform_indices = @transform_3, window_bounds = array<i64: 50>}, {transform_indices = @transform_4, window_bounds = array<i64: 50>}, {transform_indices = @transform_5, window_bounds = array<i64: 50>}, {transform_indices = @transform_6, window_bounds = array<i64: 1>}, {transform_indices = @transform_7, window_bounds = array<i64: 32, 128>}]} {
    %c0_i32 = arith.constant 0 : i32
    %c1_i32 = arith.constant 1 : i32
    %0 = arith.muli %c0_i32, %c1_i32 : i32
    %c0_i32_0 = arith.constant 0 : i32
    %1 = arith.addi %c0_i32_0, %0 : i32
    %c32_i32 = arith.constant 32 : i32
    %2 = arith.muli %1, %c32_i32 : i32
    %3 = tpu.assume_multiple %2, 32 : i32
    %4 = arith.index_cast %3 : i32 to index
    %c0 = arith.constant 0 : index
    %5 = vector.load %arg1[%4, %c0] : memref<32x128xf32, #tpu.memory_space<vmem>>, vector<32x128xf32>
    %6 = arith.index_cast %3 : i32 to index
    %c0_1 = arith.constant 0 : index
    %7 = vector.load %arg2[%6, %c0_1] : memref<32x128xf32, #tpu.memory_space<vmem>>, vector<32x128xf32>
    %c0_2 = arith.constant 0 : index
    %8 = memref.load %arg7[%c0_2] : memref<1xf32, #tpu.memory_space<smem>>
    %9 = vector.broadcast %8 : f32 to vector<32x128xf32>
    %c0_i32_3 = arith.constant 0 : i32
    %10 = arith.index_cast %c0_i32_3 : i32 to index
    %11 = memref.load %arg3[%10] : memref<50xf32, #tpu.memory_space<smem>>
    %12 = vector.broadcast %11 : f32 to vector<32x128xf32>
    %13 = arith.mulf %12, %5 : vector<32x128xf32>
    %14 = arith.index_cast %c0_i32_3 : i32 to index
    %15 = memref.load %arg4[%14] : memref<50xf32, #tpu.memory_space<smem>>
    %16 = vector.broadcast %15 : f32 to vector<32x128xf32>
    %17 = arith.mulf %16, %7 : vector<32x128xf32>
    %18 = arith.addf %13, %17 : vector<32x128xf32>
    %19 = arith.index_cast %c0_i32_3 : i32 to index
    %20 = memref.load %arg5[%19] : memref<50xf32, #tpu.memory_space<smem>>
    %21 = vector.broadcast %20 : f32 to vector<32x128xf32>
    %22 = arith.addf %18, %21 : vector<32x128xf32>
    %23 = arith.index_cast %c0_i32_3 : i32 to index
    %24 = memref.load %arg6[%23] : memref<50xf32, #tpu.memory_space<smem>>
    %cst = arith.constant 0.000000e+00 : f32
    %25 = vector.broadcast %cst : f32 to vector<32x128xf32>
    %26 = arith.maximumf %22, %25 : vector<32x128xf32>
    %27 = vector.broadcast %24 : f32 to vector<32x128xf32>
    %28 = arith.mulf %27, %26 : vector<32x128xf32>
    %29 = arith.addf %9, %28 : vector<32x128xf32>
    %c1_i32_4 = arith.constant 1 : i32
    %30 = arith.index_cast %c1_i32_4 : i32 to index
    %31 = memref.load %arg3[%30] : memref<50xf32, #tpu.memory_space<smem>>
    %32 = vector.broadcast %31 : f32 to vector<32x128xf32>
    %33 = arith.mulf %32, %5 : vector<32x128xf32>
    %34 = arith.index_cast %c1_i32_4 : i32 to index
    %35 = memref.load %arg4[%34] : memref<50xf32, #tpu.memory_space<smem>>
    %36 = vector.broadcast %35 : f32 to vector<32x128xf32>
    %37 = arith.mulf %36, %7 : vector<32x128xf32>
    %38 = arith.addf %33, %37 : vector<32x128xf32>
    %39 = arith.index_cast %c1_i32_4 : i32 to index
    %40 = memref.load %arg5[%39] : memref<50xf32, #tpu.memory_space<smem>>
    %41 = vector.broadcast %40 : f32 to vector<32x128xf32>
    %42 = arith.addf %38, %41 : vector<32x128xf32>
    %43 = arith.index_cast %c1_i32_4 : i32 to index
    %44 = memref.load %arg6[%43] : memref<50xf32, #tpu.memory_space<smem>>
    %cst_5 = arith.constant 0.000000e+00 : f32
    %45 = vector.broadcast %cst_5 : f32 to vector<32x128xf32>
    %46 = arith.maximumf %42, %45 : vector<32x128xf32>
    %47 = vector.broadcast %44 : f32 to vector<32x128xf32>
    %48 = arith.mulf %47, %46 : vector<32x128xf32>
    %49 = arith.addf %29, %48 : vector<32x128xf32>
    %c2_i32 = arith.constant 2 : i32
    %50 = arith.index_cast %c2_i32 : i32 to index
    %51 = memref.load %arg3[%50] : memref<50xf32, #tpu.memory_space<smem>>
    %52 = vector.broadcast %51 : f32 to vector<32x128xf32>
    %53 = arith.mulf %52, %5 : vector<32x128xf32>
    %54 = arith.index_cast %c2_i32 : i32 to index
    %55 = memref.load %arg4[%54] : memref<50xf32, #tpu.memory_space<smem>>
    %56 = vector.broadcast %55 : f32 to vector<32x128xf32>
    %57 = arith.mulf %56, %7 : vector<32x128xf32>
    %58 = arith.addf %53, %57 : vector<32x128xf32>
    %59 = arith.index_cast %c2_i32 : i32 to index
    %60 = memref.load %arg5[%59] : memref<50xf32, #tpu.memory_space<smem>>
    %61 = vector.broadcast %60 : f32 to vector<32x128xf32>
    %62 = arith.addf %58, %61 : vector<32x128xf32>
    %63 = arith.index_cast %c2_i32 : i32 to index
    %64 = memref.load %arg6[%63] : memref<50xf32, #tpu.memory_space<smem>>
    %cst_6 = arith.constant 0.000000e+00 : f32
    %65 = vector.broadcast %cst_6 : f32 to vector<32x128xf32>
    %66 = arith.maximumf %62, %65 : vector<32x128xf32>
    %67 = vector.broadcast %64 : f32 to vector<32x128xf32>
    %68 = arith.mulf %67, %66 : vector<32x128xf32>
    %69 = arith.addf %49, %68 : vector<32x128xf32>
    %c3_i32 = arith.constant 3 : i32
    %70 = arith.index_cast %c3_i32 : i32 to index
    %71 = memref.load %arg3[%70] : memref<50xf32, #tpu.memory_space<smem>>
    %72 = vector.broadcast %71 : f32 to vector<32x128xf32>
    %73 = arith.mulf %72, %5 : vector<32x128xf32>
    %74 = arith.index_cast %c3_i32 : i32 to index
    %75 = memref.load %arg4[%74] : memref<50xf32, #tpu.memory_space<smem>>
    %76 = vector.broadcast %75 : f32 to vector<32x128xf32>
    %77 = arith.mulf %76, %7 : vector<32x128xf32>
    %78 = arith.addf %73, %77 : vector<32x128xf32>
    %79 = arith.index_cast %c3_i32 : i32 to index
    %80 = memref.load %arg5[%79] : memref<50xf32, #tpu.memory_space<smem>>
    %81 = vector.broadcast %80 : f32 to vector<32x128xf32>
    %82 = arith.addf %78, %81 : vector<32x128xf32>
    %83 = arith.index_cast %c3_i32 : i32 to index
    %84 = memref.load %arg6[%83] : memref<50xf32, #tpu.memory_space<smem>>
    %cst_7 = arith.constant 0.000000e+00 : f32
    %85 = vector.broadcast %cst_7 : f32 to vector<32x128xf32>
    %86 = arith.maximumf %82, %85 : vector<32x128xf32>
    %87 = vector.broadcast %84 : f32 to vector<32x128xf32>
    %88 = arith.mulf %87, %86 : vector<32x128xf32>
    %89 = arith.addf %69, %88 : vector<32x128xf32>
    %c4_i32 = arith.constant 4 : i32
    %90 = arith.index_cast %c4_i32 : i32 to index
    %91 = memref.load %arg3[%90] : memref<50xf32, #tpu.memory_space<smem>>
    %92 = vector.broadcast %91 : f32 to vector<32x128xf32>
    %93 = arith.mulf %92, %5 : vector<32x128xf32>
    %94 = arith.index_cast %c4_i32 : i32 to index
    %95 = memref.load %arg4[%94] : memref<50xf32, #tpu.memory_space<smem>>
    %96 = vector.broadcast %95 : f32 to vector<32x128xf32>
    %97 = arith.mulf %96, %7 : vector<32x128xf32>
    %98 = arith.addf %93, %97 : vector<32x128xf32>
    %99 = arith.index_cast %c4_i32 : i32 to index
    %100 = memref.load %arg5[%99] : memref<50xf32, #tpu.memory_space<smem>>
    %101 = vector.broadcast %100 : f32 to vector<32x128xf32>
    %102 = arith.addf %98, %101 : vector<32x128xf32>
    %103 = arith.index_cast %c4_i32 : i32 to index
    %104 = memref.load %arg6[%103] : memref<50xf32, #tpu.memory_space<smem>>
    %cst_8 = arith.constant 0.000000e+00 : f32
    %105 = vector.broadcast %cst_8 : f32 to vector<32x128xf32>
    %106 = arith.maximumf %102, %105 : vector<32x128xf32>
    %107 = vector.broadcast %104 : f32 to vector<32x128xf32>
    %108 = arith.mulf %107, %106 : vector<32x128xf32>
    %109 = arith.addf %89, %108 : vector<32x128xf32>
    %c5_i32 = arith.constant 5 : i32
    %110 = arith.index_cast %c5_i32 : i32 to index
    %111 = memref.load %arg3[%110] : memref<50xf32, #tpu.memory_space<smem>>
    %112 = vector.broadcast %111 : f32 to vector<32x128xf32>
    %113 = arith.mulf %112, %5 : vector<32x128xf32>
    %114 = arith.index_cast %c5_i32 : i32 to index
    %115 = memref.load %arg4[%114] : memref<50xf32, #tpu.memory_space<smem>>
    %116 = vector.broadcast %115 : f32 to vector<32x128xf32>
    %117 = arith.mulf %116, %7 : vector<32x128xf32>
    %118 = arith.addf %113, %117 : vector<32x128xf32>
    %119 = arith.index_cast %c5_i32 : i32 to index
    %120 = memref.load %arg5[%119] : memref<50xf32, #tpu.memory_space<smem>>
    %121 = vector.broadcast %120 : f32 to vector<32x128xf32>
    %122 = arith.addf %118, %121 : vector<32x128xf32>
    %123 = arith.index_cast %c5_i32 : i32 to index
    %124 = memref.load %arg6[%123] : memref<50xf32, #tpu.memory_space<smem>>
    %cst_9 = arith.constant 0.000000e+00 : f32
    %125 = vector.broadcast %cst_9 : f32 to vector<32x128xf32>
    %126 = arith.maximumf %122, %125 : vector<32x128xf32>
    %127 = vector.broadcast %124 : f32 to vector<32x128xf32>
    %128 = arith.mulf %127, %126 : vector<32x128xf32>
    %129 = arith.addf %109, %128 : vector<32x128xf32>
    %c6_i32 = arith.constant 6 : i32
    %130 = arith.index_cast %c6_i32 : i32 to index
    %131 = memref.load %arg3[%130] : memref<50xf32, #tpu.memory_space<smem>>
    %132 = vector.broadcast %131 : f32 to vector<32x128xf32>
    %133 = arith.mulf %132, %5 : vector<32x128xf32>
    %134 = arith.index_cast %c6_i32 : i32 to index
    %135 = memref.load %arg4[%134] : memref<50xf32, #tpu.memory_space<smem>>
    %136 = vector.broadcast %135 : f32 to vector<32x128xf32>
    %137 = arith.mulf %136, %7 : vector<32x128xf32>
    %138 = arith.addf %133, %137 : vector<32x128xf32>
    %139 = arith.index_cast %c6_i32 : i32 to index
    %140 = memref.load %arg5[%139] : memref<50xf32, #tpu.memory_space<smem>>
    %141 = vector.broadcast %140 : f32 to vector<32x128xf32>
    %142 = arith.addf %138, %141 : vector<32x128xf32>
    %143 = arith.index_cast %c6_i32 : i32 to index
    %144 = memref.load %arg6[%143] : memref<50xf32, #tpu.memory_space<smem>>
    %cst_10 = arith.constant 0.000000e+00 : f32
    %145 = vector.broadcast %cst_10 : f32 to vector<32x128xf32>
    %146 = arith.maximumf %142, %145 : vector<32x128xf32>
    %147 = vector.broadcast %144 : f32 to vector<32x128xf32>
    %148 = arith.mulf %147, %146 : vector<32x128xf32>
    %149 = arith.addf %129, %148 : vector<32x128xf32>
    %c7_i32 = arith.constant 7 : i32
    %150 = arith.index_cast %c7_i32 : i32 to index
    %151 = memref.load %arg3[%150] : memref<50xf32, #tpu.memory_space<smem>>
    %152 = vector.broadcast %151 : f32 to vector<32x128xf32>
    %153 = arith.mulf %152, %5 : vector<32x128xf32>
    %154 = arith.index_cast %c7_i32 : i32 to index
    %155 = memref.load %arg4[%154] : memref<50xf32, #tpu.memory_space<smem>>
    %156 = vector.broadcast %155 : f32 to vector<32x128xf32>
    %157 = arith.mulf %156, %7 : vector<32x128xf32>
    %158 = arith.addf %153, %157 : vector<32x128xf32>
    %159 = arith.index_cast %c7_i32 : i32 to index
    %160 = memref.load %arg5[%159] : memref<50xf32, #tpu.memory_space<smem>>
    %161 = vector.broadcast %160 : f32 to vector<32x128xf32>
    %162 = arith.addf %158, %161 : vector<32x128xf32>
    %163 = arith.index_cast %c7_i32 : i32 to index
    %164 = memref.load %arg6[%163] : memref<50xf32, #tpu.memory_space<smem>>
    %cst_11 = arith.constant 0.000000e+00 : f32
    %165 = vector.broadcast %cst_11 : f32 to vector<32x128xf32>
    %166 = arith.maximumf %162, %165 : vector<32x128xf32>
    %167 = vector.broadcast %164 : f32 to vector<32x128xf32>
    %168 = arith.mulf %167, %166 : vector<32x128xf32>
    %169 = arith.addf %149, %168 : vector<32x128xf32>
    %c8_i32 = arith.constant 8 : i32
    %170 = arith.index_cast %c8_i32 : i32 to index
    %171 = memref.load %arg3[%170] : memref<50xf32, #tpu.memory_space<smem>>
    %172 = vector.broadcast %171 : f32 to vector<32x128xf32>
    %173 = arith.mulf %172, %5 : vector<32x128xf32>
    %174 = arith.index_cast %c8_i32 : i32 to index
    %175 = memref.load %arg4[%174] : memref<50xf32, #tpu.memory_space<smem>>
    %176 = vector.broadcast %175 : f32 to vector<32x128xf32>
    %177 = arith.mulf %176, %7 : vector<32x128xf32>
    %178 = arith.addf %173, %177 : vector<32x128xf32>
    %179 = arith.index_cast %c8_i32 : i32 to index
    %180 = memref.load %arg5[%179] : memref<50xf32, #tpu.memory_space<smem>>
    %181 = vector.broadcast %180 : f32 to vector<32x128xf32>
    %182 = arith.addf %178, %181 : vector<32x128xf32>
    %183 = arith.index_cast %c8_i32 : i32 to index
    %184 = memref.load %arg6[%183] : memref<50xf32, #tpu.memory_space<smem>>
    %cst_12 = arith.constant 0.000000e+00 : f32
    %185 = vector.broadcast %cst_12 : f32 to vector<32x128xf32>
    %186 = arith.maximumf %182, %185 : vector<32x128xf32>
    %187 = vector.broadcast %184 : f32 to vector<32x128xf32>
    %188 = arith.mulf %187, %186 : vector<32x128xf32>
    %189 = arith.addf %169, %188 : vector<32x128xf32>
    %c9_i32 = arith.constant 9 : i32
    %190 = arith.index_cast %c9_i32 : i32 to index
    %191 = memref.load %arg3[%190] : memref<50xf32, #tpu.memory_space<smem>>
    %192 = vector.broadcast %191 : f32 to vector<32x128xf32>
    %193 = arith.mulf %192, %5 : vector<32x128xf32>
    %194 = arith.index_cast %c9_i32 : i32 to index
    %195 = memref.load %arg4[%194] : memref<50xf32, #tpu.memory_space<smem>>
    %196 = vector.broadcast %195 : f32 to vector<32x128xf32>
    %197 = arith.mulf %196, %7 : vector<32x128xf32>
    %198 = arith.addf %193, %197 : vector<32x128xf32>
    %199 = arith.index_cast %c9_i32 : i32 to index
    %200 = memref.load %arg5[%199] : memref<50xf32, #tpu.memory_space<smem>>
    %201 = vector.broadcast %200 : f32 to vector<32x128xf32>
    %202 = arith.addf %198, %201 : vector<32x128xf32>
    %203 = arith.index_cast %c9_i32 : i32 to index
    %204 = memref.load %arg6[%203] : memref<50xf32, #tpu.memory_space<smem>>
    %cst_13 = arith.constant 0.000000e+00 : f32
    %205 = vector.broadcast %cst_13 : f32 to vector<32x128xf32>
    %206 = arith.maximumf %202, %205 : vector<32x128xf32>
    %207 = vector.broadcast %204 : f32 to vector<32x128xf32>
    %208 = arith.mulf %207, %206 : vector<32x128xf32>
    %209 = arith.addf %189, %208 : vector<32x128xf32>
    %c10_i32 = arith.constant 10 : i32
    %210 = arith.index_cast %c10_i32 : i32 to index
    %211 = memref.load %arg3[%210] : memref<50xf32, #tpu.memory_space<smem>>
    %212 = vector.broadcast %211 : f32 to vector<32x128xf32>
    %213 = arith.mulf %212, %5 : vector<32x128xf32>
    %214 = arith.index_cast %c10_i32 : i32 to index
    %215 = memref.load %arg4[%214] : memref<50xf32, #tpu.memory_space<smem>>
    %216 = vector.broadcast %215 : f32 to vector<32x128xf32>
    %217 = arith.mulf %216, %7 : vector<32x128xf32>
    %218 = arith.addf %213, %217 : vector<32x128xf32>
    %219 = arith.index_cast %c10_i32 : i32 to index
    %220 = memref.load %arg5[%219] : memref<50xf32, #tpu.memory_space<smem>>
    %221 = vector.broadcast %220 : f32 to vector<32x128xf32>
    %222 = arith.addf %218, %221 : vector<32x128xf32>
    %223 = arith.index_cast %c10_i32 : i32 to index
    %224 = memref.load %arg6[%223] : memref<50xf32, #tpu.memory_space<smem>>
    %cst_14 = arith.constant 0.000000e+00 : f32
    %225 = vector.broadcast %cst_14 : f32 to vector<32x128xf32>
    %226 = arith.maximumf %222, %225 : vector<32x128xf32>
    %227 = vector.broadcast %224 : f32 to vector<32x128xf32>
    %228 = arith.mulf %227, %226 : vector<32x128xf32>
    %229 = arith.addf %209, %228 : vector<32x128xf32>
    %c11_i32 = arith.constant 11 : i32
    %230 = arith.index_cast %c11_i32 : i32 to index
    %231 = memref.load %arg3[%230] : memref<50xf32, #tpu.memory_space<smem>>
    %232 = vector.broadcast %231 : f32 to vector<32x128xf32>
    %233 = arith.mulf %232, %5 : vector<32x128xf32>
    %234 = arith.index_cast %c11_i32 : i32 to index
    %235 = memref.load %arg4[%234] : memref<50xf32, #tpu.memory_space<smem>>
    %236 = vector.broadcast %235 : f32 to vector<32x128xf32>
    %237 = arith.mulf %236, %7 : vector<32x128xf32>
    %238 = arith.addf %233, %237 : vector<32x128xf32>
    %239 = arith.index_cast %c11_i32 : i32 to index
    %240 = memref.load %arg5[%239] : memref<50xf32, #tpu.memory_space<smem>>
    %241 = vector.broadcast %240 : f32 to vector<32x128xf32>
    %242 = arith.addf %238, %241 : vector<32x128xf32>
    %243 = arith.index_cast %c11_i32 : i32 to index
    %244 = memref.load %arg6[%243] : memref<50xf32, #tpu.memory_space<smem>>
    %cst_15 = arith.constant 0.000000e+00 : f32
    %245 = vector.broadcast %cst_15 : f32 to vector<32x128xf32>
    %246 = arith.maximumf %242, %245 : vector<32x128xf32>
    %247 = vector.broadcast %244 : f32 to vector<32x128xf32>
    %248 = arith.mulf %247, %246 : vector<32x128xf32>
    %249 = arith.addf %229, %248 : vector<32x128xf32>
    %c12_i32 = arith.constant 12 : i32
    %250 = arith.index_cast %c12_i32 : i32 to index
    %251 = memref.load %arg3[%250] : memref<50xf32, #tpu.memory_space<smem>>
    %252 = vector.broadcast %251 : f32 to vector<32x128xf32>
    %253 = arith.mulf %252, %5 : vector<32x128xf32>
    %254 = arith.index_cast %c12_i32 : i32 to index
    %255 = memref.load %arg4[%254] : memref<50xf32, #tpu.memory_space<smem>>
    %256 = vector.broadcast %255 : f32 to vector<32x128xf32>
    %257 = arith.mulf %256, %7 : vector<32x128xf32>
    %258 = arith.addf %253, %257 : vector<32x128xf32>
    %259 = arith.index_cast %c12_i32 : i32 to index
    %260 = memref.load %arg5[%259] : memref<50xf32, #tpu.memory_space<smem>>
    %261 = vector.broadcast %260 : f32 to vector<32x128xf32>
    %262 = arith.addf %258, %261 : vector<32x128xf32>
    %263 = arith.index_cast %c12_i32 : i32 to index
    %264 = memref.load %arg6[%263] : memref<50xf32, #tpu.memory_space<smem>>
    %cst_16 = arith.constant 0.000000e+00 : f32
    %265 = vector.broadcast %cst_16 : f32 to vector<32x128xf32>
    %266 = arith.maximumf %262, %265 : vector<32x128xf32>
    %267 = vector.broadcast %264 : f32 to vector<32x128xf32>
    %268 = arith.mulf %267, %266 : vector<32x128xf32>
    %269 = arith.addf %249, %268 : vector<32x128xf32>
    %c13_i32 = arith.constant 13 : i32
    %270 = arith.index_cast %c13_i32 : i32 to index
    %271 = memref.load %arg3[%270] : memref<50xf32, #tpu.memory_space<smem>>
    %272 = vector.broadcast %271 : f32 to vector<32x128xf32>
    %273 = arith.mulf %272, %5 : vector<32x128xf32>
    %274 = arith.index_cast %c13_i32 : i32 to index
    %275 = memref.load %arg4[%274] : memref<50xf32, #tpu.memory_space<smem>>
    %276 = vector.broadcast %275 : f32 to vector<32x128xf32>
    %277 = arith.mulf %276, %7 : vector<32x128xf32>
    %278 = arith.addf %273, %277 : vector<32x128xf32>
    %279 = arith.index_cast %c13_i32 : i32 to index
    %280 = memref.load %arg5[%279] : memref<50xf32, #tpu.memory_space<smem>>
    %281 = vector.broadcast %280 : f32 to vector<32x128xf32>
    %282 = arith.addf %278, %281 : vector<32x128xf32>
    %283 = arith.index_cast %c13_i32 : i32 to index
    %284 = memref.load %arg6[%283] : memref<50xf32, #tpu.memory_space<smem>>
    %cst_17 = arith.constant 0.000000e+00 : f32
    %285 = vector.broadcast %cst_17 : f32 to vector<32x128xf32>
    %286 = arith.maximumf %282, %285 : vector<32x128xf32>
    %287 = vector.broadcast %284 : f32 to vector<32x128xf32>
    %288 = arith.mulf %287, %286 : vector<32x128xf32>
    %289 = arith.addf %269, %288 : vector<32x128xf32>
    %c14_i32 = arith.constant 14 : i32
    %290 = arith.index_cast %c14_i32 : i32 to index
    %291 = memref.load %arg3[%290] : memref<50xf32, #tpu.memory_space<smem>>
    %292 = vector.broadcast %291 : f32 to vector<32x128xf32>
    %293 = arith.mulf %292, %5 : vector<32x128xf32>
    %294 = arith.index_cast %c14_i32 : i32 to index
    %295 = memref.load %arg4[%294] : memref<50xf32, #tpu.memory_space<smem>>
    %296 = vector.broadcast %295 : f32 to vector<32x128xf32>
    %297 = arith.mulf %296, %7 : vector<32x128xf32>
    %298 = arith.addf %293, %297 : vector<32x128xf32>
    %299 = arith.index_cast %c14_i32 : i32 to index
    %300 = memref.load %arg5[%299] : memref<50xf32, #tpu.memory_space<smem>>
    %301 = vector.broadcast %300 : f32 to vector<32x128xf32>
    %302 = arith.addf %298, %301 : vector<32x128xf32>
    %303 = arith.index_cast %c14_i32 : i32 to index
    %304 = memref.load %arg6[%303] : memref<50xf32, #tpu.memory_space<smem>>
    %cst_18 = arith.constant 0.000000e+00 : f32
    %305 = vector.broadcast %cst_18 : f32 to vector<32x128xf32>
    %306 = arith.maximumf %302, %305 : vector<32x128xf32>
    %307 = vector.broadcast %304 : f32 to vector<32x128xf32>
    %308 = arith.mulf %307, %306 : vector<32x128xf32>
    %309 = arith.addf %289, %308 : vector<32x128xf32>
    %c15_i32 = arith.constant 15 : i32
    %310 = arith.index_cast %c15_i32 : i32 to index
    %311 = memref.load %arg3[%310] : memref<50xf32, #tpu.memory_space<smem>>
    %312 = vector.broadcast %311 : f32 to vector<32x128xf32>
    %313 = arith.mulf %312, %5 : vector<32x128xf32>
    %314 = arith.index_cast %c15_i32 : i32 to index
    %315 = memref.load %arg4[%314] : memref<50xf32, #tpu.memory_space<smem>>
    %316 = vector.broadcast %315 : f32 to vector<32x128xf32>
    %317 = arith.mulf %316, %7 : vector<32x128xf32>
    %318 = arith.addf %313, %317 : vector<32x128xf32>
    %319 = arith.index_cast %c15_i32 : i32 to index
    %320 = memref.load %arg5[%319] : memref<50xf32, #tpu.memory_space<smem>>
    %321 = vector.broadcast %320 : f32 to vector<32x128xf32>
    %322 = arith.addf %318, %321 : vector<32x128xf32>
    %323 = arith.index_cast %c15_i32 : i32 to index
    %324 = memref.load %arg6[%323] : memref<50xf32, #tpu.memory_space<smem>>
    %cst_19 = arith.constant 0.000000e+00 : f32
    %325 = vector.broadcast %cst_19 : f32 to vector<32x128xf32>
    %326 = arith.maximumf %322, %325 : vector<32x128xf32>
    %327 = vector.broadcast %324 : f32 to vector<32x128xf32>
    %328 = arith.mulf %327, %326 : vector<32x128xf32>
    %329 = arith.addf %309, %328 : vector<32x128xf32>
    %c16_i32 = arith.constant 16 : i32
    %330 = arith.index_cast %c16_i32 : i32 to index
    %331 = memref.load %arg3[%330] : memref<50xf32, #tpu.memory_space<smem>>
    %332 = vector.broadcast %331 : f32 to vector<32x128xf32>
    %333 = arith.mulf %332, %5 : vector<32x128xf32>
    %334 = arith.index_cast %c16_i32 : i32 to index
    %335 = memref.load %arg4[%334] : memref<50xf32, #tpu.memory_space<smem>>
    %336 = vector.broadcast %335 : f32 to vector<32x128xf32>
    %337 = arith.mulf %336, %7 : vector<32x128xf32>
    %338 = arith.addf %333, %337 : vector<32x128xf32>
    %339 = arith.index_cast %c16_i32 : i32 to index
    %340 = memref.load %arg5[%339] : memref<50xf32, #tpu.memory_space<smem>>
    %341 = vector.broadcast %340 : f32 to vector<32x128xf32>
    %342 = arith.addf %338, %341 : vector<32x128xf32>
    %343 = arith.index_cast %c16_i32 : i32 to index
    %344 = memref.load %arg6[%343] : memref<50xf32, #tpu.memory_space<smem>>
    %cst_20 = arith.constant 0.000000e+00 : f32
    %345 = vector.broadcast %cst_20 : f32 to vector<32x128xf32>
    %346 = arith.maximumf %342, %345 : vector<32x128xf32>
    %347 = vector.broadcast %344 : f32 to vector<32x128xf32>
    %348 = arith.mulf %347, %346 : vector<32x128xf32>
    %349 = arith.addf %329, %348 : vector<32x128xf32>
    %c17_i32 = arith.constant 17 : i32
    %350 = arith.index_cast %c17_i32 : i32 to index
    %351 = memref.load %arg3[%350] : memref<50xf32, #tpu.memory_space<smem>>
    %352 = vector.broadcast %351 : f32 to vector<32x128xf32>
    %353 = arith.mulf %352, %5 : vector<32x128xf32>
    %354 = arith.index_cast %c17_i32 : i32 to index
    %355 = memref.load %arg4[%354] : memref<50xf32, #tpu.memory_space<smem>>
    %356 = vector.broadcast %355 : f32 to vector<32x128xf32>
    %357 = arith.mulf %356, %7 : vector<32x128xf32>
    %358 = arith.addf %353, %357 : vector<32x128xf32>
    %359 = arith.index_cast %c17_i32 : i32 to index
    %360 = memref.load %arg5[%359] : memref<50xf32, #tpu.memory_space<smem>>
    %361 = vector.broadcast %360 : f32 to vector<32x128xf32>
    %362 = arith.addf %358, %361 : vector<32x128xf32>
    %363 = arith.index_cast %c17_i32 : i32 to index
    %364 = memref.load %arg6[%363] : memref<50xf32, #tpu.memory_space<smem>>
    %cst_21 = arith.constant 0.000000e+00 : f32
    %365 = vector.broadcast %cst_21 : f32 to vector<32x128xf32>
    %366 = arith.maximumf %362, %365 : vector<32x128xf32>
    %367 = vector.broadcast %364 : f32 to vector<32x128xf32>
    %368 = arith.mulf %367, %366 : vector<32x128xf32>
    %369 = arith.addf %349, %368 : vector<32x128xf32>
    %c18_i32 = arith.constant 18 : i32
    %370 = arith.index_cast %c18_i32 : i32 to index
    %371 = memref.load %arg3[%370] : memref<50xf32, #tpu.memory_space<smem>>
    %372 = vector.broadcast %371 : f32 to vector<32x128xf32>
    %373 = arith.mulf %372, %5 : vector<32x128xf32>
    %374 = arith.index_cast %c18_i32 : i32 to index
    %375 = memref.load %arg4[%374] : memref<50xf32, #tpu.memory_space<smem>>
    %376 = vector.broadcast %375 : f32 to vector<32x128xf32>
    %377 = arith.mulf %376, %7 : vector<32x128xf32>
    %378 = arith.addf %373, %377 : vector<32x128xf32>
    %379 = arith.index_cast %c18_i32 : i32 to index
    %380 = memref.load %arg5[%379] : memref<50xf32, #tpu.memory_space<smem>>
    %381 = vector.broadcast %380 : f32 to vector<32x128xf32>
    %382 = arith.addf %378, %381 : vector<32x128xf32>
    %383 = arith.index_cast %c18_i32 : i32 to index
    %384 = memref.load %arg6[%383] : memref<50xf32, #tpu.memory_space<smem>>
    %cst_22 = arith.constant 0.000000e+00 : f32
    %385 = vector.broadcast %cst_22 : f32 to vector<32x128xf32>
    %386 = arith.maximumf %382, %385 : vector<32x128xf32>
    %387 = vector.broadcast %384 : f32 to vector<32x128xf32>
    %388 = arith.mulf %387, %386 : vector<32x128xf32>
    %389 = arith.addf %369, %388 : vector<32x128xf32>
    %c19_i32 = arith.constant 19 : i32
    %390 = arith.index_cast %c19_i32 : i32 to index
    %391 = memref.load %arg3[%390] : memref<50xf32, #tpu.memory_space<smem>>
    %392 = vector.broadcast %391 : f32 to vector<32x128xf32>
    %393 = arith.mulf %392, %5 : vector<32x128xf32>
    %394 = arith.index_cast %c19_i32 : i32 to index
    %395 = memref.load %arg4[%394] : memref<50xf32, #tpu.memory_space<smem>>
    %396 = vector.broadcast %395 : f32 to vector<32x128xf32>
    %397 = arith.mulf %396, %7 : vector<32x128xf32>
    %398 = arith.addf %393, %397 : vector<32x128xf32>
    %399 = arith.index_cast %c19_i32 : i32 to index
    %400 = memref.load %arg5[%399] : memref<50xf32, #tpu.memory_space<smem>>
    %401 = vector.broadcast %400 : f32 to vector<32x128xf32>
    %402 = arith.addf %398, %401 : vector<32x128xf32>
    %403 = arith.index_cast %c19_i32 : i32 to index
    %404 = memref.load %arg6[%403] : memref<50xf32, #tpu.memory_space<smem>>
    %cst_23 = arith.constant 0.000000e+00 : f32
    %405 = vector.broadcast %cst_23 : f32 to vector<32x128xf32>
    %406 = arith.maximumf %402, %405 : vector<32x128xf32>
    %407 = vector.broadcast %404 : f32 to vector<32x128xf32>
    %408 = arith.mulf %407, %406 : vector<32x128xf32>
    %409 = arith.addf %389, %408 : vector<32x128xf32>
    %c20_i32 = arith.constant 20 : i32
    %410 = arith.index_cast %c20_i32 : i32 to index
    %411 = memref.load %arg3[%410] : memref<50xf32, #tpu.memory_space<smem>>
    %412 = vector.broadcast %411 : f32 to vector<32x128xf32>
    %413 = arith.mulf %412, %5 : vector<32x128xf32>
    %414 = arith.index_cast %c20_i32 : i32 to index
    %415 = memref.load %arg4[%414] : memref<50xf32, #tpu.memory_space<smem>>
    %416 = vector.broadcast %415 : f32 to vector<32x128xf32>
    %417 = arith.mulf %416, %7 : vector<32x128xf32>
    %418 = arith.addf %413, %417 : vector<32x128xf32>
    %419 = arith.index_cast %c20_i32 : i32 to index
    %420 = memref.load %arg5[%419] : memref<50xf32, #tpu.memory_space<smem>>
    %421 = vector.broadcast %420 : f32 to vector<32x128xf32>
    %422 = arith.addf %418, %421 : vector<32x128xf32>
    %423 = arith.index_cast %c20_i32 : i32 to index
    %424 = memref.load %arg6[%423] : memref<50xf32, #tpu.memory_space<smem>>
    %cst_24 = arith.constant 0.000000e+00 : f32
    %425 = vector.broadcast %cst_24 : f32 to vector<32x128xf32>
    %426 = arith.maximumf %422, %425 : vector<32x128xf32>
    %427 = vector.broadcast %424 : f32 to vector<32x128xf32>
    %428 = arith.mulf %427, %426 : vector<32x128xf32>
    %429 = arith.addf %409, %428 : vector<32x128xf32>
    %c21_i32 = arith.constant 21 : i32
    %430 = arith.index_cast %c21_i32 : i32 to index
    %431 = memref.load %arg3[%430] : memref<50xf32, #tpu.memory_space<smem>>
    %432 = vector.broadcast %431 : f32 to vector<32x128xf32>
    %433 = arith.mulf %432, %5 : vector<32x128xf32>
    %434 = arith.index_cast %c21_i32 : i32 to index
    %435 = memref.load %arg4[%434] : memref<50xf32, #tpu.memory_space<smem>>
    %436 = vector.broadcast %435 : f32 to vector<32x128xf32>
    %437 = arith.mulf %436, %7 : vector<32x128xf32>
    %438 = arith.addf %433, %437 : vector<32x128xf32>
    %439 = arith.index_cast %c21_i32 : i32 to index
    %440 = memref.load %arg5[%439] : memref<50xf32, #tpu.memory_space<smem>>
    %441 = vector.broadcast %440 : f32 to vector<32x128xf32>
    %442 = arith.addf %438, %441 : vector<32x128xf32>
    %443 = arith.index_cast %c21_i32 : i32 to index
    %444 = memref.load %arg6[%443] : memref<50xf32, #tpu.memory_space<smem>>
    %cst_25 = arith.constant 0.000000e+00 : f32
    %445 = vector.broadcast %cst_25 : f32 to vector<32x128xf32>
    %446 = arith.maximumf %442, %445 : vector<32x128xf32>
    %447 = vector.broadcast %444 : f32 to vector<32x128xf32>
    %448 = arith.mulf %447, %446 : vector<32x128xf32>
    %449 = arith.addf %429, %448 : vector<32x128xf32>
    %c22_i32 = arith.constant 22 : i32
    %450 = arith.index_cast %c22_i32 : i32 to index
    %451 = memref.load %arg3[%450] : memref<50xf32, #tpu.memory_space<smem>>
    %452 = vector.broadcast %451 : f32 to vector<32x128xf32>
    %453 = arith.mulf %452, %5 : vector<32x128xf32>
    %454 = arith.index_cast %c22_i32 : i32 to index
    %455 = memref.load %arg4[%454] : memref<50xf32, #tpu.memory_space<smem>>
    %456 = vector.broadcast %455 : f32 to vector<32x128xf32>
    %457 = arith.mulf %456, %7 : vector<32x128xf32>
    %458 = arith.addf %453, %457 : vector<32x128xf32>
    %459 = arith.index_cast %c22_i32 : i32 to index
    %460 = memref.load %arg5[%459] : memref<50xf32, #tpu.memory_space<smem>>
    %461 = vector.broadcast %460 : f32 to vector<32x128xf32>
    %462 = arith.addf %458, %461 : vector<32x128xf32>
    %463 = arith.index_cast %c22_i32 : i32 to index
    %464 = memref.load %arg6[%463] : memref<50xf32, #tpu.memory_space<smem>>
    %cst_26 = arith.constant 0.000000e+00 : f32
    %465 = vector.broadcast %cst_26 : f32 to vector<32x128xf32>
    %466 = arith.maximumf %462, %465 : vector<32x128xf32>
    %467 = vector.broadcast %464 : f32 to vector<32x128xf32>
    %468 = arith.mulf %467, %466 : vector<32x128xf32>
    %469 = arith.addf %449, %468 : vector<32x128xf32>
    %c23_i32 = arith.constant 23 : i32
    %470 = arith.index_cast %c23_i32 : i32 to index
    %471 = memref.load %arg3[%470] : memref<50xf32, #tpu.memory_space<smem>>
    %472 = vector.broadcast %471 : f32 to vector<32x128xf32>
    %473 = arith.mulf %472, %5 : vector<32x128xf32>
    %474 = arith.index_cast %c23_i32 : i32 to index
    %475 = memref.load %arg4[%474] : memref<50xf32, #tpu.memory_space<smem>>
    %476 = vector.broadcast %475 : f32 to vector<32x128xf32>
    %477 = arith.mulf %476, %7 : vector<32x128xf32>
    %478 = arith.addf %473, %477 : vector<32x128xf32>
    %479 = arith.index_cast %c23_i32 : i32 to index
    %480 = memref.load %arg5[%479] : memref<50xf32, #tpu.memory_space<smem>>
    %481 = vector.broadcast %480 : f32 to vector<32x128xf32>
    %482 = arith.addf %478, %481 : vector<32x128xf32>
    %483 = arith.index_cast %c23_i32 : i32 to index
    %484 = memref.load %arg6[%483] : memref<50xf32, #tpu.memory_space<smem>>
    %cst_27 = arith.constant 0.000000e+00 : f32
    %485 = vector.broadcast %cst_27 : f32 to vector<32x128xf32>
    %486 = arith.maximumf %482, %485 : vector<32x128xf32>
    %487 = vector.broadcast %484 : f32 to vector<32x128xf32>
    %488 = arith.mulf %487, %486 : vector<32x128xf32>
    %489 = arith.addf %469, %488 : vector<32x128xf32>
    %c24_i32 = arith.constant 24 : i32
    %490 = arith.index_cast %c24_i32 : i32 to index
    %491 = memref.load %arg3[%490] : memref<50xf32, #tpu.memory_space<smem>>
    %492 = vector.broadcast %491 : f32 to vector<32x128xf32>
    %493 = arith.mulf %492, %5 : vector<32x128xf32>
    %494 = arith.index_cast %c24_i32 : i32 to index
    %495 = memref.load %arg4[%494] : memref<50xf32, #tpu.memory_space<smem>>
    %496 = vector.broadcast %495 : f32 to vector<32x128xf32>
    %497 = arith.mulf %496, %7 : vector<32x128xf32>
    %498 = arith.addf %493, %497 : vector<32x128xf32>
    %499 = arith.index_cast %c24_i32 : i32 to index
    %500 = memref.load %arg5[%499] : memref<50xf32, #tpu.memory_space<smem>>
    %501 = vector.broadcast %500 : f32 to vector<32x128xf32>
    %502 = arith.addf %498, %501 : vector<32x128xf32>
    %503 = arith.index_cast %c24_i32 : i32 to index
    %504 = memref.load %arg6[%503] : memref<50xf32, #tpu.memory_space<smem>>
    %cst_28 = arith.constant 0.000000e+00 : f32
    %505 = vector.broadcast %cst_28 : f32 to vector<32x128xf32>
    %506 = arith.maximumf %502, %505 : vector<32x128xf32>
    %507 = vector.broadcast %504 : f32 to vector<32x128xf32>
    %508 = arith.mulf %507, %506 : vector<32x128xf32>
    %509 = arith.addf %489, %508 : vector<32x128xf32>
    %c25_i32 = arith.constant 25 : i32
    %510 = arith.index_cast %c25_i32 : i32 to index
    %511 = memref.load %arg3[%510] : memref<50xf32, #tpu.memory_space<smem>>
    %512 = vector.broadcast %511 : f32 to vector<32x128xf32>
    %513 = arith.mulf %512, %5 : vector<32x128xf32>
    %514 = arith.index_cast %c25_i32 : i32 to index
    %515 = memref.load %arg4[%514] : memref<50xf32, #tpu.memory_space<smem>>
    %516 = vector.broadcast %515 : f32 to vector<32x128xf32>
    %517 = arith.mulf %516, %7 : vector<32x128xf32>
    %518 = arith.addf %513, %517 : vector<32x128xf32>
    %519 = arith.index_cast %c25_i32 : i32 to index
    %520 = memref.load %arg5[%519] : memref<50xf32, #tpu.memory_space<smem>>
    %521 = vector.broadcast %520 : f32 to vector<32x128xf32>
    %522 = arith.addf %518, %521 : vector<32x128xf32>
    %523 = arith.index_cast %c25_i32 : i32 to index
    %524 = memref.load %arg6[%523] : memref<50xf32, #tpu.memory_space<smem>>
    %cst_29 = arith.constant 0.000000e+00 : f32
    %525 = vector.broadcast %cst_29 : f32 to vector<32x128xf32>
    %526 = arith.maximumf %522, %525 : vector<32x128xf32>
    %527 = vector.broadcast %524 : f32 to vector<32x128xf32>
    %528 = arith.mulf %527, %526 : vector<32x128xf32>
    %529 = arith.addf %509, %528 : vector<32x128xf32>
    %c26_i32 = arith.constant 26 : i32
    %530 = arith.index_cast %c26_i32 : i32 to index
    %531 = memref.load %arg3[%530] : memref<50xf32, #tpu.memory_space<smem>>
    %532 = vector.broadcast %531 : f32 to vector<32x128xf32>
    %533 = arith.mulf %532, %5 : vector<32x128xf32>
    %534 = arith.index_cast %c26_i32 : i32 to index
    %535 = memref.load %arg4[%534] : memref<50xf32, #tpu.memory_space<smem>>
    %536 = vector.broadcast %535 : f32 to vector<32x128xf32>
    %537 = arith.mulf %536, %7 : vector<32x128xf32>
    %538 = arith.addf %533, %537 : vector<32x128xf32>
    %539 = arith.index_cast %c26_i32 : i32 to index
    %540 = memref.load %arg5[%539] : memref<50xf32, #tpu.memory_space<smem>>
    %541 = vector.broadcast %540 : f32 to vector<32x128xf32>
    %542 = arith.addf %538, %541 : vector<32x128xf32>
    %543 = arith.index_cast %c26_i32 : i32 to index
    %544 = memref.load %arg6[%543] : memref<50xf32, #tpu.memory_space<smem>>
    %cst_30 = arith.constant 0.000000e+00 : f32
    %545 = vector.broadcast %cst_30 : f32 to vector<32x128xf32>
    %546 = arith.maximumf %542, %545 : vector<32x128xf32>
    %547 = vector.broadcast %544 : f32 to vector<32x128xf32>
    %548 = arith.mulf %547, %546 : vector<32x128xf32>
    %549 = arith.addf %529, %548 : vector<32x128xf32>
    %c27_i32 = arith.constant 27 : i32
    %550 = arith.index_cast %c27_i32 : i32 to index
    %551 = memref.load %arg3[%550] : memref<50xf32, #tpu.memory_space<smem>>
    %552 = vector.broadcast %551 : f32 to vector<32x128xf32>
    %553 = arith.mulf %552, %5 : vector<32x128xf32>
    %554 = arith.index_cast %c27_i32 : i32 to index
    %555 = memref.load %arg4[%554] : memref<50xf32, #tpu.memory_space<smem>>
    %556 = vector.broadcast %555 : f32 to vector<32x128xf32>
    %557 = arith.mulf %556, %7 : vector<32x128xf32>
    %558 = arith.addf %553, %557 : vector<32x128xf32>
    %559 = arith.index_cast %c27_i32 : i32 to index
    %560 = memref.load %arg5[%559] : memref<50xf32, #tpu.memory_space<smem>>
    %561 = vector.broadcast %560 : f32 to vector<32x128xf32>
    %562 = arith.addf %558, %561 : vector<32x128xf32>
    %563 = arith.index_cast %c27_i32 : i32 to index
    %564 = memref.load %arg6[%563] : memref<50xf32, #tpu.memory_space<smem>>
    %cst_31 = arith.constant 0.000000e+00 : f32
    %565 = vector.broadcast %cst_31 : f32 to vector<32x128xf32>
    %566 = arith.maximumf %562, %565 : vector<32x128xf32>
    %567 = vector.broadcast %564 : f32 to vector<32x128xf32>
    %568 = arith.mulf %567, %566 : vector<32x128xf32>
    %569 = arith.addf %549, %568 : vector<32x128xf32>
    %c28_i32 = arith.constant 28 : i32
    %570 = arith.index_cast %c28_i32 : i32 to index
    %571 = memref.load %arg3[%570] : memref<50xf32, #tpu.memory_space<smem>>
    %572 = vector.broadcast %571 : f32 to vector<32x128xf32>
    %573 = arith.mulf %572, %5 : vector<32x128xf32>
    %574 = arith.index_cast %c28_i32 : i32 to index
    %575 = memref.load %arg4[%574] : memref<50xf32, #tpu.memory_space<smem>>
    %576 = vector.broadcast %575 : f32 to vector<32x128xf32>
    %577 = arith.mulf %576, %7 : vector<32x128xf32>
    %578 = arith.addf %573, %577 : vector<32x128xf32>
    %579 = arith.index_cast %c28_i32 : i32 to index
    %580 = memref.load %arg5[%579] : memref<50xf32, #tpu.memory_space<smem>>
    %581 = vector.broadcast %580 : f32 to vector<32x128xf32>
    %582 = arith.addf %578, %581 : vector<32x128xf32>
    %583 = arith.index_cast %c28_i32 : i32 to index
    %584 = memref.load %arg6[%583] : memref<50xf32, #tpu.memory_space<smem>>
    %cst_32 = arith.constant 0.000000e+00 : f32
    %585 = vector.broadcast %cst_32 : f32 to vector<32x128xf32>
    %586 = arith.maximumf %582, %585 : vector<32x128xf32>
    %587 = vector.broadcast %584 : f32 to vector<32x128xf32>
    %588 = arith.mulf %587, %586 : vector<32x128xf32>
    %589 = arith.addf %569, %588 : vector<32x128xf32>
    %c29_i32 = arith.constant 29 : i32
    %590 = arith.index_cast %c29_i32 : i32 to index
    %591 = memref.load %arg3[%590] : memref<50xf32, #tpu.memory_space<smem>>
    %592 = vector.broadcast %591 : f32 to vector<32x128xf32>
    %593 = arith.mulf %592, %5 : vector<32x128xf32>
    %594 = arith.index_cast %c29_i32 : i32 to index
    %595 = memref.load %arg4[%594] : memref<50xf32, #tpu.memory_space<smem>>
    %596 = vector.broadcast %595 : f32 to vector<32x128xf32>
    %597 = arith.mulf %596, %7 : vector<32x128xf32>
    %598 = arith.addf %593, %597 : vector<32x128xf32>
    %599 = arith.index_cast %c29_i32 : i32 to index
    %600 = memref.load %arg5[%599] : memref<50xf32, #tpu.memory_space<smem>>
    %601 = vector.broadcast %600 : f32 to vector<32x128xf32>
    %602 = arith.addf %598, %601 : vector<32x128xf32>
    %603 = arith.index_cast %c29_i32 : i32 to index
    %604 = memref.load %arg6[%603] : memref<50xf32, #tpu.memory_space<smem>>
    %cst_33 = arith.constant 0.000000e+00 : f32
    %605 = vector.broadcast %cst_33 : f32 to vector<32x128xf32>
    %606 = arith.maximumf %602, %605 : vector<32x128xf32>
    %607 = vector.broadcast %604 : f32 to vector<32x128xf32>
    %608 = arith.mulf %607, %606 : vector<32x128xf32>
    %609 = arith.addf %589, %608 : vector<32x128xf32>
    %c30_i32 = arith.constant 30 : i32
    %610 = arith.index_cast %c30_i32 : i32 to index
    %611 = memref.load %arg3[%610] : memref<50xf32, #tpu.memory_space<smem>>
    %612 = vector.broadcast %611 : f32 to vector<32x128xf32>
    %613 = arith.mulf %612, %5 : vector<32x128xf32>
    %614 = arith.index_cast %c30_i32 : i32 to index
    %615 = memref.load %arg4[%614] : memref<50xf32, #tpu.memory_space<smem>>
    %616 = vector.broadcast %615 : f32 to vector<32x128xf32>
    %617 = arith.mulf %616, %7 : vector<32x128xf32>
    %618 = arith.addf %613, %617 : vector<32x128xf32>
    %619 = arith.index_cast %c30_i32 : i32 to index
    %620 = memref.load %arg5[%619] : memref<50xf32, #tpu.memory_space<smem>>
    %621 = vector.broadcast %620 : f32 to vector<32x128xf32>
    %622 = arith.addf %618, %621 : vector<32x128xf32>
    %623 = arith.index_cast %c30_i32 : i32 to index
    %624 = memref.load %arg6[%623] : memref<50xf32, #tpu.memory_space<smem>>
    %cst_34 = arith.constant 0.000000e+00 : f32
    %625 = vector.broadcast %cst_34 : f32 to vector<32x128xf32>
    %626 = arith.maximumf %622, %625 : vector<32x128xf32>
    %627 = vector.broadcast %624 : f32 to vector<32x128xf32>
    %628 = arith.mulf %627, %626 : vector<32x128xf32>
    %629 = arith.addf %609, %628 : vector<32x128xf32>
    %c31_i32 = arith.constant 31 : i32
    %630 = arith.index_cast %c31_i32 : i32 to index
    %631 = memref.load %arg3[%630] : memref<50xf32, #tpu.memory_space<smem>>
    %632 = vector.broadcast %631 : f32 to vector<32x128xf32>
    %633 = arith.mulf %632, %5 : vector<32x128xf32>
    %634 = arith.index_cast %c31_i32 : i32 to index
    %635 = memref.load %arg4[%634] : memref<50xf32, #tpu.memory_space<smem>>
    %636 = vector.broadcast %635 : f32 to vector<32x128xf32>
    %637 = arith.mulf %636, %7 : vector<32x128xf32>
    %638 = arith.addf %633, %637 : vector<32x128xf32>
    %639 = arith.index_cast %c31_i32 : i32 to index
    %640 = memref.load %arg5[%639] : memref<50xf32, #tpu.memory_space<smem>>
    %641 = vector.broadcast %640 : f32 to vector<32x128xf32>
    %642 = arith.addf %638, %641 : vector<32x128xf32>
    %643 = arith.index_cast %c31_i32 : i32 to index
    %644 = memref.load %arg6[%643] : memref<50xf32, #tpu.memory_space<smem>>
    %cst_35 = arith.constant 0.000000e+00 : f32
    %645 = vector.broadcast %cst_35 : f32 to vector<32x128xf32>
    %646 = arith.maximumf %642, %645 : vector<32x128xf32>
    %647 = vector.broadcast %644 : f32 to vector<32x128xf32>
    %648 = arith.mulf %647, %646 : vector<32x128xf32>
    %649 = arith.addf %629, %648 : vector<32x128xf32>
    %c32_i32_36 = arith.constant 32 : i32
    %650 = arith.index_cast %c32_i32_36 : i32 to index
    %651 = memref.load %arg3[%650] : memref<50xf32, #tpu.memory_space<smem>>
    %652 = vector.broadcast %651 : f32 to vector<32x128xf32>
    %653 = arith.mulf %652, %5 : vector<32x128xf32>
    %654 = arith.index_cast %c32_i32_36 : i32 to index
    %655 = memref.load %arg4[%654] : memref<50xf32, #tpu.memory_space<smem>>
    %656 = vector.broadcast %655 : f32 to vector<32x128xf32>
    %657 = arith.mulf %656, %7 : vector<32x128xf32>
    %658 = arith.addf %653, %657 : vector<32x128xf32>
    %659 = arith.index_cast %c32_i32_36 : i32 to index
    %660 = memref.load %arg5[%659] : memref<50xf32, #tpu.memory_space<smem>>
    %661 = vector.broadcast %660 : f32 to vector<32x128xf32>
    %662 = arith.addf %658, %661 : vector<32x128xf32>
    %663 = arith.index_cast %c32_i32_36 : i32 to index
    %664 = memref.load %arg6[%663] : memref<50xf32, #tpu.memory_space<smem>>
    %cst_37 = arith.constant 0.000000e+00 : f32
    %665 = vector.broadcast %cst_37 : f32 to vector<32x128xf32>
    %666 = arith.maximumf %662, %665 : vector<32x128xf32>
    %667 = vector.broadcast %664 : f32 to vector<32x128xf32>
    %668 = arith.mulf %667, %666 : vector<32x128xf32>
    %669 = arith.addf %649, %668 : vector<32x128xf32>
    %c33_i32 = arith.constant 33 : i32
    %670 = arith.index_cast %c33_i32 : i32 to index
    %671 = memref.load %arg3[%670] : memref<50xf32, #tpu.memory_space<smem>>
    %672 = vector.broadcast %671 : f32 to vector<32x128xf32>
    %673 = arith.mulf %672, %5 : vector<32x128xf32>
    %674 = arith.index_cast %c33_i32 : i32 to index
    %675 = memref.load %arg4[%674] : memref<50xf32, #tpu.memory_space<smem>>
    %676 = vector.broadcast %675 : f32 to vector<32x128xf32>
    %677 = arith.mulf %676, %7 : vector<32x128xf32>
    %678 = arith.addf %673, %677 : vector<32x128xf32>
    %679 = arith.index_cast %c33_i32 : i32 to index
    %680 = memref.load %arg5[%679] : memref<50xf32, #tpu.memory_space<smem>>
    %681 = vector.broadcast %680 : f32 to vector<32x128xf32>
    %682 = arith.addf %678, %681 : vector<32x128xf32>
    %683 = arith.index_cast %c33_i32 : i32 to index
    %684 = memref.load %arg6[%683] : memref<50xf32, #tpu.memory_space<smem>>
    %cst_38 = arith.constant 0.000000e+00 : f32
    %685 = vector.broadcast %cst_38 : f32 to vector<32x128xf32>
    %686 = arith.maximumf %682, %685 : vector<32x128xf32>
    %687 = vector.broadcast %684 : f32 to vector<32x128xf32>
    %688 = arith.mulf %687, %686 : vector<32x128xf32>
    %689 = arith.addf %669, %688 : vector<32x128xf32>
    %c34_i32 = arith.constant 34 : i32
    %690 = arith.index_cast %c34_i32 : i32 to index
    %691 = memref.load %arg3[%690] : memref<50xf32, #tpu.memory_space<smem>>
    %692 = vector.broadcast %691 : f32 to vector<32x128xf32>
    %693 = arith.mulf %692, %5 : vector<32x128xf32>
    %694 = arith.index_cast %c34_i32 : i32 to index
    %695 = memref.load %arg4[%694] : memref<50xf32, #tpu.memory_space<smem>>
    %696 = vector.broadcast %695 : f32 to vector<32x128xf32>
    %697 = arith.mulf %696, %7 : vector<32x128xf32>
    %698 = arith.addf %693, %697 : vector<32x128xf32>
    %699 = arith.index_cast %c34_i32 : i32 to index
    %700 = memref.load %arg5[%699] : memref<50xf32, #tpu.memory_space<smem>>
    %701 = vector.broadcast %700 : f32 to vector<32x128xf32>
    %702 = arith.addf %698, %701 : vector<32x128xf32>
    %703 = arith.index_cast %c34_i32 : i32 to index
    %704 = memref.load %arg6[%703] : memref<50xf32, #tpu.memory_space<smem>>
    %cst_39 = arith.constant 0.000000e+00 : f32
    %705 = vector.broadcast %cst_39 : f32 to vector<32x128xf32>
    %706 = arith.maximumf %702, %705 : vector<32x128xf32>
    %707 = vector.broadcast %704 : f32 to vector<32x128xf32>
    %708 = arith.mulf %707, %706 : vector<32x128xf32>
    %709 = arith.addf %689, %708 : vector<32x128xf32>
    %c35_i32 = arith.constant 35 : i32
    %710 = arith.index_cast %c35_i32 : i32 to index
    %711 = memref.load %arg3[%710] : memref<50xf32, #tpu.memory_space<smem>>
    %712 = vector.broadcast %711 : f32 to vector<32x128xf32>
    %713 = arith.mulf %712, %5 : vector<32x128xf32>
    %714 = arith.index_cast %c35_i32 : i32 to index
    %715 = memref.load %arg4[%714] : memref<50xf32, #tpu.memory_space<smem>>
    %716 = vector.broadcast %715 : f32 to vector<32x128xf32>
    %717 = arith.mulf %716, %7 : vector<32x128xf32>
    %718 = arith.addf %713, %717 : vector<32x128xf32>
    %719 = arith.index_cast %c35_i32 : i32 to index
    %720 = memref.load %arg5[%719] : memref<50xf32, #tpu.memory_space<smem>>
    %721 = vector.broadcast %720 : f32 to vector<32x128xf32>
    %722 = arith.addf %718, %721 : vector<32x128xf32>
    %723 = arith.index_cast %c35_i32 : i32 to index
    %724 = memref.load %arg6[%723] : memref<50xf32, #tpu.memory_space<smem>>
    %cst_40 = arith.constant 0.000000e+00 : f32
    %725 = vector.broadcast %cst_40 : f32 to vector<32x128xf32>
    %726 = arith.maximumf %722, %725 : vector<32x128xf32>
    %727 = vector.broadcast %724 : f32 to vector<32x128xf32>
    %728 = arith.mulf %727, %726 : vector<32x128xf32>
    %729 = arith.addf %709, %728 : vector<32x128xf32>
    %c36_i32 = arith.constant 36 : i32
    %730 = arith.index_cast %c36_i32 : i32 to index
    %731 = memref.load %arg3[%730] : memref<50xf32, #tpu.memory_space<smem>>
    %732 = vector.broadcast %731 : f32 to vector<32x128xf32>
    %733 = arith.mulf %732, %5 : vector<32x128xf32>
    %734 = arith.index_cast %c36_i32 : i32 to index
    %735 = memref.load %arg4[%734] : memref<50xf32, #tpu.memory_space<smem>>
    %736 = vector.broadcast %735 : f32 to vector<32x128xf32>
    %737 = arith.mulf %736, %7 : vector<32x128xf32>
    %738 = arith.addf %733, %737 : vector<32x128xf32>
    %739 = arith.index_cast %c36_i32 : i32 to index
    %740 = memref.load %arg5[%739] : memref<50xf32, #tpu.memory_space<smem>>
    %741 = vector.broadcast %740 : f32 to vector<32x128xf32>
    %742 = arith.addf %738, %741 : vector<32x128xf32>
    %743 = arith.index_cast %c36_i32 : i32 to index
    %744 = memref.load %arg6[%743] : memref<50xf32, #tpu.memory_space<smem>>
    %cst_41 = arith.constant 0.000000e+00 : f32
    %745 = vector.broadcast %cst_41 : f32 to vector<32x128xf32>
    %746 = arith.maximumf %742, %745 : vector<32x128xf32>
    %747 = vector.broadcast %744 : f32 to vector<32x128xf32>
    %748 = arith.mulf %747, %746 : vector<32x128xf32>
    %749 = arith.addf %729, %748 : vector<32x128xf32>
    %c37_i32 = arith.constant 37 : i32
    %750 = arith.index_cast %c37_i32 : i32 to index
    %751 = memref.load %arg3[%750] : memref<50xf32, #tpu.memory_space<smem>>
    %752 = vector.broadcast %751 : f32 to vector<32x128xf32>
    %753 = arith.mulf %752, %5 : vector<32x128xf32>
    %754 = arith.index_cast %c37_i32 : i32 to index
    %755 = memref.load %arg4[%754] : memref<50xf32, #tpu.memory_space<smem>>
    %756 = vector.broadcast %755 : f32 to vector<32x128xf32>
    %757 = arith.mulf %756, %7 : vector<32x128xf32>
    %758 = arith.addf %753, %757 : vector<32x128xf32>
    %759 = arith.index_cast %c37_i32 : i32 to index
    %760 = memref.load %arg5[%759] : memref<50xf32, #tpu.memory_space<smem>>
    %761 = vector.broadcast %760 : f32 to vector<32x128xf32>
    %762 = arith.addf %758, %761 : vector<32x128xf32>
    %763 = arith.index_cast %c37_i32 : i32 to index
    %764 = memref.load %arg6[%763] : memref<50xf32, #tpu.memory_space<smem>>
    %cst_42 = arith.constant 0.000000e+00 : f32
    %765 = vector.broadcast %cst_42 : f32 to vector<32x128xf32>
    %766 = arith.maximumf %762, %765 : vector<32x128xf32>
    %767 = vector.broadcast %764 : f32 to vector<32x128xf32>
    %768 = arith.mulf %767, %766 : vector<32x128xf32>
    %769 = arith.addf %749, %768 : vector<32x128xf32>
    %c38_i32 = arith.constant 38 : i32
    %770 = arith.index_cast %c38_i32 : i32 to index
    %771 = memref.load %arg3[%770] : memref<50xf32, #tpu.memory_space<smem>>
    %772 = vector.broadcast %771 : f32 to vector<32x128xf32>
    %773 = arith.mulf %772, %5 : vector<32x128xf32>
    %774 = arith.index_cast %c38_i32 : i32 to index
    %775 = memref.load %arg4[%774] : memref<50xf32, #tpu.memory_space<smem>>
    %776 = vector.broadcast %775 : f32 to vector<32x128xf32>
    %777 = arith.mulf %776, %7 : vector<32x128xf32>
    %778 = arith.addf %773, %777 : vector<32x128xf32>
    %779 = arith.index_cast %c38_i32 : i32 to index
    %780 = memref.load %arg5[%779] : memref<50xf32, #tpu.memory_space<smem>>
    %781 = vector.broadcast %780 : f32 to vector<32x128xf32>
    %782 = arith.addf %778, %781 : vector<32x128xf32>
    %783 = arith.index_cast %c38_i32 : i32 to index
    %784 = memref.load %arg6[%783] : memref<50xf32, #tpu.memory_space<smem>>
    %cst_43 = arith.constant 0.000000e+00 : f32
    %785 = vector.broadcast %cst_43 : f32 to vector<32x128xf32>
    %786 = arith.maximumf %782, %785 : vector<32x128xf32>
    %787 = vector.broadcast %784 : f32 to vector<32x128xf32>
    %788 = arith.mulf %787, %786 : vector<32x128xf32>
    %789 = arith.addf %769, %788 : vector<32x128xf32>
    %c39_i32 = arith.constant 39 : i32
    %790 = arith.index_cast %c39_i32 : i32 to index
    %791 = memref.load %arg3[%790] : memref<50xf32, #tpu.memory_space<smem>>
    %792 = vector.broadcast %791 : f32 to vector<32x128xf32>
    %793 = arith.mulf %792, %5 : vector<32x128xf32>
    %794 = arith.index_cast %c39_i32 : i32 to index
    %795 = memref.load %arg4[%794] : memref<50xf32, #tpu.memory_space<smem>>
    %796 = vector.broadcast %795 : f32 to vector<32x128xf32>
    %797 = arith.mulf %796, %7 : vector<32x128xf32>
    %798 = arith.addf %793, %797 : vector<32x128xf32>
    %799 = arith.index_cast %c39_i32 : i32 to index
    %800 = memref.load %arg5[%799] : memref<50xf32, #tpu.memory_space<smem>>
    %801 = vector.broadcast %800 : f32 to vector<32x128xf32>
    %802 = arith.addf %798, %801 : vector<32x128xf32>
    %803 = arith.index_cast %c39_i32 : i32 to index
    %804 = memref.load %arg6[%803] : memref<50xf32, #tpu.memory_space<smem>>
    %cst_44 = arith.constant 0.000000e+00 : f32
    %805 = vector.broadcast %cst_44 : f32 to vector<32x128xf32>
    %806 = arith.maximumf %802, %805 : vector<32x128xf32>
    %807 = vector.broadcast %804 : f32 to vector<32x128xf32>
    %808 = arith.mulf %807, %806 : vector<32x128xf32>
    %809 = arith.addf %789, %808 : vector<32x128xf32>
    %c40_i32 = arith.constant 40 : i32
    %810 = arith.index_cast %c40_i32 : i32 to index
    %811 = memref.load %arg3[%810] : memref<50xf32, #tpu.memory_space<smem>>
    %812 = vector.broadcast %811 : f32 to vector<32x128xf32>
    %813 = arith.mulf %812, %5 : vector<32x128xf32>
    %814 = arith.index_cast %c40_i32 : i32 to index
    %815 = memref.load %arg4[%814] : memref<50xf32, #tpu.memory_space<smem>>
    %816 = vector.broadcast %815 : f32 to vector<32x128xf32>
    %817 = arith.mulf %816, %7 : vector<32x128xf32>
    %818 = arith.addf %813, %817 : vector<32x128xf32>
    %819 = arith.index_cast %c40_i32 : i32 to index
    %820 = memref.load %arg5[%819] : memref<50xf32, #tpu.memory_space<smem>>
    %821 = vector.broadcast %820 : f32 to vector<32x128xf32>
    %822 = arith.addf %818, %821 : vector<32x128xf32>
    %823 = arith.index_cast %c40_i32 : i32 to index
    %824 = memref.load %arg6[%823] : memref<50xf32, #tpu.memory_space<smem>>
    %cst_45 = arith.constant 0.000000e+00 : f32
    %825 = vector.broadcast %cst_45 : f32 to vector<32x128xf32>
    %826 = arith.maximumf %822, %825 : vector<32x128xf32>
    %827 = vector.broadcast %824 : f32 to vector<32x128xf32>
    %828 = arith.mulf %827, %826 : vector<32x128xf32>
    %829 = arith.addf %809, %828 : vector<32x128xf32>
    %c41_i32 = arith.constant 41 : i32
    %830 = arith.index_cast %c41_i32 : i32 to index
    %831 = memref.load %arg3[%830] : memref<50xf32, #tpu.memory_space<smem>>
    %832 = vector.broadcast %831 : f32 to vector<32x128xf32>
    %833 = arith.mulf %832, %5 : vector<32x128xf32>
    %834 = arith.index_cast %c41_i32 : i32 to index
    %835 = memref.load %arg4[%834] : memref<50xf32, #tpu.memory_space<smem>>
    %836 = vector.broadcast %835 : f32 to vector<32x128xf32>
    %837 = arith.mulf %836, %7 : vector<32x128xf32>
    %838 = arith.addf %833, %837 : vector<32x128xf32>
    %839 = arith.index_cast %c41_i32 : i32 to index
    %840 = memref.load %arg5[%839] : memref<50xf32, #tpu.memory_space<smem>>
    %841 = vector.broadcast %840 : f32 to vector<32x128xf32>
    %842 = arith.addf %838, %841 : vector<32x128xf32>
    %843 = arith.index_cast %c41_i32 : i32 to index
    %844 = memref.load %arg6[%843] : memref<50xf32, #tpu.memory_space<smem>>
    %cst_46 = arith.constant 0.000000e+00 : f32
    %845 = vector.broadcast %cst_46 : f32 to vector<32x128xf32>
    %846 = arith.maximumf %842, %845 : vector<32x128xf32>
    %847 = vector.broadcast %844 : f32 to vector<32x128xf32>
    %848 = arith.mulf %847, %846 : vector<32x128xf32>
    %849 = arith.addf %829, %848 : vector<32x128xf32>
    %c42_i32 = arith.constant 42 : i32
    %850 = arith.index_cast %c42_i32 : i32 to index
    %851 = memref.load %arg3[%850] : memref<50xf32, #tpu.memory_space<smem>>
    %852 = vector.broadcast %851 : f32 to vector<32x128xf32>
    %853 = arith.mulf %852, %5 : vector<32x128xf32>
    %854 = arith.index_cast %c42_i32 : i32 to index
    %855 = memref.load %arg4[%854] : memref<50xf32, #tpu.memory_space<smem>>
    %856 = vector.broadcast %855 : f32 to vector<32x128xf32>
    %857 = arith.mulf %856, %7 : vector<32x128xf32>
    %858 = arith.addf %853, %857 : vector<32x128xf32>
    %859 = arith.index_cast %c42_i32 : i32 to index
    %860 = memref.load %arg5[%859] : memref<50xf32, #tpu.memory_space<smem>>
    %861 = vector.broadcast %860 : f32 to vector<32x128xf32>
    %862 = arith.addf %858, %861 : vector<32x128xf32>
    %863 = arith.index_cast %c42_i32 : i32 to index
    %864 = memref.load %arg6[%863] : memref<50xf32, #tpu.memory_space<smem>>
    %cst_47 = arith.constant 0.000000e+00 : f32
    %865 = vector.broadcast %cst_47 : f32 to vector<32x128xf32>
    %866 = arith.maximumf %862, %865 : vector<32x128xf32>
    %867 = vector.broadcast %864 : f32 to vector<32x128xf32>
    %868 = arith.mulf %867, %866 : vector<32x128xf32>
    %869 = arith.addf %849, %868 : vector<32x128xf32>
    %c43_i32 = arith.constant 43 : i32
    %870 = arith.index_cast %c43_i32 : i32 to index
    %871 = memref.load %arg3[%870] : memref<50xf32, #tpu.memory_space<smem>>
    %872 = vector.broadcast %871 : f32 to vector<32x128xf32>
    %873 = arith.mulf %872, %5 : vector<32x128xf32>
    %874 = arith.index_cast %c43_i32 : i32 to index
    %875 = memref.load %arg4[%874] : memref<50xf32, #tpu.memory_space<smem>>
    %876 = vector.broadcast %875 : f32 to vector<32x128xf32>
    %877 = arith.mulf %876, %7 : vector<32x128xf32>
    %878 = arith.addf %873, %877 : vector<32x128xf32>
    %879 = arith.index_cast %c43_i32 : i32 to index
    %880 = memref.load %arg5[%879] : memref<50xf32, #tpu.memory_space<smem>>
    %881 = vector.broadcast %880 : f32 to vector<32x128xf32>
    %882 = arith.addf %878, %881 : vector<32x128xf32>
    %883 = arith.index_cast %c43_i32 : i32 to index
    %884 = memref.load %arg6[%883] : memref<50xf32, #tpu.memory_space<smem>>
    %cst_48 = arith.constant 0.000000e+00 : f32
    %885 = vector.broadcast %cst_48 : f32 to vector<32x128xf32>
    %886 = arith.maximumf %882, %885 : vector<32x128xf32>
    %887 = vector.broadcast %884 : f32 to vector<32x128xf32>
    %888 = arith.mulf %887, %886 : vector<32x128xf32>
    %889 = arith.addf %869, %888 : vector<32x128xf32>
    %c44_i32 = arith.constant 44 : i32
    %890 = arith.index_cast %c44_i32 : i32 to index
    %891 = memref.load %arg3[%890] : memref<50xf32, #tpu.memory_space<smem>>
    %892 = vector.broadcast %891 : f32 to vector<32x128xf32>
    %893 = arith.mulf %892, %5 : vector<32x128xf32>
    %894 = arith.index_cast %c44_i32 : i32 to index
    %895 = memref.load %arg4[%894] : memref<50xf32, #tpu.memory_space<smem>>
    %896 = vector.broadcast %895 : f32 to vector<32x128xf32>
    %897 = arith.mulf %896, %7 : vector<32x128xf32>
    %898 = arith.addf %893, %897 : vector<32x128xf32>
    %899 = arith.index_cast %c44_i32 : i32 to index
    %900 = memref.load %arg5[%899] : memref<50xf32, #tpu.memory_space<smem>>
    %901 = vector.broadcast %900 : f32 to vector<32x128xf32>
    %902 = arith.addf %898, %901 : vector<32x128xf32>
    %903 = arith.index_cast %c44_i32 : i32 to index
    %904 = memref.load %arg6[%903] : memref<50xf32, #tpu.memory_space<smem>>
    %cst_49 = arith.constant 0.000000e+00 : f32
    %905 = vector.broadcast %cst_49 : f32 to vector<32x128xf32>
    %906 = arith.maximumf %902, %905 : vector<32x128xf32>
    %907 = vector.broadcast %904 : f32 to vector<32x128xf32>
    %908 = arith.mulf %907, %906 : vector<32x128xf32>
    %909 = arith.addf %889, %908 : vector<32x128xf32>
    %c45_i32 = arith.constant 45 : i32
    %910 = arith.index_cast %c45_i32 : i32 to index
    %911 = memref.load %arg3[%910] : memref<50xf32, #tpu.memory_space<smem>>
    %912 = vector.broadcast %911 : f32 to vector<32x128xf32>
    %913 = arith.mulf %912, %5 : vector<32x128xf32>
    %914 = arith.index_cast %c45_i32 : i32 to index
    %915 = memref.load %arg4[%914] : memref<50xf32, #tpu.memory_space<smem>>
    %916 = vector.broadcast %915 : f32 to vector<32x128xf32>
    %917 = arith.mulf %916, %7 : vector<32x128xf32>
    %918 = arith.addf %913, %917 : vector<32x128xf32>
    %919 = arith.index_cast %c45_i32 : i32 to index
    %920 = memref.load %arg5[%919] : memref<50xf32, #tpu.memory_space<smem>>
    %921 = vector.broadcast %920 : f32 to vector<32x128xf32>
    %922 = arith.addf %918, %921 : vector<32x128xf32>
    %923 = arith.index_cast %c45_i32 : i32 to index
    %924 = memref.load %arg6[%923] : memref<50xf32, #tpu.memory_space<smem>>
    %cst_50 = arith.constant 0.000000e+00 : f32
    %925 = vector.broadcast %cst_50 : f32 to vector<32x128xf32>
    %926 = arith.maximumf %922, %925 : vector<32x128xf32>
    %927 = vector.broadcast %924 : f32 to vector<32x128xf32>
    %928 = arith.mulf %927, %926 : vector<32x128xf32>
    %929 = arith.addf %909, %928 : vector<32x128xf32>
    %c46_i32 = arith.constant 46 : i32
    %930 = arith.index_cast %c46_i32 : i32 to index
    %931 = memref.load %arg3[%930] : memref<50xf32, #tpu.memory_space<smem>>
    %932 = vector.broadcast %931 : f32 to vector<32x128xf32>
    %933 = arith.mulf %932, %5 : vector<32x128xf32>
    %934 = arith.index_cast %c46_i32 : i32 to index
    %935 = memref.load %arg4[%934] : memref<50xf32, #tpu.memory_space<smem>>
    %936 = vector.broadcast %935 : f32 to vector<32x128xf32>
    %937 = arith.mulf %936, %7 : vector<32x128xf32>
    %938 = arith.addf %933, %937 : vector<32x128xf32>
    %939 = arith.index_cast %c46_i32 : i32 to index
    %940 = memref.load %arg5[%939] : memref<50xf32, #tpu.memory_space<smem>>
    %941 = vector.broadcast %940 : f32 to vector<32x128xf32>
    %942 = arith.addf %938, %941 : vector<32x128xf32>
    %943 = arith.index_cast %c46_i32 : i32 to index
    %944 = memref.load %arg6[%943] : memref<50xf32, #tpu.memory_space<smem>>
    %cst_51 = arith.constant 0.000000e+00 : f32
    %945 = vector.broadcast %cst_51 : f32 to vector<32x128xf32>
    %946 = arith.maximumf %942, %945 : vector<32x128xf32>
    %947 = vector.broadcast %944 : f32 to vector<32x128xf32>
    %948 = arith.mulf %947, %946 : vector<32x128xf32>
    %949 = arith.addf %929, %948 : vector<32x128xf32>
    %c47_i32 = arith.constant 47 : i32
    %950 = arith.index_cast %c47_i32 : i32 to index
    %951 = memref.load %arg3[%950] : memref<50xf32, #tpu.memory_space<smem>>
    %952 = vector.broadcast %951 : f32 to vector<32x128xf32>
    %953 = arith.mulf %952, %5 : vector<32x128xf32>
    %954 = arith.index_cast %c47_i32 : i32 to index
    %955 = memref.load %arg4[%954] : memref<50xf32, #tpu.memory_space<smem>>
    %956 = vector.broadcast %955 : f32 to vector<32x128xf32>
    %957 = arith.mulf %956, %7 : vector<32x128xf32>
    %958 = arith.addf %953, %957 : vector<32x128xf32>
    %959 = arith.index_cast %c47_i32 : i32 to index
    %960 = memref.load %arg5[%959] : memref<50xf32, #tpu.memory_space<smem>>
    %961 = vector.broadcast %960 : f32 to vector<32x128xf32>
    %962 = arith.addf %958, %961 : vector<32x128xf32>
    %963 = arith.index_cast %c47_i32 : i32 to index
    %964 = memref.load %arg6[%963] : memref<50xf32, #tpu.memory_space<smem>>
    %cst_52 = arith.constant 0.000000e+00 : f32
    %965 = vector.broadcast %cst_52 : f32 to vector<32x128xf32>
    %966 = arith.maximumf %962, %965 : vector<32x128xf32>
    %967 = vector.broadcast %964 : f32 to vector<32x128xf32>
    %968 = arith.mulf %967, %966 : vector<32x128xf32>
    %969 = arith.addf %949, %968 : vector<32x128xf32>
    %c48_i32 = arith.constant 48 : i32
    %970 = arith.index_cast %c48_i32 : i32 to index
    %971 = memref.load %arg3[%970] : memref<50xf32, #tpu.memory_space<smem>>
    %972 = vector.broadcast %971 : f32 to vector<32x128xf32>
    %973 = arith.mulf %972, %5 : vector<32x128xf32>
    %974 = arith.index_cast %c48_i32 : i32 to index
    %975 = memref.load %arg4[%974] : memref<50xf32, #tpu.memory_space<smem>>
    %976 = vector.broadcast %975 : f32 to vector<32x128xf32>
    %977 = arith.mulf %976, %7 : vector<32x128xf32>
    %978 = arith.addf %973, %977 : vector<32x128xf32>
    %979 = arith.index_cast %c48_i32 : i32 to index
    %980 = memref.load %arg5[%979] : memref<50xf32, #tpu.memory_space<smem>>
    %981 = vector.broadcast %980 : f32 to vector<32x128xf32>
    %982 = arith.addf %978, %981 : vector<32x128xf32>
    %983 = arith.index_cast %c48_i32 : i32 to index
    %984 = memref.load %arg6[%983] : memref<50xf32, #tpu.memory_space<smem>>
    %cst_53 = arith.constant 0.000000e+00 : f32
    %985 = vector.broadcast %cst_53 : f32 to vector<32x128xf32>
    %986 = arith.maximumf %982, %985 : vector<32x128xf32>
    %987 = vector.broadcast %984 : f32 to vector<32x128xf32>
    %988 = arith.mulf %987, %986 : vector<32x128xf32>
    %989 = arith.addf %969, %988 : vector<32x128xf32>
    %c49_i32 = arith.constant 49 : i32
    %990 = arith.index_cast %c49_i32 : i32 to index
    %991 = memref.load %arg3[%990] : memref<50xf32, #tpu.memory_space<smem>>
    %992 = vector.broadcast %991 : f32 to vector<32x128xf32>
    %993 = arith.mulf %992, %5 : vector<32x128xf32>
    %994 = arith.index_cast %c49_i32 : i32 to index
    %995 = memref.load %arg4[%994] : memref<50xf32, #tpu.memory_space<smem>>
    %996 = vector.broadcast %995 : f32 to vector<32x128xf32>
    %997 = arith.mulf %996, %7 : vector<32x128xf32>
    %998 = arith.addf %993, %997 : vector<32x128xf32>
    %999 = arith.index_cast %c49_i32 : i32 to index
    %1000 = memref.load %arg5[%999] : memref<50xf32, #tpu.memory_space<smem>>
    %1001 = vector.broadcast %1000 : f32 to vector<32x128xf32>
    %1002 = arith.addf %998, %1001 : vector<32x128xf32>
    %1003 = arith.index_cast %c49_i32 : i32 to index
    %1004 = memref.load %arg6[%1003] : memref<50xf32, #tpu.memory_space<smem>>
    %cst_54 = arith.constant 0.000000e+00 : f32
    %1005 = vector.broadcast %cst_54 : f32 to vector<32x128xf32>
    %1006 = arith.maximumf %1002, %1005 : vector<32x128xf32>
    %1007 = vector.broadcast %1004 : f32 to vector<32x128xf32>
    %1008 = arith.mulf %1007, %1006 : vector<32x128xf32>
    %1009 = arith.addf %989, %1008 : vector<32x128xf32>
    %c50_i32 = arith.constant 50 : i32
    %1010 = arith.index_cast %3 : i32 to index
    %c0_55 = arith.constant 0 : index
    %1011 = vector.load %arg8[%1010, %c0_55] : memref<32x128xf32, #tpu.memory_space<vmem>>, vector<32x128xf32>
    tpu.vector_store %arg8[%1010, %c0_55], %1009 {strides = array<i32>} : memref<32x128xf32, #tpu.memory_space<vmem>>, vector<32x128xf32>,
    %c1_i32_56 = arith.constant 1 : i32
    return
  }
  func.func @transform_0(%arg0: i32) -> (i32, i32) {
    %c0_i32 = arith.constant 0 : i32
    %c0_i32_0 = arith.constant 0 : i32
    return %arg0, %c0_i32 : i32, i32
  }
  func.func @transform_1(%arg0: i32) -> (i32, i32) {
    %c0_i32 = arith.constant 0 : i32
    %c0_i32_0 = arith.constant 0 : i32
    return %arg0, %c0_i32 : i32, i32
  }
  func.func @transform_2(%arg0: i32) -> i32 {
    %c0_i32 = arith.constant 0 : i32
    %c0_i32_0 = arith.constant 0 : i32
    return %c0_i32 : i32
  }
  func.func @transform_3(%arg0: i32) -> i32 {
    %c0_i32 = arith.constant 0 : i32
    %c0_i32_0 = arith.constant 0 : i32
    return %c0_i32 : i32
  }
  func.func @transform_4(%arg0: i32) -> i32 {
    %c0_i32 = arith.constant 0 : i32
    %c0_i32_0 = arith.constant 0 : i32
    return %c0_i32 : i32
  }
  func.func @transform_5(%arg0: i32) -> i32 {
    %c0_i32 = arith.constant 0 : i32
    %c0_i32_0 = arith.constant 0 : i32
    return %c0_i32 : i32
  }
  func.func @transform_6(%arg0: i32) -> i32 {
    %c0_i32 = arith.constant 0 : i32
    %c0_i32_0 = arith.constant 0 : i32
    return %c0_i32 : i32
  }
  func.func @transform_7(%arg0: i32) -> (i32, i32) {
    %c0_i32 = arith.constant 0 : i32
    %c0_i32_0 = arith.constant 0 : i32
    return %arg0, %c0_i32 : i32, i32
  }
}

</mosaic_0001>

<bundles_post_ra>
// kernel: tpu_custom_call.1
= control target key start
LH: loop header
LB: loop body
LE: loop exit
PB: predicated region body
PF: predicated region fallthrough
CT: control target
= control target key end

     0   :  { %13 = vsyncpa [#allocation4], 0  ;;  %s3431_s0 = inlined_call_operand.hbm [shape: f32[32,128], index: 0, kind: input, shape index: {}]   ;;  %s3432_s1 = inlined_call_operand.hbm [shape: f32[32,128], index: 1, kind: input, shape index: {}]   ;;  %s3433_s2 = inlined_call_operand.vmem [shape: f32[50], index: 2, kind: input, shape index: {}]   ;;  %s3434_s3 = inlined_call_operand.vmem [shape: f32[50], index: 3, kind: input, shape index: {}]   ;;  %s3435_s4 = inlined_call_operand.vmem [shape: f32[50], index: 4, kind: input, shape index: {}]   ;;  %s3436_s5 = inlined_call_operand.vmem [shape: f32[50], index: 5, kind: input, shape index: {}]   ;;  %s3437_s6 = inlined_call_operand.<no memory space> [shape: f32[1], index: 6, kind: input, shape index: {}]   ;;  %s3438_s7 = inlined_call_operand.hbm [shape: f32[32,128], index: 7, kind: output, shape index: {}]  }
   0x1   :  { %14 = vsyncpa [#allocation8], 0 }
   0x2   :  { %15 = vsyncpa [#allocation6], 0 }
   0x3   :  { %16 = vsyncpa [#allocation11], 0 }
   0x4   :  { %17 = vsyncpa [#allocation14], 0  ;;  %s59_s26 = sshll.u32 %s3434_s3, 4  ;;  %s60_s26 = int_to_ptr.vmem [resolvable:$true] %s59_s26 }
   0x5   :  { %18 = vsyncpa [#allocation5], 0  ;;  %s23_s29 = sshll.u32 %s3431_s0, 4  ;;  %s2306_s30 = smov [#allocation10]   ;;  %s24_s29 = int_to_ptr.hbm [resolvable:$true] %s23_s29 }
   0x6   :  { %62 = dma.vmem_to_smem %s60_s26, 16, %s2306_s30, [#allocation11]  }
   0x7   :  { %s2307_s8 = smov [#allocation3]   ;;  %s2308_s10 = smov 128  }
   0x8   :  { %s25_s9 = sshll.u32 %s2307_s8, 4  ;;  %s2309_s11 = smov 8   ;;  %s26_s9 = int_to_ptr.vmem [resolvable:$true] %s25_s9 }
   0x9   :  { %31 = dma.hbm_to_vmem [thread:$0]  %s24_s29, 512, %s26_s9, [#allocation4], %s2308_s10, %s2308_s10, %s2309_s11  }
   0xa   :  { %s36_s13 = sshll.u32 %s3432_s1, 4  ;;  %s2310_s14 = smov [#allocation7]   ;;  %s37_s13 = int_to_ptr.hbm [resolvable:$true] %s36_s13 }
   0xb   :  { %s38_s15 = sshll.u32 %s2310_s14, 4  ;;  %s50_s17 = sshll.u32 %s3433_s2, 4  ;;  %s39_s15 = int_to_ptr.vmem [resolvable:$true] %s38_s15  ;;  %s51_s17 = int_to_ptr.vmem [resolvable:$true] %s50_s17 }
   0xc   :  { %44 = dma.hbm_to_vmem [thread:$0]  %s37_s13, 512, %s39_s15, [#allocation8], %s2308_s10, %s2308_s10, %s2309_s11  }
   0xd   :  { %s2311_s18 = smov [#allocation9]   ;;  %s68_s21 = sshll.u32 %s3435_s4, 4  ;;  %s69_s21 = int_to_ptr.vmem [resolvable:$true] %s68_s21 }
   0xe   :  { %53 = dma.vmem_to_smem %s51_s17, 16, %s2311_s18, [#allocation6]  }
   0xf   :  { %s77_s23 = sshll.u32 %s3436_s5, 4  ;;  %s2312_s24 = smov [#allocation12]   ;;  %s78_s23 = int_to_ptr.vmem [resolvable:$true] %s77_s23 }
  0x10   :  { %71 = dma.vmem_to_smem %s69_s21, 16, %s2312_s24, [#allocation11]  }
  0x11   :  { %s2313_s2 = smov [#allocation13]  }
  0x12   :  { %80 = dma.vmem_to_smem %s78_s23, 16, %s2313_s2, [#allocation14]  }
  0x13   :  { %2294 = dma.done.wait [#allocation4], 512  }
  0x14   :  { %2295 = vsyncadd [#allocation4], 4294966784 }
  0x15   :  { %2296 = dma.done.wait [#allocation8], 512  }
  0x16   :  { %2297 = vsyncadd [#allocation8], 4294966784 }
  0x17   :  { %2298 = dma.done.wait [#allocation6], 16  }
  0x18   :  { %2299 = vsyncadd [#allocation6], 4294967280 }
  0x19   :  { %2300 = dma.done.wait [#allocation11], 32  }
  0x1a   :  { %2301 = vsyncadd [#allocation11], 4294967264 }
  0x1b   :  { %2302 = dma.done.wait [#allocation14], 16  }
  0x1c   :  { %2303 = vsyncadd [#allocation14], 4294967280 }
  0x1d   :  { %107 = sfence }
  0x1e   :  { %s118_s4 = sld [smem:[#allocation9]]  ;;  %v2379_v0 = vld [vmem:[#allocation3] sm:$0xff]  ;;  %v2381_v1 = vld [vmem:[#allocation3 + $0x8] sm:$0xff]  ;;  %v2383_v2 = vld [vmem:[#allocation3 + $0x10] sm:$0xff]  ;;  %v117_v18 = vstv %s3437_s6 }
  0x1f   :  { %s124_s25 = sld [smem:[#allocation10]]  ;;  %v2385_v3 = vld [vmem:[#allocation3 + $0x18] sm:$0xff]  ;;  %v2387_v4 = vld [vmem:[#allocation7] sm:$0xff]  ;;  %v2391_v5 = vld [vmem:[#allocation7 + $0x8] sm:$0xff] }
  0x20   :  { %s134_s26 = sld [smem:[#allocation12]]  ;;  %v2393_v6 = vld [vmem:[#allocation7 + $0x10] sm:$0xff]  ;;  %v2395_v7 = vld [vmem:[#allocation7 + $0x18] sm:$0xff] }
  0x21   :  { %s140_s5 = sld [smem:[#allocation13]] }
  0x22   :  { %s1945_s27 = sld [smem:[#allocation9 + $0x1]] }
  0x23   :  { %s2389_s28 = sld [smem:[#allocation10 + $0x1]] }
  0x24   :  { %v119_v8 = vstv %s118_s4  ;;  %s2397_s29 = sld [smem:[#allocation12 + $0x1]] }
  0x25   :  { %v120_v9 = vmul.f32 %v119_v8, %v2379_v0  ;;  %v121_v10 = vmul.f32 %v119_v8, %v2381_v1  ;;  %v122_v11 = vmul.f32 %v119_v8, %v2383_v2  ;;  %v123_v12 = vmul.f32 %v119_v8, %v2385_v3  ;;  %s1949_s30 = sld [smem:[#allocation9 + $0x2]] }
  0x26   :  { %v125_v13 = vstv %s124_s25  ;;  %v135_v19 = vstv %s134_s26  ;;  %s2410_s12 = sld [smem:[#allocation13 + $0x1]] }
  0x27   :  { %v126_v14 = vmul.f32 %v125_v13, %v2387_v4  ;;  %v127_v15 = vmul.f32 %v125_v13, %v2391_v5  ;;  %v128_v16 = vmul.f32 %v125_v13, %v2393_v6  ;;  %v129_v17 = vmul.f32 %v125_v13, %v2395_v7  ;;  %s2415_s6 = sld [smem:[#allocation10 + $0x2]] }
  0x28   :  { %v155_v20 = vstv %s1945_s27  ;;  %v145_v25 = vstv %s140_s5  ;;  %s2420_s3 = sld [smem:[#allocation12 + $0x2]] }
  0x29   :  { %v130_v21 = vadd.f32 %v126_v14, %v120_v9  ;;  %v131_v22 = vadd.f32 %v127_v15, %v121_v10  ;;  %v132_v23 = vadd.f32 %v128_v16, %v122_v11  ;;  %v133_v24 = vadd.f32 %v129_v17, %v123_v12  ;;  %s2422_s13 = sld [smem:[#allocation9 + $0x3]] }
  0x2a   :  { %v156_v26 = vmul.f32 %v155_v20, %v2379_v0  ;;  %v157_v27 = vmul.f32 %v155_v20, %v2381_v1  ;;  %v158_v28 = vmul.f32 %v155_v20, %v2383_v2  ;;  %v159_v33 = vmul.f32 %v155_v20, %v2385_v3  ;;  %s2428_s14 = sld [smem:[#allocation13 + $0x2]] }
  0x2b   :  { %v136_v29 = vadd.f32 %v135_v19, %v130_v21  ;;  %v137_v30 = vadd.f32 %v135_v19, %v131_v22  ;;  %v138_v31 = vadd.f32 %v135_v19, %v132_v23  ;;  %v139_v32 = vadd.f32 %v135_v19, %v133_v24  ;;  %s2431_s15 = sld [smem:[#allocation10 + $0x3]] }
  0x2c   :  { %v161_v34 = vstv %s2389_s28  ;;  %v171_v35 = vstv %s2397_s29  ;;  %v191_v36 = vstv %s1949_s30  ;;  %v181_v56 = vstv %s2410_s12  ;;  %s2436_s0 = sld [smem:[#allocation12 + $0x3]] }
  0x2d   :  { %v141_v37 = vmax.f32 %v136_v29, 0.0  ;;  %v142_v38 = vmax.f32 %v137_v30, 0.0  ;;  %v143_v39 = vmax.f32 %v138_v31, 0.0  ;;  %v144_v40 = vmax.f32 %v139_v32, 0.0  ;;  %s2438_s16 = sld [smem:[#allocation9 + $0x4]] }
  0x2e   :  { %v162_v41 = vmul.f32 %v161_v34, %v2387_v4  ;;  %v163_v42 = vmul.f32 %v161_v34, %v2391_v5  ;;  %v164_v43 = vmul.f32 %v161_v34, %v2393_v6  ;;  %v165_v44 = vmul.f32 %v161_v34, %v2395_v7  ;;  %s2449_s17 = sld [smem:[#allocation13 + $0x3]] }
  0x2f   :  { %v146_v45 = vmul.f32 %v145_v25, %v141_v37  ;;  %v147_v46 = vmul.f32 %v145_v25, %v142_v38  ;;  %v148_v47 = vmul.f32 %v145_v25, %v143_v39  ;;  %v149_v48 = vmul.f32 %v145_v25, %v144_v40  ;;  %s2454_s18 = sld [smem:[#allocation10 + $0x4]] }
  0x30   :  { %v166_v49 = vadd.f32 %v162_v41, %v156_v26  ;;  %v167_v50 = vadd.f32 %v163_v42, %v157_v27  ;;  %v168_v51 = vadd.f32 %v164_v43, %v158_v28  ;;  %v169_v52 = vadd.f32 %v165_v44, %v159_v33  ;;  %s2460_s19 = sld [smem:[#allocation12 + $0x4]] }
  0x31   :  { %v150_v53 = vadd.f32 %v146_v45, %v117_v18  ;;  %v151_v54 = vadd.f32 %v147_v46, %v117_v18  ;;  %v152_v55 = vadd.f32 %v148_v47, %v117_v18  ;;  %v153_v61 = vadd.f32 %v149_v48, %v117_v18  ;;  %s2462_s20 = sld [smem:[#allocation9 + $0x5]] }
  0x32   :  { %v172_v57 = vadd.f32 %v171_v35, %v166_v49  ;;  %v173_v58 = vadd.f32 %v171_v35, %v167_v50  ;;  %v174_v59 = vadd.f32 %v171_v35, %v168_v51  ;;  %v175_v60 = vadd.f32 %v171_v35, %v169_v52  ;;  %s2468_s21 = sld [smem:[#allocation13 + $0x4]] }
  0x33   :  { %v192_v62 = vmul.f32 %v191_v36, %v2379_v0  ;;  %v193_v63 = vmul.f32 %v191_v36, %v2381_v1  ;;  %v194_v8 = vmul.f32 %v191_v36, %v2383_v2  ;;  %v195_v13 = vmul.f32 %v191_v36, %v2385_v3  ;;  %s2471_s1 = sld [smem:[#allocation10 + $0x5]] }
  0x34   :  { %v177_v9 = vmax.f32 %v172_v57, 0.0  ;;  %v178_v10 = vmax.f32 %v173_v58, 0.0  ;;  %v179_v11 = vmax.f32 %v174_v59, 0.0  ;;  %v180_v12 = vmax.f32 %v175_v60, 0.0  ;;  %s2476_s22 = sld [smem:[#allocation12 + $0x5]] }
  0x35   :  { %v197_v14 = vstv %s2415_s6  ;;  %v207_v15 = vstv %s2420_s3  ;;  %v227_v16 = vstv %s2422_s13  ;;  %v217_v28 = vstv %s2428_s14  ;;  %s2478_s23 = sld [smem:[#allocation9 + $0x6]] }
  0x36   :  { %v182_v17 = vmul.f32 %v181_v56, %v177_v9  ;;  %v183_v18 = vmul.f32 %v181_v56, %v178_v10  ;;  %v184_v19 = vmul.f32 %v181_v56, %v179_v11  ;;  %v185_v20 = vmul.f32 %v181_v56, %v180_v12  ;;  %s2489_s24 = sld [smem:[#allocation13 + $0x5]] }
  0x37   :  { %v198_v21 = vmul.f32 %v197_v14, %v2387_v4  ;;  %v199_v22 = vmul.f32 %v197_v14, %v2391_v5  ;;  %v200_v23 = vmul.f32 %v197_v14, %v2393_v6  ;;  %v201_v24 = vmul.f32 %v197_v14, %v2395_v7  ;;  %s2494_s2 = sld [smem:[#allocation10 + $0x6]] }
  0x38   :  { %v186_v25 = vadd.f32 %v182_v17, %v150_v53  ;;  %v187_v26 = vadd.f32 %v183_v18, %v151_v54  ;;  %v188_v27 = vadd.f32 %v184_v19, %v152_v55  ;;  %v189_v33 = vadd.f32 %v185_v20, %v153_v61  ;;  %s2500_s4 = sld [smem:[#allocation12 + $0x6]] }
  0x39   :  { %v202_v29 = vadd.f32 %v198_v21, %v192_v62  ;;  %v203_v30 = vadd.f32 %v199_v22, %v193_v63  ;;  %v204_v31 = vadd.f32 %v200_v23, %v194_v8  ;;  %v205_v32 = vadd.f32 %v201_v24, %v195_v13  ;;  %s2502_s25 = sld [smem:[#allocation9 + $0x7]] }
  0x3a   :  { %v228_v34 = vmul.f32 %v227_v16, %v2379_v0  ;;  %v229_v35 = vmul.f32 %v227_v16, %v2381_v1  ;;  %v230_v36 = vmul.f32 %v227_v16, %v2383_v2  ;;  %v231_v41 = vmul.f32 %v227_v16, %v2385_v3  ;;  %s2508_s26 = sld [smem:[#allocation13 + $0x6]] }
  0x3b   :  { %v208_v37 = vadd.f32 %v207_v15, %v202_v29  ;;  %v209_v38 = vadd.f32 %v207_v15, %v203_v30  ;;  %v210_v39 = vadd.f32 %v207_v15, %v204_v31  ;;  %v211_v40 = vadd.f32 %v207_v15, %v205_v32  ;;  %s2511_s5 = sld [smem:[#allocation10 + $0x7]] }
  0x3c   :  { %v233_v42 = vstv %s2431_s15  ;;  %v243_v43 = vstv %s2436_s0  ;;  %v263_v44 = vstv %s2438_s16  ;;  %v253_v8 = vstv %s2449_s17  ;;  %s2516_s27 = sld [smem:[#allocation12 + $0x7]] }
  0x3d   :  { %v213_v45 = vmax.f32 %v208_v37, 0.0  ;;  %v214_v46 = vmax.f32 %v209_v38, 0.0  ;;  %v215_v47 = vmax.f32 %v210_v39, 0.0  ;;  %v216_v48 = vmax.f32 %v211_v40, 0.0  ;;  %s2518_s28 = sld [smem:[#allocation9 + $0x8]] }
  0x3e   :  { %v234_v49 = vmul.f32 %v233_v42, %v2387_v4  ;;  %v235_v50 = vmul.f32 %v233_v42, %v2391_v5  ;;  %v236_v51 = vmul.f32 %v233_v42, %v2393_v6  ;;  %v237_v52 = vmul.f32 %v233_v42, %v2395_v7  ;;  %s2529_s29 = sld [smem:[#allocation13 + $0x7]] }
  0x3f   :  { %v218_v53 = vmul.f32 %v217_v28, %v213_v45  ;;  %v219_v54 = vmul.f32 %v217_v28, %v214_v46  ;;  %v220_v55 = vmul.f32 %v217_v28, %v215_v47  ;;  %v221_v56 = vmul.f32 %v217_v28, %v216_v48  ;;  %s2534_s30 = sld [smem:[#allocation10 + $0x8]] }
  0x40   :  { %v238_v57 = vadd.f32 %v234_v49, %v228_v34  ;;  %v239_v58 = vadd.f32 %v235_v50, %v229_v35  ;;  %v240_v59 = vadd.f32 %v236_v51, %v230_v36  ;;  %v241_v60 = vadd.f32 %v237_v52, %v231_v41  ;;  %s2540_s8 = sld [smem:[#allocation12 + $0x8]] }
  0x41   :  { %v222_v61 = vadd.f32 %v218_v53, %v186_v25  ;;  %v223_v62 = vadd.f32 %v219_v54, %v187_v26  ;;  %v224_v63 = vadd.f32 %v220_v55, %v188_v27  ;;  %v225_v13 = vadd.f32 %v221_v56, %v189_v33  ;;  %s2542_s9 = sld [smem:[#allocation9 + $0x9]] }
  0x42   :  { %v244_v9 = vadd.f32 %v243_v43, %v238_v57  ;;  %v245_v10 = vadd.f32 %v243_v43, %v239_v58  ;;  %v246_v11 = vadd.f32 %v243_v43, %v240_v59  ;;  %v247_v12 = vadd.f32 %v243_v43, %v241_v60  ;;  %s2548_s12 = sld [smem:[#allocation13 + $0x8]] }
  0x43   :  { %v264_v14 = vmul.f32 %v263_v44, %v2379_v0  ;;  %v265_v15 = vmul.f32 %v263_v44, %v2381_v1  ;;  %v266_v16 = vmul.f32 %v263_v44, %v2383_v2  ;;  %v267_v21 = vmul.f32 %v263_v44, %v2385_v3  ;;  %s2551_s6 = sld [smem:[#allocation10 + $0x9]] }
  0x44   :  { %v249_v17 = vmax.f32 %v244_v9, 0.0  ;;  %v250_v18 = vmax.f32 %v245_v10, 0.0  ;;  %v251_v19 = vmax.f32 %v246_v11, 0.0  ;;  %v252_v20 = vmax.f32 %v247_v12, 0.0  ;;  %s2556_s3 = sld [smem:[#allocation12 + $0x9]] }
  0x45   :  { %v269_v22 = vstv %s2454_s18  ;;  %v279_v23 = vstv %s2460_s19  ;;  %v299_v24 = vstv %s2462_s20  ;;  %v289_v36 = vstv %s2468_s21  ;;  %s2558_s13 = sld [smem:[#allocation9 + $0xa]] }
  0x46   :  { %v254_v25 = vmul.f32 %v253_v8, %v249_v17  ;;  %v255_v26 = vmul.f32 %v253_v8, %v250_v18  ;;  %v256_v27 = vmul.f32 %v253_v8, %v251_v19  ;;  %v257_v28 = vmul.f32 %v253_v8, %v252_v20  ;;  %s2569_s14 = sld [smem:[#allocation13 + $0x9]] }
  0x47   :  { %v270_v29 = vmul.f32 %v269_v22, %v2387_v4  ;;  %v271_v30 = vmul.f32 %v269_v22, %v2391_v5  ;;  %v272_v31 = vmul.f32 %v269_v22, %v2393_v6  ;;  %v273_v32 = vmul.f32 %v269_v22, %v2395_v7  ;;  %s2574_s15 = sld [smem:[#allocation10 + $0xa]] }
  0x48   :  { %v258_v33 = vadd.f32 %v254_v25, %v222_v61  ;;  %v259_v34 = vadd.f32 %v255_v26, %v223_v62  ;;  %v260_v35 = vadd.f32 %v256_v27, %v224_v63  ;;  %v261_v41 = vadd.f32 %v257_v28, %v225_v13  ;;  %s2580_s0 = sld [smem:[#allocation12 + $0xa]] }
  0x49   :  { %v274_v37 = vadd.f32 %v270_v29, %v264_v14  ;;  %v275_v38 = vadd.f32 %v271_v30, %v265_v15  ;;  %v276_v39 = vadd.f32 %v272_v31, %v266_v16  ;;  %v277_v40 = vadd.f32 %v273_v32, %v267_v21  ;;  %s2582_s16 = sld [smem:[#allocation9 + $0xb]] }
  0x4a   :  { %v300_v42 = vmul.f32 %v299_v24, %v2379_v0  ;;  %v301_v43 = vmul.f32 %v299_v24, %v2381_v1  ;;  %v302_v44 = vmul.f32 %v299_v24, %v2383_v2  ;;  %v303_v49 = vmul.f32 %v299_v24, %v2385_v3  ;;  %s2588_s17 = sld [smem:[#allocation13 + $0xa]] }
  0x4b   :  { %v280_v45 = vadd.f32 %v279_v23, %v274_v37  ;;  %v281_v46 = vadd.f32 %v279_v23, %v275_v38  ;;  %v282_v47 = vadd.f32 %v279_v23, %v276_v39  ;;  %v283_v48 = vadd.f32 %v279_v23, %v277_v40  ;;  %s2591_s18 = sld [smem:[#allocation10 + $0xb]] }
  0x4c   :  { %v305_v50 = vstv %s2471_s1  ;;  %v315_v51 = vstv %s2476_s22  ;;  %v335_v52 = vstv %s2478_s23  ;;  %v325_v16 = vstv %s2489_s24  ;;  %s2596_s19 = sld [smem:[#allocation12 + $0xb]] }
  0x4d   :  { %v285_v53 = vmax.f32 %v280_v45, 0.0  ;;  %v286_v54 = vmax.f32 %v281_v46, 0.0  ;;  %v287_v55 = vmax.f32 %v282_v47, 0.0  ;;  %v288_v56 = vmax.f32 %v283_v48, 0.0  ;;  %s2598_s20 = sld [smem:[#allocation9 + $0xc]] }
  0x4e   :  { %v306_v57 = vmul.f32 %v305_v50, %v2387_v4  ;;  %v307_v58 = vmul.f32 %v305_v50, %v2391_v5  ;;  %v308_v59 = vmul.f32 %v305_v50, %v2393_v6  ;;  %v309_v60 = vmul.f32 %v305_v50, %v2395_v7  ;;  %s2609_s21 = sld [smem:[#allocation13 + $0xb]] }
  0x4f   :  { %v290_v61 = vmul.f32 %v289_v36, %v285_v53  ;;  %v291_v62 = vmul.f32 %v289_v36, %v286_v54  ;;  %v292_v63 = vmul.f32 %v289_v36, %v287_v55  ;;  %v293_v8 = vmul.f32 %v289_v36, %v288_v56  ;;  %s2614_s1 = sld [smem:[#allocation10 + $0xc]] }
  0x50   :  { %v310_v9 = vadd.f32 %v306_v57, %v300_v42  ;;  %v311_v10 = vadd.f32 %v307_v58, %v301_v43  ;;  %v312_v11 = vadd.f32 %v308_v59, %v302_v44  ;;  %v313_v12 = vadd.f32 %v309_v60, %v303_v49  ;;  %s2620_s22 = sld [smem:[#allocation12 + $0xc]] }
  0x51   :  { %v294_v13 = vadd.f32 %v290_v61, %v258_v33  ;;  %v295_v14 = vadd.f32 %v291_v62, %v259_v34  ;;  %v296_v15 = vadd.f32 %v292_v63, %v260_v35  ;;  %v297_v21 = vadd.f32 %v293_v8, %v261_v41  ;;  %s2622_s23 = sld [smem:[#allocation9 + $0xd]] }
  0x52   :  { %v316_v17 = vadd.f32 %v315_v51, %v310_v9  ;;  %v317_v18 = vadd.f32 %v315_v51, %v311_v10  ;;  %v318_v19 = vadd.f32 %v315_v51, %v312_v11  ;;  %v319_v20 = vadd.f32 %v315_v51, %v313_v12  ;;  %s2628_s24 = sld [smem:[#allocation13 + $0xc]] }
  0x53   :  { %v336_v22 = vmul.f32 %v335_v52, %v2379_v0  ;;  %v337_v23 = vmul.f32 %v335_v52, %v2381_v1  ;;  %v338_v24 = vmul.f32 %v335_v52, %v2383_v2  ;;  %v339_v29 = vmul.f32 %v335_v52, %v2385_v3 }
  0x54   :  { %v321_v25 = vmax.f32 %v316_v17, 0.0  ;;  %v322_v26 = vmax.f32 %v317_v18, 0.0  ;;  %v323_v27 = vmax.f32 %v318_v19, 0.0  ;;  %v324_v28 = vmax.f32 %v319_v20, 0.0 }
  0x55   :  { %v341_v30 = vstv %s2494_s2  ;;  %v351_v31 = vstv %s2500_s4  ;;  %v371_v32 = vstv %s2502_s25  ;;  %v361_v44 = vstv %s2508_s26  ;;  %s2631_s2 = sld [smem:[#allocation10 + $0xd]] }
  0x56   :  { %v326_v33 = vmul.f32 %v325_v16, %v321_v25  ;;  %v327_v34 = vmul.f32 %v325_v16, %v322_v26  ;;  %v328_v35 = vmul.f32 %v325_v16, %v323_v27  ;;  %v329_v36 = vmul.f32 %v325_v16, %v324_v28  ;;  %s2636_s4 = sld [smem:[#allocation12 + $0xd]] }
  0x57   :  { %v342_v37 = vmul.f32 %v341_v30, %v2387_v4  ;;  %v343_v38 = vmul.f32 %v341_v30, %v2391_v5  ;;  %v344_v39 = vmul.f32 %v341_v30, %v2393_v6  ;;  %v345_v40 = vmul.f32 %v341_v30, %v2395_v7  ;;  %s2638_s25 = sld [smem:[#allocation9 + $0xe]] }
  0x58   :  { %v330_v41 = vadd.f32 %v326_v33, %v294_v13  ;;  %v331_v42 = vadd.f32 %v327_v34, %v295_v14  ;;  %v332_v43 = vadd.f32 %v328_v35, %v296_v15  ;;  %v333_v49 = vadd.f32 %v329_v36, %v297_v21  ;;  %s2649_s26 = sld [smem:[#allocation13 + $0xd]] }
  0x59   :  { %v346_v45 = vadd.f32 %v342_v37, %v336_v22  ;;  %v347_v46 = vadd.f32 %v343_v38, %v337_v23  ;;  %v348_v47 = vadd.f32 %v344_v39, %v338_v24  ;;  %v349_v48 = vadd.f32 %v345_v40, %v339_v29 }
  0x5a   :  { %v372_v50 = vmul.f32 %v371_v32, %v2379_v0  ;;  %v373_v51 = vmul.f32 %v371_v32, %v2381_v1  ;;  %v374_v52 = vmul.f32 %v371_v32, %v2383_v2  ;;  %v375_v57 = vmul.f32 %v371_v32, %v2385_v3 }
  0x5b   :  { %v352_v53 = vadd.f32 %v351_v31, %v346_v45  ;;  %v353_v54 = vadd.f32 %v351_v31, %v347_v46  ;;  %v354_v55 = vadd.f32 %v351_v31, %v348_v47  ;;  %v355_v56 = vadd.f32 %v351_v31, %v349_v48 }
  0x5c   :  { %v377_v58 = vstv %s2511_s5  ;;  %v387_v59 = vstv %s2516_s27  ;;  %v407_v60 = vstv %s2518_s28  ;;  %v397_v24 = vstv %s2529_s29  ;;  %s2654_s5 = sld [smem:[#allocation10 + $0xe]] }
  0x5d   :  { %v357_v61 = vmax.f32 %v352_v53, 0.0  ;;  %v358_v62 = vmax.f32 %v353_v54, 0.0  ;;  %v359_v63 = vmax.f32 %v354_v55, 0.0  ;;  %v360_v8 = vmax.f32 %v355_v56, 0.0  ;;  %s2660_s27 = sld [smem:[#allocation12 + $0xe]] }
  0x5e   :  { %v378_v9 = vmul.f32 %v377_v58, %v2387_v4  ;;  %v379_v10 = vmul.f32 %v377_v58, %v2391_v5  ;;  %v380_v11 = vmul.f32 %v377_v58, %v2393_v6  ;;  %v381_v12 = vmul.f32 %v377_v58, %v2395_v7  ;;  %s2662_s28 = sld [smem:[#allocation9 + $0xf]] }
  0x5f   :  { %v362_v13 = vmul.f32 %v361_v44, %v357_v61  ;;  %v363_v14 = vmul.f32 %v361_v44, %v358_v62  ;;  %v364_v15 = vmul.f32 %v361_v44, %v359_v63  ;;  %v365_v16 = vmul.f32 %v361_v44, %v360_v8  ;;  %s2668_s29 = sld [smem:[#allocation13 + $0xe]] }
  0x60   :  { %v382_v17 = vadd.f32 %v378_v9, %v372_v50  ;;  %v383_v18 = vadd.f32 %v379_v10, %v373_v51  ;;  %v384_v19 = vadd.f32 %v380_v11, %v374_v52  ;;  %v385_v20 = vadd.f32 %v381_v12, %v375_v57 }
  0x61   :  { %v366_v21 = vadd.f32 %v362_v13, %v330_v41  ;;  %v367_v22 = vadd.f32 %v363_v14, %v331_v42  ;;  %v368_v23 = vadd.f32 %v364_v15, %v332_v43  ;;  %v369_v29 = vadd.f32 %v365_v16, %v333_v49 }
  0x62   :  { %v388_v25 = vadd.f32 %v387_v59, %v382_v17  ;;  %v389_v26 = vadd.f32 %v387_v59, %v383_v18  ;;  %v390_v27 = vadd.f32 %v387_v59, %v384_v19  ;;  %v391_v28 = vadd.f32 %v387_v59, %v385_v20 }
  0x63   :  { %v408_v30 = vmul.f32 %v407_v60, %v2379_v0  ;;  %v409_v31 = vmul.f32 %v407_v60, %v2381_v1  ;;  %v410_v32 = vmul.f32 %v407_v60, %v2383_v2  ;;  %v411_v37 = vmul.f32 %v407_v60, %v2385_v3 }
  0x64   :  { %v393_v33 = vmax.f32 %v388_v25, 0.0  ;;  %v394_v34 = vmax.f32 %v389_v26, 0.0  ;;  %v395_v35 = vmax.f32 %v390_v27, 0.0  ;;  %v396_v36 = vmax.f32 %v391_v28, 0.0 }
  0x65   :  { %v413_v38 = vstv %s2534_s30  ;;  %v423_v39 = vstv %s2540_s8  ;;  %v443_v40 = vstv %s2542_s9  ;;  %v433_v52 = vstv %s2548_s12  ;;  %s2671_s30 = sld [smem:[#allocation10 + $0xf]] }
  0x66   :  { %v398_v41 = vmul.f32 %v397_v24, %v393_v33  ;;  %v399_v42 = vmul.f32 %v397_v24, %v394_v34  ;;  %v400_v43 = vmul.f32 %v397_v24, %v395_v35  ;;  %v401_v44 = vmul.f32 %v397_v24, %v396_v36  ;;  %s2676_s8 = sld [smem:[#allocation12 + $0xf]] }
  0x67   :  { %v414_v45 = vmul.f32 %v413_v38, %v2387_v4  ;;  %v415_v46 = vmul.f32 %v413_v38, %v2391_v5  ;;  %v416_v47 = vmul.f32 %v413_v38, %v2393_v6  ;;  %v417_v48 = vmul.f32 %v413_v38, %v2395_v7  ;;  %s2678_s9 = sld [smem:[#allocation9 + $0x10]] }
  0x68   :  { %v402_v49 = vadd.f32 %v398_v41, %v366_v21  ;;  %v403_v50 = vadd.f32 %v399_v42, %v367_v22  ;;  %v404_v51 = vadd.f32 %v400_v43, %v368_v23  ;;  %v405_v57 = vadd.f32 %v401_v44, %v369_v29  ;;  %s2697_s12 = sld [smem:[#allocation13 + $0xf]] }
  0x69   :  { %v418_v53 = vadd.f32 %v414_v45, %v408_v30  ;;  %v419_v54 = vadd.f32 %v415_v46, %v409_v31  ;;  %v420_v55 = vadd.f32 %v416_v47, %v410_v32  ;;  %v421_v56 = vadd.f32 %v417_v48, %v411_v37 }
  0x6a   :  { %v444_v58 = vmul.f32 %v443_v40, %v2379_v0  ;;  %v445_v59 = vmul.f32 %v443_v40, %v2381_v1  ;;  %v446_v60 = vmul.f32 %v443_v40, %v2383_v2  ;;  %v447_v9 = vmul.f32 %v443_v40, %v2385_v3 }
  0x6b   :  { %v424_v61 = vadd.f32 %v423_v39, %v418_v53  ;;  %v425_v62 = vadd.f32 %v423_v39, %v419_v54  ;;  %v426_v63 = vadd.f32 %v423_v39, %v420_v55  ;;  %v427_v8 = vadd.f32 %v423_v39, %v421_v56 }
  0x6c   :  { %v449_v10 = vstv %s2551_s6  ;;  %v459_v11 = vstv %s2556_s3  ;;  %v479_v12 = vstv %s2558_s13  ;;  %v469_v32 = vstv %s2569_s14  ;;  %s2708_s6 = sld [smem:[#allocation10 + $0x10]] }
  0x6d   :  { %v429_v13 = vmax.f32 %v424_v61, 0.0  ;;  %v430_v14 = vmax.f32 %v425_v62, 0.0  ;;  %v431_v15 = vmax.f32 %v426_v63, 0.0  ;;  %v432_v16 = vmax.f32 %v427_v8, 0.0  ;;  %s2716_s3 = sld [smem:[#allocation12 + $0x10]] }
  0x6e   :  { %v450_v17 = vmul.f32 %v449_v10, %v2387_v4  ;;  %v451_v18 = vmul.f32 %v449_v10, %v2391_v5  ;;  %v452_v19 = vmul.f32 %v449_v10, %v2393_v6  ;;  %v453_v20 = vmul.f32 %v449_v10, %v2395_v7  ;;  %s2718_s13 = sld [smem:[#allocation9 + $0x11]] }
  0x6f   :  { %v434_v21 = vmul.f32 %v433_v52, %v429_v13  ;;  %v435_v22 = vmul.f32 %v433_v52, %v430_v14  ;;  %v436_v23 = vmul.f32 %v433_v52, %v431_v15  ;;  %v437_v24 = vmul.f32 %v433_v52, %v432_v16  ;;  %s2724_s14 = sld [smem:[#allocation13 + $0x10]] }
  0x70   :  { %v454_v25 = vadd.f32 %v450_v17, %v444_v58  ;;  %v455_v26 = vadd.f32 %v451_v18, %v445_v59  ;;  %v456_v27 = vadd.f32 %v452_v19, %v446_v60  ;;  %v457_v28 = vadd.f32 %v453_v20, %v447_v9 }
  0x71   :  { %v438_v29 = vadd.f32 %v434_v21, %v402_v49  ;;  %v439_v30 = vadd.f32 %v435_v22, %v403_v50  ;;  %v440_v31 = vadd.f32 %v436_v23, %v404_v51  ;;  %v441_v37 = vadd.f32 %v437_v24, %v405_v57 }
  0x72   :  { %v460_v33 = vadd.f32 %v459_v11, %v454_v25  ;;  %v461_v34 = vadd.f32 %v459_v11, %v455_v26  ;;  %v462_v35 = vadd.f32 %v459_v11, %v456_v27  ;;  %v463_v36 = vadd.f32 %v459_v11, %v457_v28 }
  0x73   :  { %v480_v38 = vmul.f32 %v479_v12, %v2379_v0  ;;  %v481_v39 = vmul.f32 %v479_v12, %v2381_v1  ;;  %v482_v40 = vmul.f32 %v479_v12, %v2383_v2  ;;  %v483_v45 = vmul.f32 %v479_v12, %v2385_v3 }
  0x74   :  { %v465_v41 = vmax.f32 %v460_v33, 0.0  ;;  %v466_v42 = vmax.f32 %v461_v34, 0.0  ;;  %v467_v43 = vmax.f32 %v462_v35, 0.0  ;;  %v468_v44 = vmax.f32 %v463_v36, 0.0 }
  0x75   :  { %v485_v46 = vstv %s2574_s15  ;;  %v495_v47 = vstv %s2580_s0  ;;  %v515_v48 = vstv %s2582_s16  ;;  %v505_v60 = vstv %s2588_s17  ;;  %s2727_s15 = sld [smem:[#allocation10 + $0x11]] }
  0x76   :  { %v470_v49 = vmul.f32 %v469_v32, %v465_v41  ;;  %v471_v50 = vmul.f32 %v469_v32, %v466_v42  ;;  %v472_v51 = vmul.f32 %v469_v32, %v467_v43  ;;  %v473_v52 = vmul.f32 %v469_v32, %v468_v44  ;;  %s2732_s0 = sld [smem:[#allocation12 + $0x11]] }
  0x77   :  { %v486_v53 = vmul.f32 %v485_v46, %v2387_v4  ;;  %v487_v54 = vmul.f32 %v485_v46, %v2391_v5  ;;  %v488_v55 = vmul.f32 %v485_v46, %v2393_v6  ;;  %v489_v56 = vmul.f32 %v485_v46, %v2395_v7  ;;  %s2734_s16 = sld [smem:[#allocation9 + $0x12]] }
  0x78   :  { %v474_v57 = vadd.f32 %v470_v49, %v438_v29  ;;  %v475_v58 = vadd.f32 %v471_v50, %v439_v30  ;;  %v476_v59 = vadd.f32 %v472_v51, %v440_v31  ;;  %v477_v9 = vadd.f32 %v473_v52, %v441_v37  ;;  %s2745_s17 = sld [smem:[#allocation13 + $0x11]] }
  0x79   :  { %v490_v61 = vadd.f32 %v486_v53, %v480_v38  ;;  %v491_v62 = vadd.f32 %v487_v54, %v481_v39  ;;  %v492_v63 = vadd.f32 %v488_v55, %v482_v40  ;;  %v493_v8 = vadd.f32 %v489_v56, %v483_v45 }
  0x7a   :  { %v516_v10 = vmul.f32 %v515_v48, %v2379_v0  ;;  %v517_v11 = vmul.f32 %v515_v48, %v2381_v1  ;;  %v518_v12 = vmul.f32 %v515_v48, %v2383_v2  ;;  %v519_v17 = vmul.f32 %v515_v48, %v2385_v3 }
  0x7b   :  { %v496_v13 = vadd.f32 %v495_v47, %v490_v61  ;;  %v497_v14 = vadd.f32 %v495_v47, %v491_v62  ;;  %v498_v15 = vadd.f32 %v495_v47, %v492_v63  ;;  %v499_v16 = vadd.f32 %v495_v47, %v493_v8 }
  0x7c   :  { %v521_v18 = vstv %s2591_s18  ;;  %v531_v19 = vstv %s2596_s19  ;;  %v551_v20 = vstv %s2598_s20  ;;  %v541_v40 = vstv %s2609_s21  ;;  %s2750_s18 = sld [smem:[#allocation10 + $0x12]] }
  0x7d   :  { %v501_v21 = vmax.f32 %v496_v13, 0.0  ;;  %v502_v22 = vmax.f32 %v497_v14, 0.0  ;;  %v503_v23 = vmax.f32 %v498_v15, 0.0  ;;  %v504_v24 = vmax.f32 %v499_v16, 0.0  ;;  %s2756_s19 = sld [smem:[#allocation12 + $0x12]] }
  0x7e   :  { %v522_v25 = vmul.f32 %v521_v18, %v2387_v4  ;;  %v523_v26 = vmul.f32 %v521_v18, %v2391_v5  ;;  %v524_v27 = vmul.f32 %v521_v18, %v2393_v6  ;;  %v525_v28 = vmul.f32 %v521_v18, %v2395_v7  ;;  %s2758_s20 = sld [smem:[#allocation9 + $0x13]] }
  0x7f   :  { %v506_v29 = vmul.f32 %v505_v60, %v501_v21  ;;  %v507_v30 = vmul.f32 %v505_v60, %v502_v22  ;;  %v508_v31 = vmul.f32 %v505_v60, %v503_v23  ;;  %v509_v32 = vmul.f32 %v505_v60, %v504_v24  ;;  %s2764_s21 = sld [smem:[#allocation13 + $0x12]] }
  0x80   :  { %v526_v33 = vadd.f32 %v522_v25, %v516_v10  ;;  %v527_v34 = vadd.f32 %v523_v26, %v517_v11  ;;  %v528_v35 = vadd.f32 %v524_v27, %v518_v12  ;;  %v529_v36 = vadd.f32 %v525_v28, %v519_v17 }
  0x81   :  { %v510_v37 = vadd.f32 %v506_v29, %v474_v57  ;;  %v511_v38 = vadd.f32 %v507_v30, %v475_v58  ;;  %v512_v39 = vadd.f32 %v508_v31, %v476_v59  ;;  %v513_v45 = vadd.f32 %v509_v32, %v477_v9 }
  0x82   :  { %v532_v41 = vadd.f32 %v531_v19, %v526_v33  ;;  %v533_v42 = vadd.f32 %v531_v19, %v527_v34  ;;  %v534_v43 = vadd.f32 %v531_v19, %v528_v35  ;;  %v535_v44 = vadd.f32 %v531_v19, %v529_v36 }
  0x83   :  { %v552_v46 = vmul.f32 %v551_v20, %v2379_v0  ;;  %v553_v47 = vmul.f32 %v551_v20, %v2381_v1  ;;  %v554_v48 = vmul.f32 %v551_v20, %v2383_v2  ;;  %v555_v53 = vmul.f32 %v551_v20, %v2385_v3 }
  0x84   :  { %v537_v49 = vmax.f32 %v532_v41, 0.0  ;;  %v538_v50 = vmax.f32 %v533_v42, 0.0  ;;  %v539_v51 = vmax.f32 %v534_v43, 0.0  ;;  %v540_v52 = vmax.f32 %v535_v44, 0.0 }
  0x85   :  { %v557_v54 = vstv %s2614_s1  ;;  %v567_v55 = vstv %s2620_s22  ;;  %v587_v56 = vstv %s2622_s23  ;;  %v577_v12 = vstv %s2628_s24  ;;  %s2767_s1 = sld [smem:[#allocation10 + $0x13]] }
  0x86   :  { %v542_v57 = vmul.f32 %v541_v40, %v537_v49  ;;  %v543_v58 = vmul.f32 %v541_v40, %v538_v50  ;;  %v544_v59 = vmul.f32 %v541_v40, %v539_v51  ;;  %v545_v60 = vmul.f32 %v541_v40, %v540_v52  ;;  %s2772_s22 = sld [smem:[#allocation12 + $0x13]] }
  0x87   :  { %v558_v61 = vmul.f32 %v557_v54, %v2387_v4  ;;  %v559_v62 = vmul.f32 %v557_v54, %v2391_v5  ;;  %v560_v63 = vmul.f32 %v557_v54, %v2393_v6  ;;  %v561_v8 = vmul.f32 %v557_v54, %v2395_v7  ;;  %s2774_s23 = sld [smem:[#allocation9 + $0x14]] }
  0x88   :  { %v546_v9 = vadd.f32 %v542_v57, %v510_v37  ;;  %v547_v10 = vadd.f32 %v543_v58, %v511_v38  ;;  %v548_v11 = vadd.f32 %v544_v59, %v512_v39  ;;  %v549_v17 = vadd.f32 %v545_v60, %v513_v45  ;;  %s2785_s24 = sld [smem:[#allocation13 + $0x13]] }
  0x89   :  { %v562_v13 = vadd.f32 %v558_v61, %v552_v46  ;;  %v563_v14 = vadd.f32 %v559_v62, %v553_v47  ;;  %v564_v15 = vadd.f32 %v560_v63, %v554_v48  ;;  %v565_v16 = vadd.f32 %v561_v8, %v555_v53  ;;  %v2684_v63 = vld [vmem:[#allocation7] sm:$0xff]  ;;  %v2687_v8 = vld [vmem:[#allocation7 + $0x8] sm:$0xff] }
  0x8a   :  { %v588_v18 = vmul.f32 %v587_v56, %v2379_v0  ;;  %v589_v19 = vmul.f32 %v587_v56, %v2381_v1  ;;  %v590_v20 = vmul.f32 %v587_v56, %v2383_v2  ;;  %v591_v25 = vmul.f32 %v587_v56, %v2385_v3 }
  0x8b   :  { %v568_v21 = vadd.f32 %v567_v55, %v562_v13  ;;  %v569_v22 = vadd.f32 %v567_v55, %v563_v14  ;;  %v570_v23 = vadd.f32 %v567_v55, %v564_v15  ;;  %v571_v24 = vadd.f32 %v567_v55, %v565_v16 }
  0x8c   :  { %v593_v26 = vstv %s2631_s2  ;;  %v603_v27 = vstv %s2636_s4  ;;  %v623_v28 = vstv %s2638_s25  ;;  %v613_v47 = vstv %s2649_s26  ;;  %s2790_s2 = sld [smem:[#allocation10 + $0x14]] }
  0x8d   :  { %v573_v29 = vmax.f32 %v568_v21, 0.0  ;;  %v574_v30 = vmax.f32 %v569_v22, 0.0  ;;  %v575_v31 = vmax.f32 %v570_v23, 0.0  ;;  %v576_v32 = vmax.f32 %v571_v24, 0.0  ;;  %v2699_v22 = vld [vmem:[#allocation3] sm:$0xff]  ;;  %v2702_v24 = vld [vmem:[#allocation3 + $0x8] sm:$0xff] }
  0x8e   :  { %v594_v33 = vmul.f32 %v593_v26, %v2387_v4  ;;  %v595_v34 = vmul.f32 %v593_v26, %v2391_v5  ;;  %v596_v35 = vmul.f32 %v593_v26, %v2393_v6  ;;  %v597_v36 = vmul.f32 %v593_v26, %v2395_v7  ;;  %v2705_v26 = vld [vmem:[#allocation3 + $0x10] sm:$0xff]  ;;  %s2796_s4 = sld [smem:[#allocation12 + $0x14]] }
  0x8f   :  { %v578_v37 = vmul.f32 %v577_v12, %v573_v29  ;;  %v579_v38 = vmul.f32 %v577_v12, %v574_v30  ;;  %v580_v39 = vmul.f32 %v577_v12, %v575_v31  ;;  %v581_v40 = vmul.f32 %v577_v12, %v576_v32  ;;  %v2710_v32 = vld [vmem:[#allocation3 + $0x18] sm:$0xff]  ;;  %s2798_s25 = sld [smem:[#allocation9 + $0x15]] }
  0x90   :  { %v598_v41 = vadd.f32 %v594_v33, %v588_v18  ;;  %v599_v42 = vadd.f32 %v595_v34, %v589_v19  ;;  %v600_v43 = vadd.f32 %v596_v35, %v590_v20  ;;  %v601_v44 = vadd.f32 %v597_v36, %v591_v25  ;;  %s2804_s26 = sld [smem:[#allocation13 + $0x14]] }
  0x91   :  { %v582_v45 = vadd.f32 %v578_v37, %v546_v9  ;;  %v583_v46 = vadd.f32 %v579_v38, %v547_v10  ;;  %v584_v4 = vadd.f32 %v580_v39, %v548_v11  ;;  %v585_v49 = vadd.f32 %v581_v40, %v549_v17  ;;  %v2690_v10 = vld [vmem:[#allocation7 + $0x10] sm:$0xff]  ;;  %v2693_v11 = vld [vmem:[#allocation7 + $0x18] sm:$0xff] }
  0x92   :  { %v604_v48 = vadd.f32 %v603_v27, %v598_v41  ;;  %v605_v5 = vadd.f32 %v603_v27, %v599_v42  ;;  %v606_v6 = vadd.f32 %v603_v27, %v600_v43  ;;  %v607_v7 = vadd.f32 %v603_v27, %v601_v44 }
  0x93   :  { %v624_v50 = vmul.f32 %v623_v28, %v2379_v0  ;;  %v625_v51 = vmul.f32 %v623_v28, %v2381_v1  ;;  %v626_v52 = vmul.f32 %v623_v28, %v2383_v2  ;;  %v627_v57 = vmul.f32 %v623_v28, %v2385_v3 }
  0x94   :  { %v609_v53 = vmax.f32 %v604_v48, 0.0  ;;  %v610_v54 = vmax.f32 %v605_v5, 0.0  ;;  %v611_v55 = vmax.f32 %v606_v6, 0.0  ;;  %v612_v56 = vmax.f32 %v607_v7, 0.0 }
  0x95   :  { %v629_v58 = vstv %s2654_s5  ;;  %v639_v59 = vstv %s2660_s27  ;;  %v659_v60 = vstv %s2662_s28  ;;  %v649_v16 = vstv %s2668_s29  ;;  %s2807_s5 = sld [smem:[#allocation10 + $0x15]] }
  0x96   :  { %v614_v61 = vmul.f32 %v613_v47, %v609_v53  ;;  %v615_v0 = vmul.f32 %v613_v47, %v610_v54  ;;  %v616_v62 = vmul.f32 %v613_v47, %v611_v55  ;;  %v617_v1 = vmul.f32 %v613_v47, %v612_v56  ;;  %s2812_s27 = sld [smem:[#allocation12 + $0x15]] }
  0x97   :  { %v630_v2 = vmul.f32 %v2684_v63, %v629_v58  ;;  %v631_v9 = vmul.f32 %v2687_v8, %v629_v58  ;;  %v632_v3 = vmul.f32 %v2690_v10, %v629_v58  ;;  %v633_v12 = vmul.f32 %v2693_v11, %v629_v58  ;;  %s2814_s28 = sld [smem:[#allocation9 + $0x16]] }
  0x98   :  { %v618_v13 = vadd.f32 %v614_v61, %v582_v45  ;;  %v619_v14 = vadd.f32 %v615_v0, %v583_v46  ;;  %v620_v15 = vadd.f32 %v616_v62, %v584_v4  ;;  %v621_v21 = vadd.f32 %v617_v1, %v585_v49  ;;  %s2825_s29 = sld [smem:[#allocation13 + $0x15]] }
  0x99   :  { %v634_v17 = vadd.f32 %v630_v2, %v624_v50  ;;  %v635_v18 = vadd.f32 %v631_v9, %v625_v51  ;;  %v636_v19 = vadd.f32 %v632_v3, %v626_v52  ;;  %v637_v20 = vadd.f32 %v633_v12, %v627_v57 }
  0x9a   :  { %v660_v23 = vmul.f32 %v2699_v22, %v659_v60  ;;  %v661_v25 = vmul.f32 %v2702_v24, %v659_v60  ;;  %v662_v27 = vmul.f32 %v2705_v26, %v659_v60  ;;  %v663_v33 = vmul.f32 %v2710_v32, %v659_v60 }
  0x9b   :  { %v640_v28 = vadd.f32 %v639_v59, %v634_v17  ;;  %v641_v29 = vadd.f32 %v639_v59, %v635_v18  ;;  %v642_v30 = vadd.f32 %v639_v59, %v636_v19  ;;  %v643_v31 = vadd.f32 %v639_v59, %v637_v20 }
  0x9c   :  { %v665_v34 = vstv %s2671_s30  ;;  %v675_v35 = vstv %s2676_s8  ;;  %v695_v36 = vstv %s2678_s9  ;;  %v685_v52 = vstv %s2697_s12  ;;  %s2830_s30 = sld [smem:[#allocation10 + $0x16]] }
  0x9d   :  { %v645_v37 = vmax.f32 %v640_v28, 0.0  ;;  %v646_v38 = vmax.f32 %v641_v29, 0.0  ;;  %v647_v39 = vmax.f32 %v642_v30, 0.0  ;;  %v648_v40 = vmax.f32 %v643_v31, 0.0  ;;  %s2836_s8 = sld [smem:[#allocation12 + $0x16]] }
  0x9e   :  { %v666_v41 = vmul.f32 %v2684_v63, %v665_v34  ;;  %v667_v42 = vmul.f32 %v2687_v8, %v665_v34  ;;  %v668_v43 = vmul.f32 %v2690_v10, %v665_v34  ;;  %v669_v44 = vmul.f32 %v2693_v11, %v665_v34  ;;  %s2838_s9 = sld [smem:[#allocation9 + $0x17]] }
  0x9f   :  { %v650_v45 = vmul.f32 %v649_v16, %v645_v37  ;;  %v651_v46 = vmul.f32 %v649_v16, %v646_v38  ;;  %v652_v4 = vmul.f32 %v649_v16, %v647_v39  ;;  %v653_v47 = vmul.f32 %v649_v16, %v648_v40  ;;  %s2844_s12 = sld [smem:[#allocation13 + $0x16]] }
  0xa0   :  { %v670_v48 = vadd.f32 %v666_v41, %v660_v23  ;;  %v671_v5 = vadd.f32 %v667_v42, %v661_v25  ;;  %v672_v6 = vadd.f32 %v668_v43, %v662_v27  ;;  %v673_v7 = vadd.f32 %v669_v44, %v663_v33 }
  0xa1   :  { %v654_v49 = vadd.f32 %v650_v45, %v618_v13  ;;  %v655_v50 = vadd.f32 %v651_v46, %v619_v14  ;;  %v656_v51 = vadd.f32 %v652_v4, %v620_v15  ;;  %v657_v57 = vadd.f32 %v653_v47, %v621_v21 }
  0xa2   :  { %v676_v53 = vadd.f32 %v675_v35, %v670_v48  ;;  %v677_v54 = vadd.f32 %v675_v35, %v671_v5  ;;  %v678_v55 = vadd.f32 %v675_v35, %v672_v6  ;;  %v679_v56 = vadd.f32 %v675_v35, %v673_v7 }
  0xa3   :  { %v696_v58 = vmul.f32 %v2699_v22, %v695_v36  ;;  %v697_v59 = vmul.f32 %v2702_v24, %v695_v36  ;;  %v698_v60 = vmul.f32 %v2705_v26, %v695_v36  ;;  %v699_v2 = vmul.f32 %v2710_v32, %v695_v36 }
  0xa4   :  { %v681_v61 = vmax.f32 %v676_v53, 0.0  ;;  %v682_v0 = vmax.f32 %v677_v54, 0.0  ;;  %v683_v62 = vmax.f32 %v678_v55, 0.0  ;;  %v684_v1 = vmax.f32 %v679_v56, 0.0 }
  0xa5   :  { %v701_v9 = vstv %s2708_s6  ;;  %v711_v3 = vstv %s2716_s3  ;;  %v731_v12 = vstv %s2718_s13  ;;  %v721_v27 = vstv %s2724_s14  ;;  %s2847_s6 = sld [smem:[#allocation10 + $0x17]] }
  0xa6   :  { %v686_v13 = vmul.f32 %v685_v52, %v681_v61  ;;  %v687_v14 = vmul.f32 %v685_v52, %v682_v0  ;;  %v688_v15 = vmul.f32 %v685_v52, %v683_v62  ;;  %v689_v16 = vmul.f32 %v685_v52, %v684_v1  ;;  %s2852_s3 = sld [smem:[#allocation12 + $0x17]] }
  0xa7   :  { %v702_v17 = vmul.f32 %v2684_v63, %v701_v9  ;;  %v703_v18 = vmul.f32 %v2687_v8, %v701_v9  ;;  %v704_v19 = vmul.f32 %v2690_v10, %v701_v9  ;;  %v705_v20 = vmul.f32 %v2693_v11, %v701_v9  ;;  %s2854_s13 = sld [smem:[#allocation9 + $0x18]] }
  0xa8   :  { %v690_v21 = vadd.f32 %v686_v13, %v654_v49  ;;  %v691_v23 = vadd.f32 %v687_v14, %v655_v50  ;;  %v692_v25 = vadd.f32 %v688_v15, %v656_v51  ;;  %v693_v33 = vadd.f32 %v689_v16, %v657_v57  ;;  %s2865_s14 = sld [smem:[#allocation13 + $0x17]] }
  0xa9   :  { %v706_v28 = vadd.f32 %v702_v17, %v696_v58  ;;  %v707_v29 = vadd.f32 %v703_v18, %v697_v59  ;;  %v708_v30 = vadd.f32 %v704_v19, %v698_v60  ;;  %v709_v31 = vadd.f32 %v705_v20, %v699_v2 }
  0xaa   :  { %v732_v34 = vmul.f32 %v2699_v22, %v731_v12  ;;  %v733_v35 = vmul.f32 %v2702_v24, %v731_v12  ;;  %v734_v36 = vmul.f32 %v2705_v26, %v731_v12  ;;  %v735_v41 = vmul.f32 %v2710_v32, %v731_v12 }
  0xab   :  { %v712_v37 = vadd.f32 %v711_v3, %v706_v28  ;;  %v713_v38 = vadd.f32 %v711_v3, %v707_v29  ;;  %v714_v39 = vadd.f32 %v711_v3, %v708_v30  ;;  %v715_v40 = vadd.f32 %v711_v3, %v709_v31 }
  0xac   :  { %v737_v42 = vstv %s2727_s15  ;;  %v747_v43 = vstv %s2732_s0  ;;  %v767_v44 = vstv %s2734_s16  ;;  %v757_v60 = vstv %s2745_s17  ;;  %s2870_s15 = sld [smem:[#allocation10 + $0x18]] }
  0xad   :  { %v717_v45 = vmax.f32 %v712_v37, 0.0  ;;  %v718_v46 = vmax.f32 %v713_v38, 0.0  ;;  %v719_v4 = vmax.f32 %v714_v39, 0.0  ;;  %v720_v47 = vmax.f32 %v715_v40, 0.0  ;;  %s2876_s0 = sld [smem:[#allocation12 + $0x18]] }
  0xae   :  { %v738_v48 = vmul.f32 %v2684_v63, %v737_v42  ;;  %v739_v5 = vmul.f32 %v2687_v8, %v737_v42  ;;  %v740_v6 = vmul.f32 %v2690_v10, %v737_v42  ;;  %v741_v7 = vmul.f32 %v2693_v11, %v737_v42  ;;  %s2878_s16 = sld [smem:[#allocation9 + $0x19]] }
  0xaf   :  { %v722_v49 = vmul.f32 %v721_v27, %v717_v45  ;;  %v723_v50 = vmul.f32 %v721_v27, %v718_v46  ;;  %v724_v51 = vmul.f32 %v721_v27, %v719_v4  ;;  %v725_v52 = vmul.f32 %v721_v27, %v720_v47  ;;  %s2884_s17 = sld [smem:[#allocation13 + $0x18]] }
  0xb0   :  { %v742_v53 = vadd.f32 %v738_v48, %v732_v34  ;;  %v743_v54 = vadd.f32 %v739_v5, %v733_v35  ;;  %v744_v55 = vadd.f32 %v740_v6, %v734_v36  ;;  %v745_v56 = vadd.f32 %v741_v7, %v735_v41 }
  0xb1   :  { %v726_v57 = vadd.f32 %v722_v49, %v690_v21  ;;  %v727_v58 = vadd.f32 %v723_v50, %v691_v23  ;;  %v728_v59 = vadd.f32 %v724_v51, %v692_v25  ;;  %v729_v2 = vadd.f32 %v725_v52, %v693_v33 }
  0xb2   :  { %v748_v61 = vadd.f32 %v747_v43, %v742_v53  ;;  %v749_v0 = vadd.f32 %v747_v43, %v743_v54  ;;  %v750_v62 = vadd.f32 %v747_v43, %v744_v55  ;;  %v751_v1 = vadd.f32 %v747_v43, %v745_v56 }
  0xb3   :  { %v768_v9 = vmul.f32 %v2699_v22, %v767_v44  ;;  %v769_v3 = vmul.f32 %v2702_v24, %v767_v44  ;;  %v770_v12 = vmul.f32 %v2705_v26, %v767_v44  ;;  %v771_v17 = vmul.f32 %v2710_v32, %v767_v44 }
  0xb4   :  { %v753_v13 = vmax.f32 %v748_v61, 0.0  ;;  %v754_v14 = vmax.f32 %v749_v0, 0.0  ;;  %v755_v15 = vmax.f32 %v750_v62, 0.0  ;;  %v756_v16 = vmax.f32 %v751_v1, 0.0 }
  0xb5   :  { %v773_v18 = vstv %s2750_s18  ;;  %v783_v19 = vstv %s2756_s19  ;;  %v803_v20 = vstv %s2758_s20  ;;  %v793_v36 = vstv %s2764_s21  ;;  %s2887_s18 = sld [smem:[#allocation10 + $0x19]] }
  0xb6   :  { %v758_v21 = vmul.f32 %v757_v60, %v753_v13  ;;  %v759_v23 = vmul.f32 %v757_v60, %v754_v14  ;;  %v760_v25 = vmul.f32 %v757_v60, %v755_v15  ;;  %v761_v27 = vmul.f32 %v757_v60, %v756_v16  ;;  %s2892_s19 = sld [smem:[#allocation12 + $0x19]] }
  0xb7   :  { %v774_v28 = vmul.f32 %v2684_v63, %v773_v18  ;;  %v775_v29 = vmul.f32 %v2687_v8, %v773_v18  ;;  %v776_v30 = vmul.f32 %v2690_v10, %v773_v18  ;;  %v777_v31 = vmul.f32 %v2693_v11, %v773_v18  ;;  %s2894_s20 = sld [smem:[#allocation9 + $0x1a]] }
  0xb8   :  { %v762_v33 = vadd.f32 %v758_v21, %v726_v57  ;;  %v763_v34 = vadd.f32 %v759_v23, %v727_v58  ;;  %v764_v35 = vadd.f32 %v760_v25, %v728_v59  ;;  %v765_v41 = vadd.f32 %v761_v27, %v729_v2  ;;  %s2905_s21 = sld [smem:[#allocation13 + $0x19]] }
  0xb9   :  { %v778_v37 = vadd.f32 %v774_v28, %v768_v9  ;;  %v779_v38 = vadd.f32 %v775_v29, %v769_v3  ;;  %v780_v39 = vadd.f32 %v776_v30, %v770_v12  ;;  %v781_v40 = vadd.f32 %v777_v31, %v771_v17 }
  0xba   :  { %v804_v42 = vmul.f32 %v2699_v22, %v803_v20  ;;  %v805_v43 = vmul.f32 %v2702_v24, %v803_v20  ;;  %v806_v44 = vmul.f32 %v2705_v26, %v803_v20  ;;  %v807_v48 = vmul.f32 %v2710_v32, %v803_v20 }
  0xbb   :  { %v784_v45 = vadd.f32 %v783_v19, %v778_v37  ;;  %v785_v46 = vadd.f32 %v783_v19, %v779_v38  ;;  %v786_v4 = vadd.f32 %v783_v19, %v780_v39  ;;  %v787_v47 = vadd.f32 %v783_v19, %v781_v40 }
  0xbc   :  { %v809_v5 = vstv %s2767_s1  ;;  %v819_v6 = vstv %s2772_s22  ;;  %v839_v7 = vstv %s2774_s23  ;;  %v829_v12 = vstv %s2785_s24  ;;  %s2910_s1 = sld [smem:[#allocation10 + $0x1a]] }
  0xbd   :  { %v789_v49 = vmax.f32 %v784_v45, 0.0  ;;  %v790_v50 = vmax.f32 %v785_v46, 0.0  ;;  %v791_v51 = vmax.f32 %v786_v4, 0.0  ;;  %v792_v52 = vmax.f32 %v787_v47, 0.0  ;;  %s2916_s22 = sld [smem:[#allocation12 + $0x1a]] }
  0xbe   :  { %v810_v53 = vmul.f32 %v2684_v63, %v809_v5  ;;  %v811_v54 = vmul.f32 %v2687_v8, %v809_v5  ;;  %v812_v55 = vmul.f32 %v2690_v10, %v809_v5  ;;  %v813_v56 = vmul.f32 %v2693_v11, %v809_v5  ;;  %s2918_s23 = sld [smem:[#allocation9 + $0x1b]] }
  0xbf   :  { %v794_v57 = vmul.f32 %v793_v36, %v789_v49  ;;  %v795_v58 = vmul.f32 %v793_v36, %v790_v50  ;;  %v796_v59 = vmul.f32 %v793_v36, %v791_v51  ;;  %v797_v60 = vmul.f32 %v793_v36, %v792_v52  ;;  %s2924_s24 = sld [smem:[#allocation13 + $0x1a]] }
  0xc0   :  { %v814_v61 = vadd.f32 %v810_v53, %v804_v42  ;;  %v815_v0 = vadd.f32 %v811_v54, %v805_v43  ;;  %v816_v62 = vadd.f32 %v812_v55, %v806_v44  ;;  %v817_v1 = vadd.f32 %v813_v56, %v807_v48 }
  0xc1   :  { %v798_v2 = vadd.f32 %v794_v57, %v762_v33  ;;  %v799_v9 = vadd.f32 %v795_v58, %v763_v34  ;;  %v800_v3 = vadd.f32 %v796_v59, %v764_v35  ;;  %v801_v17 = vadd.f32 %v797_v60, %v765_v41 }
  0xc2   :  { %v820_v13 = vadd.f32 %v819_v6, %v814_v61  ;;  %v821_v14 = vadd.f32 %v819_v6, %v815_v0  ;;  %v822_v15 = vadd.f32 %v819_v6, %v816_v62  ;;  %v823_v16 = vadd.f32 %v819_v6, %v817_v1 }
  0xc3   :  { %v840_v18 = vmul.f32 %v2699_v22, %v839_v7  ;;  %v841_v19 = vmul.f32 %v2702_v24, %v839_v7  ;;  %v842_v20 = vmul.f32 %v2705_v26, %v839_v7  ;;  %v843_v28 = vmul.f32 %v2710_v32, %v839_v7 }
  0xc4   :  { %v825_v21 = vmax.f32 %v820_v13, 0.0  ;;  %v826_v23 = vmax.f32 %v821_v14, 0.0  ;;  %v827_v25 = vmax.f32 %v822_v15, 0.0  ;;  %v828_v27 = vmax.f32 %v823_v16, 0.0 }
  0xc5   :  { %v845_v29 = vstv %s2790_s2  ;;  %v855_v30 = vstv %s2796_s4  ;;  %v875_v31 = vstv %s2798_s25  ;;  %v865_v44 = vstv %s2804_s26  ;;  %s2927_s2 = sld [smem:[#allocation10 + $0x1b]] }
  0xc6   :  { %v830_v33 = vmul.f32 %v829_v12, %v825_v21  ;;  %v831_v34 = vmul.f32 %v829_v12, %v826_v23  ;;  %v832_v35 = vmul.f32 %v829_v12, %v827_v25  ;;  %v833_v36 = vmul.f32 %v829_v12, %v828_v27  ;;  %s2932_s4 = sld [smem:[#allocation12 + $0x1b]] }
  0xc7   :  { %v846_v37 = vmul.f32 %v2684_v63, %v845_v29  ;;  %v847_v38 = vmul.f32 %v2687_v8, %v845_v29  ;;  %v848_v39 = vmul.f32 %v2690_v10, %v845_v29  ;;  %v849_v40 = vmul.f32 %v2693_v11, %v845_v29  ;;  %s2934_s25 = sld [smem:[#allocation9 + $0x1c]] }
  0xc8   :  { %v834_v41 = vadd.f32 %v830_v33, %v798_v2  ;;  %v835_v42 = vadd.f32 %v831_v34, %v799_v9  ;;  %v836_v43 = vadd.f32 %v832_v35, %v800_v3  ;;  %v837_v48 = vadd.f32 %v833_v36, %v801_v17  ;;  %s2945_s26 = sld [smem:[#allocation13 + $0x1b]] }
  0xc9   :  { %v850_v45 = vadd.f32 %v846_v37, %v840_v18  ;;  %v851_v46 = vadd.f32 %v847_v38, %v841_v19  ;;  %v852_v4 = vadd.f32 %v848_v39, %v842_v20  ;;  %v853_v47 = vadd.f32 %v849_v40, %v843_v28 }
  0xca   :  { %v876_v5 = vmul.f32 %v2699_v22, %v875_v31  ;;  %v877_v6 = vmul.f32 %v2702_v24, %v875_v31  ;;  %v878_v7 = vmul.f32 %v2705_v26, %v875_v31  ;;  %v879_v53 = vmul.f32 %v2710_v32, %v875_v31 }
  0xcb   :  { %v856_v49 = vadd.f32 %v855_v30, %v850_v45  ;;  %v857_v50 = vadd.f32 %v855_v30, %v851_v46  ;;  %v858_v51 = vadd.f32 %v855_v30, %v852_v4  ;;  %v859_v52 = vadd.f32 %v855_v30, %v853_v47 }
  0xcc   :  { %v881_v54 = vstv %s2807_s5  ;;  %v891_v55 = vstv %s2812_s27  ;;  %v911_v56 = vstv %s2814_s28  ;;  %v901_v20 = vstv %s2825_s29  ;;  %s2950_s5 = sld [smem:[#allocation10 + $0x1c]] }
  0xcd   :  { %v861_v57 = vmax.f32 %v856_v49, 0.0  ;;  %v862_v58 = vmax.f32 %v857_v50, 0.0  ;;  %v863_v59 = vmax.f32 %v858_v51, 0.0  ;;  %v864_v60 = vmax.f32 %v859_v52, 0.0  ;;  %s2956_s27 = sld [smem:[#allocation12 + $0x1c]] }
  0xce   :  { %v882_v61 = vmul.f32 %v2684_v63, %v881_v54  ;;  %v883_v0 = vmul.f32 %v2687_v8, %v881_v54  ;;  %v884_v62 = vmul.f32 %v2690_v10, %v881_v54  ;;  %v885_v1 = vmul.f32 %v2693_v11, %v881_v54  ;;  %s2958_s28 = sld [smem:[#allocation9 + $0x1d]] }
  0xcf   :  { %v866_v2 = vmul.f32 %v865_v44, %v861_v57  ;;  %v867_v9 = vmul.f32 %v865_v44, %v862_v58  ;;  %v868_v3 = vmul.f32 %v865_v44, %v863_v59  ;;  %v869_v12 = vmul.f32 %v865_v44, %v864_v60  ;;  %s2964_s29 = sld [smem:[#allocation13 + $0x1c]] }
  0xd0   :  { %v886_v13 = vadd.f32 %v882_v61, %v876_v5  ;;  %v887_v14 = vadd.f32 %v883_v0, %v877_v6  ;;  %v888_v15 = vadd.f32 %v884_v62, %v878_v7  ;;  %v889_v16 = vadd.f32 %v885_v1, %v879_v53 }
  0xd1   :  { %v870_v17 = vadd.f32 %v866_v2, %v834_v41  ;;  %v871_v18 = vadd.f32 %v867_v9, %v835_v42  ;;  %v872_v19 = vadd.f32 %v868_v3, %v836_v43  ;;  %v873_v28 = vadd.f32 %v869_v12, %v837_v48 }
  0xd2   :  { %v892_v21 = vadd.f32 %v891_v55, %v886_v13  ;;  %v893_v23 = vadd.f32 %v891_v55, %v887_v14  ;;  %v894_v25 = vadd.f32 %v891_v55, %v888_v15  ;;  %v895_v27 = vadd.f32 %v891_v55, %v889_v16 }
  0xd3   :  { %v912_v29 = vmul.f32 %v2699_v22, %v911_v56  ;;  %v913_v30 = vmul.f32 %v2702_v24, %v911_v56  ;;  %v914_v31 = vmul.f32 %v2705_v26, %v911_v56  ;;  %v915_v37 = vmul.f32 %v2710_v32, %v911_v56 }
  0xd4   :  { %v897_v33 = vmax.f32 %v892_v21, 0.0  ;;  %v898_v34 = vmax.f32 %v893_v23, 0.0  ;;  %v899_v35 = vmax.f32 %v894_v25, 0.0  ;;  %v900_v36 = vmax.f32 %v895_v27, 0.0 }
  0xd5   :  { %v917_v38 = vstv %s2830_s30  ;;  %v927_v39 = vstv %s2836_s8  ;;  %v947_v40 = vstv %s2838_s9  ;;  %v937_v7 = vstv %s2844_s12  ;;  %s2967_s30 = sld [smem:[#allocation10 + $0x1d]] }
  0xd6   :  { %v902_v41 = vmul.f32 %v901_v20, %v897_v33  ;;  %v903_v42 = vmul.f32 %v901_v20, %v898_v34  ;;  %v904_v43 = vmul.f32 %v901_v20, %v899_v35  ;;  %v905_v44 = vmul.f32 %v901_v20, %v900_v36  ;;  %s2972_s8 = sld [smem:[#allocation12 + $0x1d]] }
  0xd7   :  { %v918_v45 = vmul.f32 %v2684_v63, %v917_v38  ;;  %v919_v46 = vmul.f32 %v2687_v8, %v917_v38  ;;  %v920_v4 = vmul.f32 %v2690_v10, %v917_v38  ;;  %v921_v47 = vmul.f32 %v2693_v11, %v917_v38  ;;  %s2974_s9 = sld [smem:[#allocation9 + $0x1e]] }
  0xd8   :  { %v906_v48 = vadd.f32 %v902_v41, %v870_v17  ;;  %v907_v5 = vadd.f32 %v903_v42, %v871_v18  ;;  %v908_v6 = vadd.f32 %v904_v43, %v872_v19  ;;  %v909_v53 = vadd.f32 %v905_v44, %v873_v28  ;;  %s2985_s12 = sld [smem:[#allocation13 + $0x1d]] }
  0xd9   :  { %v922_v49 = vadd.f32 %v918_v45, %v912_v29  ;;  %v923_v50 = vadd.f32 %v919_v46, %v913_v30  ;;  %v924_v51 = vadd.f32 %v920_v4, %v914_v31  ;;  %v925_v52 = vadd.f32 %v921_v47, %v915_v37 }
  0xda   :  { %v948_v54 = vmul.f32 %v2699_v22, %v947_v40  ;;  %v949_v55 = vmul.f32 %v2702_v24, %v947_v40  ;;  %v950_v56 = vmul.f32 %v2705_v26, %v947_v40  ;;  %v951_v61 = vmul.f32 %v2710_v32, %v947_v40 }
  0xdb   :  { %v928_v57 = vadd.f32 %v927_v39, %v922_v49  ;;  %v929_v58 = vadd.f32 %v927_v39, %v923_v50  ;;  %v930_v59 = vadd.f32 %v927_v39, %v924_v51  ;;  %v931_v60 = vadd.f32 %v927_v39, %v925_v52 }
  0xdc   :  { %v953_v0 = vstv %s2847_s6  ;;  %v963_v62 = vstv %s2852_s3  ;;  %v983_v1 = vstv %s2854_s13  ;;  %v973_v31 = vstv %s2865_s14  ;;  %s2990_s6 = sld [smem:[#allocation10 + $0x1e]] }
  0xdd   :  { %v933_v2 = vmax.f32 %v928_v57, 0.0  ;;  %v934_v9 = vmax.f32 %v929_v58, 0.0  ;;  %v935_v3 = vmax.f32 %v930_v59, 0.0  ;;  %v936_v12 = vmax.f32 %v931_v60, 0.0  ;;  %s2996_s3 = sld [smem:[#allocation12 + $0x1e]] }
  0xde   :  { %v954_v13 = vmul.f32 %v2684_v63, %v953_v0  ;;  %v955_v14 = vmul.f32 %v2687_v8, %v953_v0  ;;  %v956_v15 = vmul.f32 %v2690_v10, %v953_v0  ;;  %v957_v16 = vmul.f32 %v2693_v11, %v953_v0  ;;  %s2998_s13 = sld [smem:[#allocation9 + $0x1f]] }
  0xdf   :  { %v938_v17 = vmul.f32 %v937_v7, %v933_v2  ;;  %v939_v18 = vmul.f32 %v937_v7, %v934_v9  ;;  %v940_v19 = vmul.f32 %v937_v7, %v935_v3  ;;  %v941_v20 = vmul.f32 %v937_v7, %v936_v12  ;;  %s3012_s14 = sld [smem:[#allocation13 + $0x1e]] }
  0xe0   :  { %v958_v21 = vadd.f32 %v954_v13, %v948_v54  ;;  %v959_v23 = vadd.f32 %v955_v14, %v949_v55  ;;  %v960_v25 = vadd.f32 %v956_v15, %v950_v56  ;;  %v961_v27 = vadd.f32 %v957_v16, %v951_v61 }
  0xe1   :  { %v942_v28 = vadd.f32 %v938_v17, %v906_v48  ;;  %v943_v29 = vadd.f32 %v939_v18, %v907_v5  ;;  %v944_v30 = vadd.f32 %v940_v19, %v908_v6  ;;  %v945_v37 = vadd.f32 %v941_v20, %v909_v53 }
  0xe2   :  { %v964_v33 = vadd.f32 %v963_v62, %v958_v21  ;;  %v965_v34 = vadd.f32 %v963_v62, %v959_v23  ;;  %v966_v35 = vadd.f32 %v963_v62, %v960_v25  ;;  %v967_v36 = vadd.f32 %v963_v62, %v961_v27 }
  0xe3   :  { %v984_v38 = vmul.f32 %v2699_v22, %v983_v1  ;;  %v985_v39 = vmul.f32 %v2702_v24, %v983_v1  ;;  %v986_v40 = vmul.f32 %v2705_v26, %v983_v1  ;;  %v987_v45 = vmul.f32 %v2710_v32, %v983_v1 }
  0xe4   :  { %v969_v41 = vmax.f32 %v964_v33, 0.0  ;;  %v970_v42 = vmax.f32 %v965_v34, 0.0  ;;  %v971_v43 = vmax.f32 %v966_v35, 0.0  ;;  %v972_v44 = vmax.f32 %v967_v36, 0.0 }
  0xe5   :  { %v989_v46 = vstv %s2870_s15  ;;  %v999_v4 = vstv %s2876_s0  ;;  %v1019_v47 = vstv %s2878_s16  ;;  %v1009_v56 = vstv %s2884_s17  ;;  %s3015_s15 = sld [smem:[#allocation10 + $0x1f]] }
  0xe6   :  { %v974_v48 = vmul.f32 %v973_v31, %v969_v41  ;;  %v975_v5 = vmul.f32 %v973_v31, %v970_v42  ;;  %v976_v6 = vmul.f32 %v973_v31, %v971_v43  ;;  %v977_v7 = vmul.f32 %v973_v31, %v972_v44  ;;  %s3026_s0 = sld [smem:[#allocation12 + $0x1f]] }
  0xe7   :  { %v990_v49 = vmul.f32 %v2684_v63, %v989_v46  ;;  %v991_v50 = vmul.f32 %v2687_v8, %v989_v46  ;;  %v992_v51 = vmul.f32 %v2690_v10, %v989_v46  ;;  %v993_v52 = vmul.f32 %v2693_v11, %v989_v46  ;;  %s3028_s16 = sld [smem:[#allocation9 + $0x20]] }
  0xe8   :  { %v978_v53 = vadd.f32 %v974_v48, %v942_v28  ;;  %v979_v54 = vadd.f32 %v975_v5, %v943_v29  ;;  %v980_v55 = vadd.f32 %v976_v6, %v944_v30  ;;  %v981_v61 = vadd.f32 %v977_v7, %v945_v37  ;;  %s3041_s17 = sld [smem:[#allocation13 + $0x1f]] }
  0xe9   :  { %v994_v57 = vadd.f32 %v990_v49, %v984_v38  ;;  %v995_v58 = vadd.f32 %v991_v50, %v985_v39  ;;  %v996_v59 = vadd.f32 %v992_v51, %v986_v40  ;;  %v997_v60 = vadd.f32 %v993_v52, %v987_v45 }
  0xea   :  { %v1020_v0 = vmul.f32 %v2699_v22, %v1019_v47  ;;  %v1021_v62 = vmul.f32 %v2702_v24, %v1019_v47  ;;  %v1022_v1 = vmul.f32 %v2705_v26, %v1019_v47  ;;  %v1023_v13 = vmul.f32 %v2710_v32, %v1019_v47 }
  0xeb   :  { %v1000_v2 = vadd.f32 %v999_v4, %v994_v57  ;;  %v1001_v9 = vadd.f32 %v999_v4, %v995_v58  ;;  %v1002_v3 = vadd.f32 %v999_v4, %v996_v59  ;;  %v1003_v12 = vadd.f32 %v999_v4, %v997_v60 }
  0xec   :  { %v1025_v14 = vstv %s2887_s18  ;;  %v1035_v15 = vstv %s2892_s19  ;;  %v1055_v16 = vstv %s2894_s20  ;;  %v1045_v40 = vstv %s2905_s21  ;;  %s3046_s18 = sld [smem:[#allocation10 + $0x20]] }
  0xed   :  { %v1005_v17 = vmax.f32 %v1000_v2, 0.0  ;;  %v1006_v18 = vmax.f32 %v1001_v9, 0.0  ;;  %v1007_v19 = vmax.f32 %v1002_v3, 0.0  ;;  %v1008_v20 = vmax.f32 %v1003_v12, 0.0  ;;  %s3052_s19 = sld [smem:[#allocation9 + $0x21]] }
  0xee   :  { %v1026_v21 = vmul.f32 %v2684_v63, %v1025_v14  ;;  %v1027_v23 = vmul.f32 %v2687_v8, %v1025_v14  ;;  %v1028_v25 = vmul.f32 %v2690_v10, %v1025_v14  ;;  %v1029_v27 = vmul.f32 %v2693_v11, %v1025_v14  ;;  %s3054_s20 = sld [smem:[#allocation12 + $0x20]] }
  0xef   :  { %v1010_v28 = vmul.f32 %v1009_v56, %v1005_v17  ;;  %v1011_v29 = vmul.f32 %v1009_v56, %v1006_v18  ;;  %v1012_v30 = vmul.f32 %v1009_v56, %v1007_v19  ;;  %v1013_v31 = vmul.f32 %v1009_v56, %v1008_v20  ;;  %s3060_s21 = sld [smem:[#allocation13 + $0x20]] }
  0xf0   :  { %v1030_v33 = vadd.f32 %v1026_v21, %v1020_v0  ;;  %v1031_v34 = vadd.f32 %v1027_v23, %v1021_v62  ;;  %v1032_v35 = vadd.f32 %v1028_v25, %v1022_v1  ;;  %v1033_v36 = vadd.f32 %v1029_v27, %v1023_v13 }
  0xf1   :  { %v1014_v37 = vadd.f32 %v1010_v28, %v978_v53  ;;  %v1015_v38 = vadd.f32 %v1011_v29, %v979_v54  ;;  %v1016_v39 = vadd.f32 %v1012_v30, %v980_v55  ;;  %v1017_v45 = vadd.f32 %v1013_v31, %v981_v61 }
  0xf2   :  { %v1036_v41 = vadd.f32 %v1035_v15, %v1030_v33  ;;  %v1037_v42 = vadd.f32 %v1035_v15, %v1031_v34  ;;  %v1038_v43 = vadd.f32 %v1035_v15, %v1032_v35  ;;  %v1039_v44 = vadd.f32 %v1035_v15, %v1033_v36 }
  0xf3   :  { %v1056_v46 = vmul.f32 %v2699_v22, %v1055_v16  ;;  %v1057_v4 = vmul.f32 %v2702_v24, %v1055_v16  ;;  %v1058_v47 = vmul.f32 %v2705_v26, %v1055_v16  ;;  %v1059_v49 = vmul.f32 %v2710_v32, %v1055_v16 }
  0xf4   :  { %v1041_v48 = vmax.f32 %v1036_v41, 0.0  ;;  %v1042_v5 = vmax.f32 %v1037_v42, 0.0  ;;  %v1043_v6 = vmax.f32 %v1038_v43, 0.0  ;;  %v1044_v7 = vmax.f32 %v1039_v44, 0.0 }
  0xf5   :  { %v1061_v50 = vstv %s2910_s1  ;;  %v1071_v51 = vstv %s2916_s22  ;;  %v1091_v52 = vstv %s2918_s23  ;;  %v1081_v1 = vstv %s2924_s24  ;;  %s3063_s1 = sld [smem:[#allocation10 + $0x21]] }
  0xf6   :  { %v1046_v53 = vmul.f32 %v1045_v40, %v1041_v48  ;;  %v1047_v54 = vmul.f32 %v1045_v40, %v1042_v5  ;;  %v1048_v55 = vmul.f32 %v1045_v40, %v1043_v6  ;;  %v1049_v56 = vmul.f32 %v1045_v40, %v1044_v7  ;;  %s3068_s22 = sld [smem:[#allocation9 + $0x22]] }
  0xf7   :  { %v1062_v57 = vmul.f32 %v2684_v63, %v1061_v50  ;;  %v1063_v58 = vmul.f32 %v2687_v8, %v1061_v50  ;;  %v1064_v59 = vmul.f32 %v2690_v10, %v1061_v50  ;;  %v1065_v60 = vmul.f32 %v2693_v11, %v1061_v50  ;;  %s3070_s23 = sld [smem:[#allocation12 + $0x21]] }
  0xf8   :  { %v1050_v61 = vadd.f32 %v1046_v53, %v1014_v37  ;;  %v1051_v0 = vadd.f32 %v1047_v54, %v1015_v38  ;;  %v1052_v62 = vadd.f32 %v1048_v55, %v1016_v39  ;;  %v1053_v13 = vadd.f32 %v1049_v56, %v1017_v45  ;;  %s3081_s24 = sld [smem:[#allocation13 + $0x21]] }
  0xf9   :  { %v1066_v2 = vadd.f32 %v1062_v57, %v1056_v46  ;;  %v1067_v9 = vadd.f32 %v1063_v58, %v1057_v4  ;;  %v1068_v3 = vadd.f32 %v1064_v59, %v1058_v47  ;;  %v1069_v12 = vadd.f32 %v1065_v60, %v1059_v49 }
  0xfa   :  { %v1092_v14 = vmul.f32 %v2699_v22, %v1091_v52  ;;  %v1093_v15 = vmul.f32 %v2702_v24, %v1091_v52  ;;  %v1094_v16 = vmul.f32 %v2705_v26, %v1091_v52  ;;  %v1095_v21 = vmul.f32 %v2710_v32, %v1091_v52 }
  0xfb   :  { %v1072_v17 = vadd.f32 %v1071_v51, %v1066_v2  ;;  %v1073_v18 = vadd.f32 %v1071_v51, %v1067_v9  ;;  %v1074_v19 = vadd.f32 %v1071_v51, %v1068_v3  ;;  %v1075_v20 = vadd.f32 %v1071_v51, %v1069_v12 }
  0xfc   :  { %v1097_v23 = vstv %s2927_s2  ;;  %v1107_v25 = vstv %s2932_s4  ;;  %v1127_v27 = vstv %s2934_s25  ;;  %v1117_v47 = vstv %s2945_s26  ;;  %s3086_s2 = sld [smem:[#allocation10 + $0x22]] }
  0xfd   :  { %v1077_v28 = vmax.f32 %v1072_v17, 0.0  ;;  %v1078_v29 = vmax.f32 %v1073_v18, 0.0  ;;  %v1079_v30 = vmax.f32 %v1074_v19, 0.0  ;;  %v1080_v31 = vmax.f32 %v1075_v20, 0.0  ;;  %s3092_s4 = sld [smem:[#allocation9 + $0x23]] }
  0xfe   :  { %v1098_v33 = vmul.f32 %v2684_v63, %v1097_v23  ;;  %v1099_v34 = vmul.f32 %v2687_v8, %v1097_v23  ;;  %v1100_v35 = vmul.f32 %v2690_v10, %v1097_v23  ;;  %v1101_v36 = vmul.f32 %v2693_v11, %v1097_v23  ;;  %s3094_s25 = sld [smem:[#allocation12 + $0x22]] }
  0xff   :  { %v1082_v37 = vmul.f32 %v1081_v1, %v1077_v28  ;;  %v1083_v38 = vmul.f32 %v1081_v1, %v1078_v29  ;;  %v1084_v39 = vmul.f32 %v1081_v1, %v1079_v30  ;;  %v1085_v40 = vmul.f32 %v1081_v1, %v1080_v31  ;;  %s3100_s26 = sld [smem:[#allocation13 + $0x22]] }
 0x100   :  { %v1102_v41 = vadd.f32 %v1098_v33, %v1092_v14  ;;  %v1103_v42 = vadd.f32 %v1099_v34, %v1093_v15  ;;  %v1104_v43 = vadd.f32 %v1100_v35, %v1094_v16  ;;  %v1105_v44 = vadd.f32 %v1101_v36, %v1095_v21  ;;  %v3003_v36 = vld [vmem:[#allocation7 + $0x8] sm:$0xff] }
 0x101   :  { %v1086_v45 = vadd.f32 %v1082_v37, %v1050_v61  ;;  %v1087_v46 = vadd.f32 %v1083_v38, %v1051_v0  ;;  %v1088_v4 = vadd.f32 %v1084_v39, %v1052_v62  ;;  %v1089_v49 = vadd.f32 %v1085_v40, %v1053_v13  ;;  %v3009_v39 = vld [vmem:[#allocation7 + $0x18] sm:$0xff] }
 0x102   :  { %v1108_v48 = vadd.f32 %v1107_v25, %v1102_v41  ;;  %v1109_v5 = vadd.f32 %v1107_v25, %v1103_v42  ;;  %v1110_v6 = vadd.f32 %v1107_v25, %v1104_v43  ;;  %v1111_v7 = vadd.f32 %v1107_v25, %v1105_v44 }
 0x103   :  { %v1128_v50 = vmul.f32 %v2699_v22, %v1127_v27  ;;  %v1129_v51 = vmul.f32 %v2702_v24, %v1127_v27  ;;  %v1130_v52 = vmul.f32 %v2705_v26, %v1127_v27  ;;  %v1131_v57 = vmul.f32 %v2710_v32, %v1127_v27 }
 0x104   :  { %v1113_v53 = vmax.f32 %v1108_v48, 0.0  ;;  %v1114_v54 = vmax.f32 %v1109_v5, 0.0  ;;  %v1115_v55 = vmax.f32 %v1110_v6, 0.0  ;;  %v1116_v56 = vmax.f32 %v1111_v7, 0.0 }
 0x105   :  { %v1133_v58 = vstv %s2950_s5  ;;  %v1143_v59 = vstv %s2956_s27  ;;  %v1163_v60 = vstv %s2958_s28  ;;  %v1153_v16 = vstv %s2964_s29  ;;  %s3103_s5 = sld [smem:[#allocation10 + $0x23]] }
 0x106   :  { %v1118_v61 = vmul.f32 %v1117_v47, %v1113_v53  ;;  %v1119_v0 = vmul.f32 %v1117_v47, %v1114_v54  ;;  %v1120_v62 = vmul.f32 %v1117_v47, %v1115_v55  ;;  %v1121_v1 = vmul.f32 %v1117_v47, %v1116_v56  ;;  %v3017_v54 = vld [vmem:[#allocation3] sm:$0xff]  ;;  %v3020_v56 = vld [vmem:[#allocation3 + $0x8] sm:$0xff]  ;;  %s3108_s27 = sld [smem:[#allocation9 + $0x24]] }
 0x107   :  { %v1134_v2 = vmul.f32 %v2684_v63, %v1133_v58  ;;  %v1135_v9 = vmul.f32 %v2687_v8, %v1133_v58  ;;  %v1136_v3 = vmul.f32 %v2690_v10, %v1133_v58  ;;  %v1137_v12 = vmul.f32 %v2693_v11, %v1133_v58  ;;  %v3023_v58 = vld [vmem:[#allocation3 + $0x10] sm:$0xff]  ;;  %s3110_s28 = sld [smem:[#allocation12 + $0x23]] }
 0x108   :  { %v1122_v13 = vadd.f32 %v1118_v61, %v1086_v45  ;;  %v1123_v14 = vadd.f32 %v1119_v0, %v1087_v46  ;;  %v1124_v15 = vadd.f32 %v1120_v62, %v1088_v4  ;;  %v1125_v63 = vadd.f32 %v1121_v1, %v1089_v49  ;;  %v3030_v1 = vld [vmem:[#allocation3 + $0x18] sm:$0xff]  ;;  %s3121_s29 = sld [smem:[#allocation13 + $0x23]] }
 0x109   :  { %v1138_v17 = vadd.f32 %v1134_v2, %v1128_v50  ;;  %v1139_v18 = vadd.f32 %v1135_v9, %v1129_v51  ;;  %v1140_v19 = vadd.f32 %v1136_v3, %v1130_v52  ;;  %v1141_v20 = vadd.f32 %v1137_v12, %v1131_v57 }
 0x10a   :  { %v1164_v8 = vmul.f32 %v2699_v22, %v1163_v60  ;;  %v1165_v10 = vmul.f32 %v2702_v24, %v1163_v60  ;;  %v1166_v11 = vmul.f32 %v2705_v26, %v1163_v60  ;;  %v1167_v28 = vmul.f32 %v2710_v32, %v1163_v60  ;;  %v3000_v24 = vld [vmem:[#allocation7] sm:$0xff]  ;;  %v3006_v32 = vld [vmem:[#allocation7 + $0x10] sm:$0xff] }
 0x10b   :  { %v1144_v21 = vadd.f32 %v1143_v59, %v1138_v17  ;;  %v1145_v23 = vadd.f32 %v1143_v59, %v1139_v18  ;;  %v1146_v25 = vadd.f32 %v1143_v59, %v1140_v19  ;;  %v1147_v27 = vadd.f32 %v1143_v59, %v1141_v20 }
 0x10c   :  { %v1169_v29 = vstv %s2967_s30  ;;  %v1179_v30 = vstv %s2972_s8  ;;  %v1199_v31 = vstv %s2974_s9  ;;  %v1189_v7 = vstv %s2985_s12  ;;  %s3126_s30 = sld [smem:[#allocation10 + $0x24]] }
 0x10d   :  { %v1149_v33 = vmax.f32 %v1144_v21, 0.0  ;;  %v1150_v34 = vmax.f32 %v1145_v23, 0.0  ;;  %v1151_v22 = vmax.f32 %v1146_v25, 0.0  ;;  %v1152_v35 = vmax.f32 %v1147_v27, 0.0  ;;  %s3132_s8 = sld [smem:[#allocation9 + $0x25]] }
 0x10e   :  { %v1170_v26 = vmul.f32 %v3000_v24, %v1169_v29  ;;  %v1171_v37 = vmul.f32 %v3003_v36, %v1169_v29  ;;  %v1172_v38 = vmul.f32 %v3006_v32, %v1169_v29  ;;  %v1173_v40 = vmul.f32 %v3009_v39, %v1169_v29  ;;  %s3134_s9 = sld [smem:[#allocation12 + $0x24]] }
 0x10f   :  { %v1154_v41 = vmul.f32 %v1153_v16, %v1149_v33  ;;  %v1155_v42 = vmul.f32 %v1153_v16, %v1150_v34  ;;  %v1156_v43 = vmul.f32 %v1153_v16, %v1151_v22  ;;  %v1157_v44 = vmul.f32 %v1153_v16, %v1152_v35  ;;  %s3140_s12 = sld [smem:[#allocation13 + $0x24]] }
 0x110   :  { %v1174_v45 = vadd.f32 %v1170_v26, %v1164_v8  ;;  %v1175_v46 = vadd.f32 %v1171_v37, %v1165_v10  ;;  %v1176_v4 = vadd.f32 %v1172_v38, %v1166_v11  ;;  %v1177_v47 = vadd.f32 %v1173_v40, %v1167_v28 }
 0x111   :  { %v1158_v48 = vadd.f32 %v1154_v41, %v1122_v13  ;;  %v1159_v5 = vadd.f32 %v1155_v42, %v1123_v14  ;;  %v1160_v6 = vadd.f32 %v1156_v43, %v1124_v15  ;;  %v1161_v53 = vadd.f32 %v1157_v44, %v1125_v63 }
 0x112   :  { %v1180_v49 = vadd.f32 %v1179_v30, %v1174_v45  ;;  %v1181_v50 = vadd.f32 %v1179_v30, %v1175_v46  ;;  %v1182_v51 = vadd.f32 %v1179_v30, %v1176_v4  ;;  %v1183_v52 = vadd.f32 %v1179_v30, %v1177_v47 }
 0x113   :  { %v1200_v55 = vmul.f32 %v3017_v54, %v1199_v31  ;;  %v1201_v57 = vmul.f32 %v3020_v56, %v1199_v31  ;;  %v1202_v59 = vmul.f32 %v3023_v58, %v1199_v31  ;;  %v1203_v2 = vmul.f32 %v3030_v1, %v1199_v31 }
 0x114   :  { %v1185_v60 = vmax.f32 %v1180_v49, 0.0  ;;  %v1186_v61 = vmax.f32 %v1181_v50, 0.0  ;;  %v1187_v0 = vmax.f32 %v1182_v51, 0.0  ;;  %v1188_v62 = vmax.f32 %v1183_v52, 0.0 }
 0x115   :  { %v1205_v9 = vstv %s2990_s6  ;;  %v1215_v3 = vstv %s2996_s3  ;;  %v1235_v12 = vstv %s2998_s13  ;;  %v1225_v11 = vstv %s3012_s14  ;;  %s3143_s6 = sld [smem:[#allocation10 + $0x25]] }
 0x116   :  { %v1190_v13 = vmul.f32 %v1189_v7, %v1185_v60  ;;  %v1191_v14 = vmul.f32 %v1189_v7, %v1186_v61  ;;  %v1192_v15 = vmul.f32 %v1189_v7, %v1187_v0  ;;  %v1193_v16 = vmul.f32 %v1189_v7, %v1188_v62  ;;  %s3148_s3 = sld [smem:[#allocation9 + $0x26]] }
 0x117   :  { %v1206_v17 = vmul.f32 %v3000_v24, %v1205_v9  ;;  %v1207_v18 = vmul.f32 %v3003_v36, %v1205_v9  ;;  %v1208_v19 = vmul.f32 %v3006_v32, %v1205_v9  ;;  %v1209_v20 = vmul.f32 %v3009_v39, %v1205_v9  ;;  %s3150_s13 = sld [smem:[#allocation12 + $0x25]] }
 0x118   :  { %v1194_v63 = vadd.f32 %v1190_v13, %v1158_v48  ;;  %v1195_v8 = vadd.f32 %v1191_v14, %v1159_v5  ;;  %v1196_v10 = vadd.f32 %v1192_v15, %v1160_v6  ;;  %v1197_v28 = vadd.f32 %v1193_v16, %v1161_v53  ;;  %s3161_s14 = sld [smem:[#allocation13 + $0x25]] }
 0x119   :  { %v1210_v21 = vadd.f32 %v1206_v17, %v1200_v55  ;;  %v1211_v23 = vadd.f32 %v1207_v18, %v1201_v57  ;;  %v1212_v25 = vadd.f32 %v1208_v19, %v1202_v59  ;;  %v1213_v27 = vadd.f32 %v1209_v20, %v1203_v2 }
 0x11a   :  { %v1236_v29 = vmul.f32 %v3017_v54, %v1235_v12  ;;  %v1237_v30 = vmul.f32 %v3020_v56, %v1235_v12  ;;  %v1238_v31 = vmul.f32 %v3023_v58, %v1235_v12  ;;  %v1239_v26 = vmul.f32 %v3030_v1, %v1235_v12 }
 0x11b   :  { %v1216_v33 = vadd.f32 %v1215_v3, %v1210_v21  ;;  %v1217_v34 = vadd.f32 %v1215_v3, %v1211_v23  ;;  %v1218_v22 = vadd.f32 %v1215_v3, %v1212_v25  ;;  %v1219_v35 = vadd.f32 %v1215_v3, %v1213_v27 }
 0x11c   :  { %v1241_v37 = vstv %s3015_s15  ;;  %v1251_v38 = vstv %s3026_s0  ;;  %v1271_v40 = vstv %s3028_s16  ;;  %v1261_v59 = vstv %s3041_s17  ;;  %s3166_s15 = sld [smem:[#allocation10 + $0x26]] }
 0x11d   :  { %v1221_v41 = vmax.f32 %v1216_v33, 0.0  ;;  %v1222_v42 = vmax.f32 %v1217_v34, 0.0  ;;  %v1223_v43 = vmax.f32 %v1218_v22, 0.0  ;;  %v1224_v44 = vmax.f32 %v1219_v35, 0.0  ;;  %s3172_s0 = sld [smem:[#allocation9 + $0x27]] }
 0x11e   :  { %v1242_v45 = vmul.f32 %v3000_v24, %v1241_v37  ;;  %v1243_v46 = vmul.f32 %v3003_v36, %v1241_v37  ;;  %v1244_v4 = vmul.f32 %v3006_v32, %v1241_v37  ;;  %v1245_v47 = vmul.f32 %v3009_v39, %v1241_v37  ;;  %s3174_s16 = sld [smem:[#allocation12 + $0x26]] }
 0x11f   :  { %v1226_v48 = vmul.f32 %v1225_v11, %v1221_v41  ;;  %v1227_v5 = vmul.f32 %v1225_v11, %v1222_v42  ;;  %v1228_v6 = vmul.f32 %v1225_v11, %v1223_v43  ;;  %v1229_v7 = vmul.f32 %v1225_v11, %v1224_v44  ;;  %s3180_s17 = sld [smem:[#allocation13 + $0x26]] }
 0x120   :  { %v1246_v49 = vadd.f32 %v1242_v45, %v1236_v29  ;;  %v1247_v50 = vadd.f32 %v1243_v46, %v1237_v30  ;;  %v1248_v51 = vadd.f32 %v1244_v4, %v1238_v31  ;;  %v1249_v52 = vadd.f32 %v1245_v47, %v1239_v26 }
 0x121   :  { %v1230_v53 = vadd.f32 %v1226_v48, %v1194_v63  ;;  %v1231_v55 = vadd.f32 %v1227_v5, %v1195_v8  ;;  %v1232_v57 = vadd.f32 %v1228_v6, %v1196_v10  ;;  %v1233_v2 = vadd.f32 %v1229_v7, %v1197_v28 }
 0x122   :  { %v1252_v60 = vadd.f32 %v1251_v38, %v1246_v49  ;;  %v1253_v61 = vadd.f32 %v1251_v38, %v1247_v50  ;;  %v1254_v0 = vadd.f32 %v1251_v38, %v1248_v51  ;;  %v1255_v62 = vadd.f32 %v1251_v38, %v1249_v52 }
 0x123   :  { %v1272_v9 = vmul.f32 %v3017_v54, %v1271_v40  ;;  %v1273_v3 = vmul.f32 %v3020_v56, %v1271_v40  ;;  %v1274_v12 = vmul.f32 %v3023_v58, %v1271_v40  ;;  %v1275_v17 = vmul.f32 %v3030_v1, %v1271_v40 }
 0x124   :  { %v1257_v13 = vmax.f32 %v1252_v60, 0.0  ;;  %v1258_v14 = vmax.f32 %v1253_v61, 0.0  ;;  %v1259_v15 = vmax.f32 %v1254_v0, 0.0  ;;  %v1260_v16 = vmax.f32 %v1255_v62, 0.0 }
 0x125   :  { %v1277_v18 = vstv %s3046_s18  ;;  %v1287_v19 = vstv %s3054_s20  ;;  %v1307_v20 = vstv %s3052_s19  ;;  %v1297_v31 = vstv %s3060_s21  ;;  %s3183_s18 = sld [smem:[#allocation10 + $0x27]] }
 0x126   :  { %v1262_v63 = vmul.f32 %v1261_v59, %v1257_v13  ;;  %v1263_v8 = vmul.f32 %v1261_v59, %v1258_v14  ;;  %v1264_v10 = vmul.f32 %v1261_v59, %v1259_v15  ;;  %v1265_v11 = vmul.f32 %v1261_v59, %v1260_v16  ;;  %s3188_s19 = sld [smem:[#allocation9 + $0x28]] }
 0x127   :  { %v1278_v21 = vmul.f32 %v3000_v24, %v1277_v18  ;;  %v1279_v23 = vmul.f32 %v3003_v36, %v1277_v18  ;;  %v1280_v25 = vmul.f32 %v3006_v32, %v1277_v18  ;;  %v1281_v27 = vmul.f32 %v3009_v39, %v1277_v18  ;;  %s3190_s20 = sld [smem:[#allocation12 + $0x27]] }
 0x128   :  { %v1266_v28 = vadd.f32 %v1262_v63, %v1230_v53  ;;  %v1267_v29 = vadd.f32 %v1263_v8, %v1231_v55  ;;  %v1268_v30 = vadd.f32 %v1264_v10, %v1232_v57  ;;  %v1269_v26 = vadd.f32 %v1265_v11, %v1233_v2  ;;  %s3201_s21 = sld [smem:[#allocation13 + $0x27]] }
 0x129   :  { %v1282_v33 = vadd.f32 %v1278_v21, %v1272_v9  ;;  %v1283_v34 = vadd.f32 %v1279_v23, %v1273_v3  ;;  %v1284_v22 = vadd.f32 %v1280_v25, %v1274_v12  ;;  %v1285_v35 = vadd.f32 %v1281_v27, %v1275_v17 }
 0x12a   :  { %v1308_v37 = vmul.f32 %v3017_v54, %v1307_v20  ;;  %v1309_v38 = vmul.f32 %v3020_v56, %v1307_v20  ;;  %v1310_v40 = vmul.f32 %v3023_v58, %v1307_v20  ;;  %v1311_v45 = vmul.f32 %v3030_v1, %v1307_v20 }
 0x12b   :  { %v1288_v41 = vadd.f32 %v1287_v19, %v1282_v33  ;;  %v1289_v42 = vadd.f32 %v1287_v19, %v1283_v34  ;;  %v1290_v43 = vadd.f32 %v1287_v19, %v1284_v22  ;;  %v1291_v44 = vadd.f32 %v1287_v19, %v1285_v35 }
 0x12c   :  { %v1313_v46 = vstv %s3063_s1  ;;  %v1323_v4 = vstv %s3070_s23  ;;  %v1343_v47 = vstv %s3068_s22  ;;  %v1333_v12 = vstv %s3081_s24  ;;  %s3206_s1 = sld [smem:[#allocation10 + $0x28]] }
 0x12d   :  { %v1293_v48 = vmax.f32 %v1288_v41, 0.0  ;;  %v1294_v5 = vmax.f32 %v1289_v42, 0.0  ;;  %v1295_v6 = vmax.f32 %v1290_v43, 0.0  ;;  %v1296_v7 = vmax.f32 %v1291_v44, 0.0  ;;  %s3212_s22 = sld [smem:[#allocation9 + $0x29]] }
 0x12e   :  { %v1314_v49 = vmul.f32 %v3000_v24, %v1313_v46  ;;  %v1315_v50 = vmul.f32 %v3003_v36, %v1313_v46  ;;  %v1316_v51 = vmul.f32 %v3006_v32, %v1313_v46  ;;  %v1317_v52 = vmul.f32 %v3009_v39, %v1313_v46  ;;  %s3214_s23 = sld [smem:[#allocation12 + $0x28]] }
 0x12f   :  { %v1298_v53 = vmul.f32 %v1297_v31, %v1293_v48  ;;  %v1299_v55 = vmul.f32 %v1297_v31, %v1294_v5  ;;  %v1300_v57 = vmul.f32 %v1297_v31, %v1295_v6  ;;  %v1301_v59 = vmul.f32 %v1297_v31, %v1296_v7  ;;  %s3220_s24 = sld [smem:[#allocation13 + $0x28]] }
 0x130   :  { %v1318_v60 = vadd.f32 %v1314_v49, %v1308_v37  ;;  %v1319_v61 = vadd.f32 %v1315_v50, %v1309_v38  ;;  %v1320_v0 = vadd.f32 %v1316_v51, %v1310_v40  ;;  %v1321_v62 = vadd.f32 %v1317_v52, %v1311_v45 }
 0x131   :  { %v1302_v2 = vadd.f32 %v1298_v53, %v1266_v28  ;;  %v1303_v9 = vadd.f32 %v1299_v55, %v1267_v29  ;;  %v1304_v3 = vadd.f32 %v1300_v57, %v1268_v30  ;;  %v1305_v17 = vadd.f32 %v1301_v59, %v1269_v26 }
 0x132   :  { %v1324_v13 = vadd.f32 %v1323_v4, %v1318_v60  ;;  %v1325_v14 = vadd.f32 %v1323_v4, %v1319_v61  ;;  %v1326_v15 = vadd.f32 %v1323_v4, %v1320_v0  ;;  %v1327_v16 = vadd.f32 %v1323_v4, %v1321_v62 }
 0x133   :  { %v1344_v18 = vmul.f32 %v3017_v54, %v1343_v47  ;;  %v1345_v19 = vmul.f32 %v3020_v56, %v1343_v47  ;;  %v1346_v20 = vmul.f32 %v3023_v58, %v1343_v47  ;;  %v1347_v21 = vmul.f32 %v3030_v1, %v1343_v47 }
 0x134   :  { %v1329_v63 = vmax.f32 %v1324_v13, 0.0  ;;  %v1330_v8 = vmax.f32 %v1325_v14, 0.0  ;;  %v1331_v10 = vmax.f32 %v1326_v15, 0.0  ;;  %v1332_v11 = vmax.f32 %v1327_v16, 0.0 }
 0x135   :  { %v1349_v23 = vstv %s3086_s2  ;;  %v1359_v25 = vstv %s3094_s25  ;;  %v1379_v27 = vstv %s3092_s4  ;;  %v1369_v40 = vstv %s3100_s26  ;;  %s3223_s2 = sld [smem:[#allocation10 + $0x29]] }
 0x136   :  { %v1334_v28 = vmul.f32 %v1333_v12, %v1329_v63  ;;  %v1335_v29 = vmul.f32 %v1333_v12, %v1330_v8  ;;  %v1336_v30 = vmul.f32 %v1333_v12, %v1331_v10  ;;  %v1337_v31 = vmul.f32 %v1333_v12, %v1332_v11  ;;  %s3228_s4 = sld [smem:[#allocation9 + $0x2a]] }
 0x137   :  { %v1350_v33 = vmul.f32 %v3000_v24, %v1349_v23  ;;  %v1351_v34 = vmul.f32 %v3003_v36, %v1349_v23  ;;  %v1352_v22 = vmul.f32 %v3006_v32, %v1349_v23  ;;  %v1353_v35 = vmul.f32 %v3009_v39, %v1349_v23  ;;  %s3230_s25 = sld [smem:[#allocation12 + $0x29]] }
 0x138   :  { %v1338_v26 = vadd.f32 %v1334_v28, %v1302_v2  ;;  %v1339_v37 = vadd.f32 %v1335_v29, %v1303_v9  ;;  %v1340_v38 = vadd.f32 %v1336_v30, %v1304_v3  ;;  %v1341_v45 = vadd.f32 %v1337_v31, %v1305_v17  ;;  %s3241_s26 = sld [smem:[#allocation13 + $0x29]] }
 0x139   :  { %v1354_v41 = vadd.f32 %v1350_v33, %v1344_v18  ;;  %v1355_v42 = vadd.f32 %v1351_v34, %v1345_v19  ;;  %v1356_v43 = vadd.f32 %v1352_v22, %v1346_v20  ;;  %v1357_v44 = vadd.f32 %v1353_v35, %v1347_v21 }
 0x13a   :  { %v1380_v46 = vmul.f32 %v3017_v54, %v1379_v27  ;;  %v1381_v4 = vmul.f32 %v3020_v56, %v1379_v27  ;;  %v1382_v47 = vmul.f32 %v3023_v58, %v1379_v27  ;;  %v1383_v49 = vmul.f32 %v3030_v1, %v1379_v27 }
 0x13b   :  { %v1360_v48 = vadd.f32 %v1359_v25, %v1354_v41  ;;  %v1361_v5 = vadd.f32 %v1359_v25, %v1355_v42  ;;  %v1362_v6 = vadd.f32 %v1359_v25, %v1356_v43  ;;  %v1363_v7 = vadd.f32 %v1359_v25, %v1357_v44 }
 0x13c   :  { %v1385_v50 = vstv %s3103_s5  ;;  %v1395_v51 = vstv %s3110_s28  ;;  %v1415_v52 = vstv %s3108_s27  ;;  %v1405_v20 = vstv %s3121_s29  ;;  %s3246_s5 = sld [smem:[#allocation10 + $0x2a]] }
 0x13d   :  { %v1365_v53 = vmax.f32 %v1360_v48, 0.0  ;;  %v1366_v55 = vmax.f32 %v1361_v5, 0.0  ;;  %v1367_v57 = vmax.f32 %v1362_v6, 0.0  ;;  %v1368_v59 = vmax.f32 %v1363_v7, 0.0  ;;  %s3252_s27 = sld [smem:[#allocation9 + $0x2b]] }
 0x13e   :  { %v1386_v60 = vmul.f32 %v3000_v24, %v1385_v50  ;;  %v1387_v61 = vmul.f32 %v3003_v36, %v1385_v50  ;;  %v1388_v0 = vmul.f32 %v3006_v32, %v1385_v50  ;;  %v1389_v62 = vmul.f32 %v3009_v39, %v1385_v50  ;;  %s3254_s28 = sld [smem:[#allocation12 + $0x2a]] }
 0x13f   :  { %v1370_v2 = vmul.f32 %v1369_v40, %v1365_v53  ;;  %v1371_v9 = vmul.f32 %v1369_v40, %v1366_v55  ;;  %v1372_v3 = vmul.f32 %v1369_v40, %v1367_v57  ;;  %v1373_v12 = vmul.f32 %v1369_v40, %v1368_v59  ;;  %s3260_s29 = sld [smem:[#allocation13 + $0x2a]] }
 0x140   :  { %v1390_v13 = vadd.f32 %v1386_v60, %v1380_v46  ;;  %v1391_v14 = vadd.f32 %v1387_v61, %v1381_v4  ;;  %v1392_v15 = vadd.f32 %v1388_v0, %v1382_v47  ;;  %v1393_v16 = vadd.f32 %v1389_v62, %v1383_v49 }
 0x141   :  { %v1374_v17 = vadd.f32 %v1370_v2, %v1338_v26  ;;  %v1375_v18 = vadd.f32 %v1371_v9, %v1339_v37  ;;  %v1376_v19 = vadd.f32 %v1372_v3, %v1340_v38  ;;  %v1377_v21 = vadd.f32 %v1373_v12, %v1341_v45 }
 0x142   :  { %v1396_v63 = vadd.f32 %v1395_v51, %v1390_v13  ;;  %v1397_v8 = vadd.f32 %v1395_v51, %v1391_v14  ;;  %v1398_v10 = vadd.f32 %v1395_v51, %v1392_v15  ;;  %v1399_v11 = vadd.f32 %v1395_v51, %v1393_v16 }
 0x143   :  { %v1416_v23 = vmul.f32 %v3017_v54, %v1415_v52  ;;  %v1417_v25 = vmul.f32 %v3020_v56, %v1415_v52  ;;  %v1418_v27 = vmul.f32 %v3023_v58, %v1415_v52  ;;  %v1419_v33 = vmul.f32 %v3030_v1, %v1415_v52 }
 0x144   :  { %v1401_v28 = vmax.f32 %v1396_v63, 0.0  ;;  %v1402_v29 = vmax.f32 %v1397_v8, 0.0  ;;  %v1403_v30 = vmax.f32 %v1398_v10, 0.0  ;;  %v1404_v31 = vmax.f32 %v1399_v11, 0.0 }
 0x145   :  { %v1421_v34 = vstv %s3126_s30  ;;  %v1431_v22 = vstv %s3134_s9  ;;  %v1451_v35 = vstv %s3132_s8  ;;  %v1441_v47 = vstv %s3140_s12  ;;  %s3263_s30 = sld [smem:[#allocation10 + $0x2b]] }
 0x146   :  { %v1406_v26 = vmul.f32 %v1405_v20, %v1401_v28  ;;  %v1407_v37 = vmul.f32 %v1405_v20, %v1402_v29  ;;  %v1408_v38 = vmul.f32 %v1405_v20, %v1403_v30  ;;  %v1409_v40 = vmul.f32 %v1405_v20, %v1404_v31  ;;  %s3268_s8 = sld [smem:[#allocation9 + $0x2c]] }
 0x147   :  { %v1422_v41 = vmul.f32 %v3000_v24, %v1421_v34  ;;  %v1423_v42 = vmul.f32 %v3003_v36, %v1421_v34  ;;  %v1424_v43 = vmul.f32 %v3006_v32, %v1421_v34  ;;  %v1425_v44 = vmul.f32 %v3009_v39, %v1421_v34  ;;  %s3270_s9 = sld [smem:[#allocation12 + $0x2b]] }
 0x148   :  { %v1410_v45 = vadd.f32 %v1406_v26, %v1374_v17  ;;  %v1411_v46 = vadd.f32 %v1407_v37, %v1375_v18  ;;  %v1412_v4 = vadd.f32 %v1408_v38, %v1376_v19  ;;  %v1413_v49 = vadd.f32 %v1409_v40, %v1377_v21  ;;  %s3281_s12 = sld [smem:[#allocation13 + $0x2b]] }
 0x149   :  { %v1426_v48 = vadd.f32 %v1422_v41, %v1416_v23  ;;  %v1427_v5 = vadd.f32 %v1423_v42, %v1417_v25  ;;  %v1428_v6 = vadd.f32 %v1424_v43, %v1418_v27  ;;  %v1429_v7 = vadd.f32 %v1425_v44, %v1419_v33 }
 0x14a   :  { %v1452_v50 = vmul.f32 %v3017_v54, %v1451_v35  ;;  %v1453_v51 = vmul.f32 %v3020_v56, %v1451_v35  ;;  %v1454_v52 = vmul.f32 %v3023_v58, %v1451_v35  ;;  %v1455_v60 = vmul.f32 %v3030_v1, %v1451_v35 }
 0x14b   :  { %v1432_v53 = vadd.f32 %v1431_v22, %v1426_v48  ;;  %v1433_v55 = vadd.f32 %v1431_v22, %v1427_v5  ;;  %v1434_v57 = vadd.f32 %v1431_v22, %v1428_v6  ;;  %v1435_v59 = vadd.f32 %v1431_v22, %v1429_v7 }
 0x14c   :  { %v1457_v61 = vstv %s3143_s6  ;;  %v1467_v0 = vstv %s3150_s13  ;;  %v1487_v62 = vstv %s3148_s3  ;;  %v1477_v27 = vstv %s3161_s14  ;;  %s3286_s6 = sld [smem:[#allocation10 + $0x2c]] }
 0x14d   :  { %v1437_v2 = vmax.f32 %v1432_v53, 0.0  ;;  %v1438_v9 = vmax.f32 %v1433_v55, 0.0  ;;  %v1439_v3 = vmax.f32 %v1434_v57, 0.0  ;;  %v1440_v12 = vmax.f32 %v1435_v59, 0.0  ;;  %s3292_s3 = sld [smem:[#allocation9 + $0x2d]] }
 0x14e   :  { %v1458_v13 = vmul.f32 %v3000_v24, %v1457_v61  ;;  %v1459_v14 = vmul.f32 %v3003_v36, %v1457_v61  ;;  %v1460_v15 = vmul.f32 %v3006_v32, %v1457_v61  ;;  %v1461_v16 = vmul.f32 %v3009_v39, %v1457_v61  ;;  %s3294_s13 = sld [smem:[#allocation12 + $0x2c]] }
 0x14f   :  { %v1442_v17 = vmul.f32 %v1441_v47, %v1437_v2  ;;  %v1443_v18 = vmul.f32 %v1441_v47, %v1438_v9  ;;  %v1444_v19 = vmul.f32 %v1441_v47, %v1439_v3  ;;  %v1445_v20 = vmul.f32 %v1441_v47, %v1440_v12  ;;  %s3300_s14 = sld [smem:[#allocation13 + $0x2c]] }
 0x150   :  { %v1462_v63 = vadd.f32 %v1458_v13, %v1452_v50  ;;  %v1463_v8 = vadd.f32 %v1459_v14, %v1453_v51  ;;  %v1464_v10 = vadd.f32 %v1460_v15, %v1454_v52  ;;  %v1465_v11 = vadd.f32 %v1461_v16, %v1455_v60 }
 0x151   :  { %v1446_v21 = vadd.f32 %v1442_v17, %v1410_v45  ;;  %v1447_v23 = vadd.f32 %v1443_v18, %v1411_v46  ;;  %v1448_v25 = vadd.f32 %v1444_v19, %v1412_v4  ;;  %v1449_v33 = vadd.f32 %v1445_v20, %v1413_v49 }
 0x152   :  { %v1468_v28 = vadd.f32 %v1467_v0, %v1462_v63  ;;  %v1469_v29 = vadd.f32 %v1467_v0, %v1463_v8  ;;  %v1470_v30 = vadd.f32 %v1467_v0, %v1464_v10  ;;  %v1471_v31 = vadd.f32 %v1467_v0, %v1465_v11 }
 0x153   :  { %v1488_v34 = vmul.f32 %v3017_v54, %v1487_v62  ;;  %v1489_v22 = vmul.f32 %v3020_v56, %v1487_v62  ;;  %v1490_v35 = vmul.f32 %v3023_v58, %v1487_v62  ;;  %v1491_v41 = vmul.f32 %v3030_v1, %v1487_v62 }
 0x154   :  { %v1473_v26 = vmax.f32 %v1468_v28, 0.0  ;;  %v1474_v37 = vmax.f32 %v1469_v29, 0.0  ;;  %v1475_v38 = vmax.f32 %v1470_v30, 0.0  ;;  %v1476_v40 = vmax.f32 %v1471_v31, 0.0 }
 0x155   :  { %v1493_v42 = vstv %s3166_s15  ;;  %v1503_v43 = vstv %s3174_s16  ;;  %v1523_v44 = vstv %s3172_s0  ;;  %v1513_v52 = vstv %s3180_s17  ;;  %s3303_s15 = sld [smem:[#allocation10 + $0x2d]] }
 0x156   :  { %v1478_v45 = vmul.f32 %v1477_v27, %v1473_v26  ;;  %v1479_v46 = vmul.f32 %v1477_v27, %v1474_v37  ;;  %v1480_v4 = vmul.f32 %v1477_v27, %v1475_v38  ;;  %v1481_v47 = vmul.f32 %v1477_v27, %v1476_v40  ;;  %s3308_s0 = sld [smem:[#allocation9 + $0x2e]] }
 0x157   :  { %v1494_v48 = vmul.f32 %v3000_v24, %v1493_v42  ;;  %v1495_v5 = vmul.f32 %v3003_v36, %v1493_v42  ;;  %v1496_v6 = vmul.f32 %v3006_v32, %v1493_v42  ;;  %v1497_v7 = vmul.f32 %v3009_v39, %v1493_v42  ;;  %s3310_s16 = sld [smem:[#allocation12 + $0x2d]] }
 0x158   :  { %v1482_v49 = vadd.f32 %v1478_v45, %v1446_v21  ;;  %v1483_v50 = vadd.f32 %v1479_v46, %v1447_v23  ;;  %v1484_v51 = vadd.f32 %v1480_v4, %v1448_v25  ;;  %v1485_v60 = vadd.f32 %v1481_v47, %v1449_v33  ;;  %s3329_s17 = sld [smem:[#allocation13 + $0x2d]] }
 0x159   :  { %v1498_v53 = vadd.f32 %v1494_v48, %v1488_v34  ;;  %v1499_v55 = vadd.f32 %v1495_v5, %v1489_v22  ;;  %v1500_v57 = vadd.f32 %v1496_v6, %v1490_v35  ;;  %v1501_v59 = vadd.f32 %v1497_v7, %v1491_v41 }
 0x15a   :  { %v1524_v61 = vmul.f32 %v3017_v54, %v1523_v44  ;;  %v1525_v0 = vmul.f32 %v3020_v56, %v1523_v44  ;;  %v1526_v62 = vmul.f32 %v3023_v58, %v1523_v44  ;;  %v1527_v13 = vmul.f32 %v3030_v1, %v1523_v44 }
 0x15b   :  { %v1504_v2 = vadd.f32 %v1503_v43, %v1498_v53  ;;  %v1505_v9 = vadd.f32 %v1503_v43, %v1499_v55  ;;  %v1506_v3 = vadd.f32 %v1503_v43, %v1500_v57  ;;  %v1507_v12 = vadd.f32 %v1503_v43, %v1501_v59 }
 0x15c   :  { %v1529_v14 = vstv %s3183_s18  ;;  %v1539_v15 = vstv %s3190_s20  ;;  %v1559_v16 = vstv %s3188_s19  ;;  %v1549_v35 = vstv %s3201_s21  ;;  %s3346_s18 = sld [smem:[#allocation10 + $0x2e]] }
 0x15d   :  { %v1509_v17 = vmax.f32 %v1504_v2, 0.0  ;;  %v1510_v18 = vmax.f32 %v1505_v9, 0.0  ;;  %v1511_v19 = vmax.f32 %v1506_v3, 0.0  ;;  %v1512_v20 = vmax.f32 %v1507_v12, 0.0  ;;  %s3352_s19 = sld [smem:[#allocation9 + $0x2f]] }
 0x15e   :  { %v1530_v63 = vmul.f32 %v3000_v24, %v1529_v14  ;;  %v1531_v8 = vmul.f32 %v3003_v36, %v1529_v14  ;;  %v1532_v10 = vmul.f32 %v3006_v32, %v1529_v14  ;;  %v1533_v11 = vmul.f32 %v3009_v39, %v1529_v14  ;;  %s3354_s20 = sld [smem:[#allocation12 + $0x2e]] }
 0x15f   :  { %v1514_v21 = vmul.f32 %v1513_v52, %v1509_v17  ;;  %v1515_v23 = vmul.f32 %v1513_v52, %v1510_v18  ;;  %v1516_v25 = vmul.f32 %v1513_v52, %v1511_v19  ;;  %v1517_v27 = vmul.f32 %v1513_v52, %v1512_v20  ;;  %s3356_s21 = sld [smem:[#allocation13 + $0x2e]] }
 0x160   :  { %v1534_v28 = vadd.f32 %v1530_v63, %v1524_v61  ;;  %v1535_v29 = vadd.f32 %v1531_v8, %v1525_v0  ;;  %v1536_v30 = vadd.f32 %v1532_v10, %v1526_v62  ;;  %v1537_v31 = vadd.f32 %v1533_v11, %v1527_v13 }
 0x161   :  { %v1518_v33 = vadd.f32 %v1514_v21, %v1482_v49  ;;  %v1519_v34 = vadd.f32 %v1515_v23, %v1483_v50  ;;  %v1520_v22 = vadd.f32 %v1516_v25, %v1484_v51  ;;  %v1521_v41 = vadd.f32 %v1517_v27, %v1485_v60 }
 0x162   :  { %v1540_v26 = vadd.f32 %v1539_v15, %v1534_v28  ;;  %v1541_v37 = vadd.f32 %v1539_v15, %v1535_v29  ;;  %v1542_v38 = vadd.f32 %v1539_v15, %v1536_v30  ;;  %v1543_v40 = vadd.f32 %v1539_v15, %v1537_v31 }
 0x163   :  { %v1560_v42 = vmul.f32 %v3017_v54, %v1559_v16  ;;  %v1561_v43 = vmul.f32 %v3020_v56, %v1559_v16  ;;  %v1562_v44 = vmul.f32 %v3023_v58, %v1559_v16  ;;  %v1563_v48 = vmul.f32 %v3030_v1, %v1559_v16 }
 0x164   :  { %v1545_v45 = vmax.f32 %v1540_v26, 0.0  ;;  %v1546_v46 = vmax.f32 %v1541_v37, 0.0  ;;  %v1547_v4 = vmax.f32 %v1542_v38, 0.0  ;;  %v1548_v47 = vmax.f32 %v1543_v40, 0.0 }
 0x165   :  { %v1565_v5 = vstv %s3206_s1  ;;  %v1575_v6 = vstv %s3214_s23  ;;  %v1595_v7 = vstv %s3212_s22  ;;  %v1585_v62 = vstv %s3220_s24  ;;  %s3360_s1 = sld [smem:[#allocation10 + $0x2f]] }
 0x166   :  { %v1550_v49 = vmul.f32 %v1549_v35, %v1545_v45  ;;  %v1551_v50 = vmul.f32 %v1549_v35, %v1546_v46  ;;  %v1552_v51 = vmul.f32 %v1549_v35, %v1547_v4  ;;  %v1553_v52 = vmul.f32 %v1549_v35, %v1548_v47  ;;  %s3362_s22 = sld [smem:[#allocation12 + $0x2f]] }
 0x167   :  { %v1566_v53 = vmul.f32 %v3000_v24, %v1565_v5  ;;  %v1567_v55 = vmul.f32 %v3003_v36, %v1565_v5  ;;  %v1568_v57 = vmul.f32 %v3006_v32, %v1565_v5  ;;  %v1569_v59 = vmul.f32 %v3009_v39, %v1565_v5  ;;  %s3373_s23 = sld [smem:[#allocation9 + $0x30]] }
 0x168   :  { %v1554_v60 = vadd.f32 %v1550_v49, %v1518_v33  ;;  %v1555_v61 = vadd.f32 %v1551_v50, %v1519_v34  ;;  %v1556_v0 = vadd.f32 %v1552_v51, %v1520_v22  ;;  %v1557_v13 = vadd.f32 %v1553_v52, %v1521_v41  ;;  %s3377_s24 = sld [smem:[#allocation13 + $0x2f]] }
 0x169   :  { %v1570_v2 = vadd.f32 %v1566_v53, %v1560_v42  ;;  %v1571_v9 = vadd.f32 %v1567_v55, %v1561_v43  ;;  %v1572_v3 = vadd.f32 %v1568_v57, %v1562_v44  ;;  %v1573_v12 = vadd.f32 %v1569_v59, %v1563_v48 }
 0x16a   :  { %v1596_v14 = vmul.f32 %v3017_v54, %v1595_v7  ;;  %v1597_v15 = vmul.f32 %v3020_v56, %v1595_v7  ;;  %v1598_v16 = vmul.f32 %v3023_v58, %v1595_v7  ;;  %v1599_v63 = vmul.f32 %v3030_v1, %v1595_v7 }
 0x16b   :  { %v1576_v17 = vadd.f32 %v1575_v6, %v1570_v2  ;;  %v1577_v18 = vadd.f32 %v1575_v6, %v1571_v9  ;;  %v1578_v19 = vadd.f32 %v1575_v6, %v1572_v3  ;;  %v1579_v20 = vadd.f32 %v1575_v6, %v1573_v12 }
 0x16c   :  { %v1601_v8 = vstv %s3223_s2  ;;  %v1611_v10 = vstv %s3230_s25  ;;  %v1631_v11 = vstv %s3228_s4  ;;  %v1621_v44 = vstv %s3241_s26  ;;  %s3385_s2 = sld [smem:[#allocation10 + $0x30]] }
 0x16d   :  { %v1581_v21 = vmax.f32 %v1576_v17, 0.0  ;;  %v1582_v23 = vmax.f32 %v1577_v18, 0.0  ;;  %v1583_v25 = vmax.f32 %v1578_v19, 0.0  ;;  %v1584_v27 = vmax.f32 %v1579_v20, 0.0  ;;  %s3391_s4 = sld [smem:[#allocation9 + $0x31]] }
 0x16e   :  { %v1602_v28 = vmul.f32 %v3000_v24, %v1601_v8  ;;  %v1603_v29 = vmul.f32 %v3003_v36, %v1601_v8  ;;  %v1604_v30 = vmul.f32 %v3006_v32, %v1601_v8  ;;  %v1605_v31 = vmul.f32 %v3009_v39, %v1601_v8  ;;  %s3394_s25 = sld [smem:[#allocation12 + $0x30]] }
 0x16f   :  { %v1586_v33 = vmul.f32 %v1585_v62, %v1581_v21  ;;  %v1587_v34 = vmul.f32 %v1585_v62, %v1582_v23  ;;  %v1588_v22 = vmul.f32 %v1585_v62, %v1583_v25  ;;  %v1589_v35 = vmul.f32 %v1585_v62, %v1584_v27  ;;  %s3396_s26 = sld [smem:[#allocation13 + $0x30]] }
 0x170   :  { %v1606_v26 = vadd.f32 %v1602_v28, %v1596_v14  ;;  %v1607_v37 = vadd.f32 %v1603_v29, %v1597_v15  ;;  %v1608_v38 = vadd.f32 %v1604_v30, %v1598_v16  ;;  %v1609_v40 = vadd.f32 %v1605_v31, %v1599_v63 }
 0x171   :  { %v1590_v41 = vadd.f32 %v1586_v33, %v1554_v60  ;;  %v1591_v42 = vadd.f32 %v1587_v34, %v1555_v61  ;;  %v1592_v43 = vadd.f32 %v1588_v22, %v1556_v0  ;;  %v1593_v48 = vadd.f32 %v1589_v35, %v1557_v13 }
 0x172   :  { %v1612_v45 = vadd.f32 %v1611_v10, %v1606_v26  ;;  %v1613_v46 = vadd.f32 %v1611_v10, %v1607_v37  ;;  %v1614_v4 = vadd.f32 %v1611_v10, %v1608_v38  ;;  %v1615_v47 = vadd.f32 %v1611_v10, %v1609_v40 }
 0x173   :  { %v1632_v5 = vmul.f32 %v3017_v54, %v1631_v11  ;;  %v1633_v6 = vmul.f32 %v3020_v56, %v1631_v11  ;;  %v1634_v7 = vmul.f32 %v3023_v58, %v1631_v11  ;;  %v1635_v53 = vmul.f32 %v3030_v1, %v1631_v11 }
 0x174   :  { %v1617_v49 = vmax.f32 %v1612_v45, 0.0  ;;  %v1618_v50 = vmax.f32 %v1613_v46, 0.0  ;;  %v1619_v51 = vmax.f32 %v1614_v4, 0.0  ;;  %v1620_v52 = vmax.f32 %v1615_v47, 0.0 }
 0x175   :  { %v1637_v55 = vstv %s3246_s5  ;;  %v1647_v57 = vstv %s3254_s28  ;;  %v1667_v59 = vstv %s3252_s27  ;;  %v1657_v16 = vstv %s3260_s29  ;;  %s3400_s5 = sld [smem:[#allocation10 + $0x31]]  ;;  %s2314_s29 = smov [#allocation15]  }
 0x176   :  { %v1622_v60 = vmul.f32 %v1621_v44, %v1617_v49  ;;  %v1623_v61 = vmul.f32 %v1621_v44, %v1618_v50  ;;  %v1624_v0 = vmul.f32 %v1621_v44, %v1619_v51  ;;  %v1625_v62 = vmul.f32 %v1621_v44, %v1620_v52  ;;  %s3411_s27 = sld [smem:[#allocation12 + $0x31]] }
 0x177   :  { %v1638_v2 = vmul.f32 %v3000_v24, %v1637_v55  ;;  %v1639_v9 = vmul.f32 %v3003_v36, %v1637_v55  ;;  %v1640_v3 = vmul.f32 %v3006_v32, %v1637_v55  ;;  %v1641_v12 = vmul.f32 %v3009_v39, %v1637_v55  ;;  %s2140_s28 = sld [smem:[#allocation13 + $0x31]] }
 0x178   :  { %v1626_v13 = vadd.f32 %v1622_v60, %v1590_v41  ;;  %v1627_v14 = vadd.f32 %v1623_v61, %v1591_v42  ;;  %v1628_v15 = vadd.f32 %v1624_v0, %v1592_v43  ;;  %v1629_v63 = vadd.f32 %v1625_v62, %v1593_v48 }
 0x179   :  { %v1642_v17 = vadd.f32 %v1638_v2, %v1632_v5  ;;  %v1643_v18 = vadd.f32 %v1639_v9, %v1633_v6  ;;  %v1644_v19 = vadd.f32 %v1640_v3, %v1634_v7  ;;  %v1645_v20 = vadd.f32 %v1641_v12, %v1635_v53  ;;  %v3316_v3 = vld [vmem:[#allocation7] sm:$0xff]  ;;  %v3319_v12 = vld [vmem:[#allocation7 + $0x8] sm:$0xff] }
 0x17a   :  { %v1668_v8 = vmul.f32 %v3017_v54, %v1667_v59  ;;  %v1669_v10 = vmul.f32 %v3020_v56, %v1667_v59  ;;  %v1670_v11 = vmul.f32 %v3023_v58, %v1667_v59  ;;  %v1671_v28 = vmul.f32 %v3030_v1, %v1667_v59 }
 0x17b   :  { %v1648_v21 = vadd.f32 %v1647_v57, %v1642_v17  ;;  %v1649_v23 = vadd.f32 %v1647_v57, %v1643_v18  ;;  %v1650_v25 = vadd.f32 %v1647_v57, %v1644_v19  ;;  %v1651_v27 = vadd.f32 %v1647_v57, %v1645_v20 }
 0x17c   :  { %v1673_v29 = vstv %s3263_s30  ;;  %v1683_v30 = vstv %s3270_s9  ;;  %v1703_v31 = vstv %s3268_s8  ;;  %v1693_v6 = vstv %s3281_s12  ;;  %s1926_s30 = sshll.u32 %s2314_s29, 4  ;;  %s1928_s12 = sshll.u32 %s3438_s7, 4  ;;  %s1927_s30 = int_to_ptr.vmem [resolvable:$true] %s1926_s30  ;;  %s1929_s12 = int_to_ptr.hbm [resolvable:$true] %s1928_s12 }
 0x17d   :  { %v1653_v33 = vmax.f32 %v1648_v21, 0.0  ;;  %v1654_v34 = vmax.f32 %v1649_v23, 0.0  ;;  %v1655_v22 = vmax.f32 %v1650_v25, 0.0  ;;  %v1656_v35 = vmax.f32 %v1651_v27, 0.0  ;;  %v3331_v23 = vld [vmem:[#allocation3] sm:$0xff]  ;;  %v3334_v27 = vld [vmem:[#allocation3 + $0x8] sm:$0xff] }
 0x17e   :  { %v1674_v26 = vmul.f32 %v3000_v24, %v1673_v29  ;;  %v1675_v37 = vmul.f32 %v3003_v36, %v1673_v29  ;;  %v1676_v38 = vmul.f32 %v3006_v32, %v1673_v29  ;;  %v1677_v40 = vmul.f32 %v3009_v39, %v1673_v29  ;;  %v3337_v29 = vld [vmem:[#allocation3 + $0x10] sm:$0xff] }
 0x17f   :  { %v1658_v41 = vmul.f32 %v1657_v16, %v1653_v33  ;;  %v1659_v42 = vmul.f32 %v1657_v16, %v1654_v34  ;;  %v1660_v43 = vmul.f32 %v1657_v16, %v1655_v22  ;;  %v1661_v44 = vmul.f32 %v1657_v16, %v1656_v35  ;;  %v3340_v35 = vld [vmem:[#allocation3 + $0x18] sm:$0xff] }
 0x180   :  { %v1678_v45 = vadd.f32 %v1674_v26, %v1668_v8  ;;  %v1679_v46 = vadd.f32 %v1675_v37, %v1669_v10  ;;  %v1680_v4 = vadd.f32 %v1676_v38, %v1670_v11  ;;  %v1681_v47 = vadd.f32 %v1677_v40, %v1671_v28 }
 0x181   :  { %v1662_v48 = vadd.f32 %v1658_v41, %v1626_v13  ;;  %v1663_v5 = vadd.f32 %v1659_v42, %v1627_v14  ;;  %v1664_v24 = vadd.f32 %v1660_v43, %v1628_v15  ;;  %v1665_v49 = vadd.f32 %v1661_v44, %v1629_v63  ;;  %v3322_v14 = vld [vmem:[#allocation7 + $0x10] sm:$0xff]  ;;  %v3325_v15 = vld [vmem:[#allocation7 + $0x18] sm:$0xff] }
 0x182   :  { %v1684_v7 = vadd.f32 %v1683_v30, %v1678_v45  ;;  %v1685_v36 = vadd.f32 %v1683_v30, %v1679_v46  ;;  %v1686_v32 = vadd.f32 %v1683_v30, %v1680_v4  ;;  %v1687_v39 = vadd.f32 %v1683_v30, %v1681_v47 }
 0x183   :  { %v1704_v50 = vmul.f32 %v3017_v54, %v1703_v31  ;;  %v1705_v51 = vmul.f32 %v3020_v56, %v1703_v31  ;;  %v1706_v52 = vmul.f32 %v3023_v58, %v1703_v31  ;;  %v1707_v60 = vmul.f32 %v3030_v1, %v1703_v31 }
 0x184   :  { %v1689_v53 = vmax.f32 %v1684_v7, 0.0  ;;  %v1690_v55 = vmax.f32 %v1685_v36, 0.0  ;;  %v1691_v57 = vmax.f32 %v1686_v32, 0.0  ;;  %v1692_v59 = vmax.f32 %v1687_v39, 0.0 }
 0x185   :  { %v1709_v61 = vstv %s3286_s6  ;;  %v1719_v0 = vstv %s3294_s13  ;;  %v1739_v62 = vstv %s3292_s3  ;;  %v1729_v20 = vstv %s3300_s14 }
 0x186   :  { %v1694_v2 = vmul.f32 %v1693_v6, %v1689_v53  ;;  %v1695_v54 = vmul.f32 %v1693_v6, %v1690_v55  ;;  %v1696_v9 = vmul.f32 %v1693_v6, %v1691_v57  ;;  %v1697_v56 = vmul.f32 %v1693_v6, %v1692_v59 }
 0x187   :  { %v1710_v58 = vmul.f32 %v3316_v3, %v1709_v61  ;;  %v1711_v13 = vmul.f32 %v3319_v12, %v1709_v61  ;;  %v1712_v1 = vmul.f32 %v3322_v14, %v1709_v61  ;;  %v1713_v16 = vmul.f32 %v3325_v15, %v1709_v61 }
 0x188   :  { %v1698_v17 = vadd.f32 %v1694_v2, %v1662_v48  ;;  %v1699_v18 = vadd.f32 %v1695_v54, %v1663_v5  ;;  %v1700_v19 = vadd.f32 %v1696_v9, %v1664_v24  ;;  %v1701_v21 = vadd.f32 %v1697_v56, %v1665_v49 }
 0x189   :  { %v1714_v63 = vadd.f32 %v1710_v58, %v1704_v50  ;;  %v1715_v8 = vadd.f32 %v1711_v13, %v1705_v51  ;;  %v1716_v10 = vadd.f32 %v1712_v1, %v1706_v52  ;;  %v1717_v11 = vadd.f32 %v1713_v16, %v1707_v60 }
 0x18a   :  { %v1740_v25 = vmul.f32 %v3331_v23, %v1739_v62  ;;  %v1741_v28 = vmul.f32 %v3334_v27, %v1739_v62  ;;  %v1742_v30 = vmul.f32 %v3337_v29, %v1739_v62  ;;  %v1743_v26 = vmul.f32 %v3340_v35, %v1739_v62 }
 0x18b   :  { %v1720_v31 = vadd.f32 %v1719_v0, %v1714_v63  ;;  %v1721_v33 = vadd.f32 %v1719_v0, %v1715_v8  ;;  %v1722_v34 = vadd.f32 %v1719_v0, %v1716_v10  ;;  %v1723_v22 = vadd.f32 %v1719_v0, %v1717_v11 }
 0x18c   :  { %v1745_v37 = vstv %s3303_s15  ;;  %v1755_v38 = vstv %s3310_s16  ;;  %v1775_v40 = vstv %s3308_s0  ;;  %v1765_v50 = vstv %s3329_s17 }
 0x18d   :  { %v1725_v41 = vmax.f32 %v1720_v31, 0.0  ;;  %v1726_v42 = vmax.f32 %v1721_v33, 0.0  ;;  %v1727_v43 = vmax.f32 %v1722_v34, 0.0  ;;  %v1728_v44 = vmax.f32 %v1723_v22, 0.0 }
 0x18e   :  { %v1746_v45 = vmul.f32 %v3316_v3, %v1745_v37  ;;  %v1747_v46 = vmul.f32 %v3319_v12, %v1745_v37  ;;  %v1748_v4 = vmul.f32 %v3322_v14, %v1745_v37  ;;  %v1749_v47 = vmul.f32 %v3325_v15, %v1745_v37 }
 0x18f   :  { %v1730_v48 = vmul.f32 %v1729_v20, %v1725_v41  ;;  %v1731_v5 = vmul.f32 %v1729_v20, %v1726_v42  ;;  %v1732_v24 = vmul.f32 %v1729_v20, %v1727_v43  ;;  %v1733_v6 = vmul.f32 %v1729_v20, %v1728_v44 }
 0x190   :  { %v1750_v7 = vadd.f32 %v1746_v45, %v1740_v25  ;;  %v1751_v36 = vadd.f32 %v1747_v46, %v1741_v28  ;;  %v1752_v32 = vadd.f32 %v1748_v4, %v1742_v30  ;;  %v1753_v39 = vadd.f32 %v1749_v47, %v1743_v26 }
 0x191   :  { %v1734_v49 = vadd.f32 %v1730_v48, %v1698_v17  ;;  %v1735_v57 = vadd.f32 %v1731_v5, %v1699_v18  ;;  %v1736_v59 = vadd.f32 %v1732_v24, %v1700_v19  ;;  %v1737_v60 = vadd.f32 %v1733_v6, %v1701_v21 }
 0x192   :  { %v1756_v51 = vadd.f32 %v1755_v38, %v1750_v7  ;;  %v1757_v52 = vadd.f32 %v1755_v38, %v1751_v36  ;;  %v1758_v53 = vadd.f32 %v1755_v38, %v1752_v32  ;;  %v1759_v55 = vadd.f32 %v1755_v38, %v1753_v39 }
 0x193   :  { %v1776_v61 = vmul.f32 %v3331_v23, %v1775_v40  ;;  %v1777_v9 = vmul.f32 %v3334_v27, %v1775_v40  ;;  %v1778_v56 = vmul.f32 %v3337_v29, %v1775_v40  ;;  %v1779_v58 = vmul.f32 %v3340_v35, %v1775_v40 }
 0x194   :  { %v1761_v0 = vmax.f32 %v1756_v51, 0.0  ;;  %v1762_v62 = vmax.f32 %v1757_v52, 0.0  ;;  %v1763_v2 = vmax.f32 %v1758_v53, 0.0  ;;  %v1764_v54 = vmax.f32 %v1759_v55, 0.0 }
 0x195   :  { %v1781_v13 = vstv %s3346_s18  ;;  %v1811_v18 = vstv %s3352_s19  ;;  %v1791_v21 = vstv %s3354_s20  ;;  %v1801_v25 = vstv %s3356_s21 }
 0x196   :  { %v1766_v1 = vmul.f32 %v1765_v50, %v1761_v0  ;;  %v1767_v16 = vmul.f32 %v1765_v50, %v1762_v62  ;;  %v1768_v17 = vmul.f32 %v1765_v50, %v1763_v2  ;;  %v1782_v19 = vmul.f32 %v3316_v3, %v1781_v13 }
 0x197   :  { %v1783_v20 = vmul.f32 %v3319_v12, %v1781_v13  ;;  %v1784_v63 = vmul.f32 %v3322_v14, %v1781_v13  ;;  %v1785_v8 = vmul.f32 %v3325_v15, %v1781_v13  ;;  %v1769_v10 = vmul.f32 %v1765_v50, %v1764_v54 }
 0x198   :  { %v1770_v11 = vadd.f32 %v1766_v1, %v1734_v49  ;;  %v1786_v28 = vadd.f32 %v1782_v19, %v1776_v61  ;;  %v1771_v34 = vadd.f32 %v1767_v16, %v1735_v57  ;;  %v1772_v22 = vadd.f32 %v1768_v17, %v1736_v59 }
 0x199   :  { %v1787_v30 = vadd.f32 %v1783_v20, %v1777_v9  ;;  %v1788_v31 = vadd.f32 %v1784_v63, %v1778_v56  ;;  %v1789_v33 = vadd.f32 %v1785_v8, %v1779_v58  ;;  %v1812_v26 = vmul.f32 %v3331_v23, %v1811_v18 }
 0x19a   :  { %v1813_v37 = vmul.f32 %v3334_v27, %v1811_v18  ;;  %v1792_v38 = vadd.f32 %v1791_v21, %v1786_v28  ;;  %v1814_v43 = vmul.f32 %v3337_v29, %v1811_v18  ;;  %v1815_v44 = vmul.f32 %v3340_v35, %v1811_v18 }
 0x19b   :  { %v1793_v40 = vadd.f32 %v1791_v21, %v1787_v30  ;;  %v1794_v41 = vadd.f32 %v1791_v21, %v1788_v31  ;;  %v1795_v42 = vadd.f32 %v1791_v21, %v1789_v33  ;;  %v1817_v45 = vstv %s3360_s1 }
 0x19c   :  { %v1827_v46 = vstv %s3362_s22  ;;  %v1797_v4 = vmax.f32 %v1792_v38, 0.0  ;;  %v1818_v24 = vmul.f32 %v3316_v3, %v1817_v45  ;;  %v1819_v6 = vmul.f32 %v3319_v12, %v1817_v45 }
 0x19d   :  { %v1798_v47 = vmax.f32 %v1793_v40, 0.0  ;;  %v1799_v48 = vmax.f32 %v1794_v41, 0.0  ;;  %v1800_v5 = vmax.f32 %v1795_v42, 0.0  ;;  %v1820_v7 = vmul.f32 %v3322_v14, %v1817_v45 }
 0x19e   :  { %v1821_v36 = vmul.f32 %v3325_v15, %v1817_v45  ;;  %v1802_v32 = vmul.f32 %v1801_v25, %v1797_v4  ;;  %v1847_v50 = vstv %s3373_s23  ;;  %v1822_v51 = vadd.f32 %v1818_v24, %v1812_v26 }
 0x19f   :  { %v1803_v39 = vmul.f32 %v1801_v25, %v1798_v47  ;;  %v1804_v49 = vmul.f32 %v1801_v25, %v1799_v48  ;;  %v1823_v52 = vadd.f32 %v1819_v6, %v1813_v37  ;;  %v1824_v53 = vadd.f32 %v1820_v7, %v1814_v43 }
 0x1a0   :  { %v1825_v55 = vadd.f32 %v1821_v36, %v1815_v44  ;;  %v1773_v57 = vadd.f32 %v1769_v10, %v1737_v60  ;;  %v1805_v59 = vmul.f32 %v1801_v25, %v1800_v5  ;;  %v1837_v61 = vstv %s3377_s24 }
 0x1a1   :  { %v1828_v0 = vadd.f32 %v1827_v46, %v1822_v51  ;;  %v1829_v62 = vadd.f32 %v1827_v46, %v1823_v52  ;;  %v1830_v2 = vadd.f32 %v1827_v46, %v1824_v53  ;;  %v1806_v9 = vadd.f32 %v1802_v32, %v1770_v11 }
 0x1a2   :  { %v1831_v54 = vadd.f32 %v1827_v46, %v1825_v55  ;;  %v1807_v56 = vadd.f32 %v1803_v39, %v1771_v34  ;;  %v1808_v58 = vadd.f32 %v1804_v49, %v1772_v22  ;;  %v1848_v13 = vmul.f32 %v3331_v23, %v1847_v50 }
 0x1a3   :  { %v1833_v1 = vmax.f32 %v1828_v0, 0.0  ;;  %v1834_v16 = vmax.f32 %v1829_v62, 0.0  ;;  %v1835_v17 = vmax.f32 %v1830_v2, 0.0  ;;  %v1849_v60 = vmul.f32 %v3334_v27, %v1847_v50 }
 0x1a4   :  { %v1836_v18 = vmax.f32 %v1831_v54, 0.0  ;;  %v1850_v19 = vmul.f32 %v3337_v29, %v1847_v50  ;;  %v1851_v20 = vmul.f32 %v3340_v35, %v1847_v50  ;;  %v1853_v63 = vstv %s3385_s2 }
 0x1a5   :  { %v1838_v8 = vmul.f32 %v1837_v61, %v1833_v1  ;;  %v1839_v10 = vmul.f32 %v1837_v61, %v1834_v16  ;;  %v1840_v11 = vmul.f32 %v1837_v61, %v1835_v17  ;;  %v1883_v21 = vstv %s3391_s4 }
 0x1a6   :  { %v1854_v25 = vmul.f32 %v3316_v3, %v1853_v63  ;;  %v1855_v28 = vmul.f32 %v3319_v12, %v1853_v63  ;;  %v1856_v30 = vmul.f32 %v3322_v14, %v1853_v63  ;;  %v1857_v31 = vmul.f32 %v3325_v15, %v1853_v63 }
 0x1a7   :  { %v1809_v33 = vadd.f32 %v1805_v59, %v1773_v57  ;;  %v1841_v34 = vmul.f32 %v1837_v61, %v1836_v18  ;;  %v1863_v22 = vstv %s3394_s25  ;;  %v1873_v26 = vstv %s3396_s26 }
 0x1a8   :  { %v1858_v37 = vadd.f32 %v1854_v25, %v1848_v13  ;;  %v1859_v38 = vadd.f32 %v1855_v28, %v1849_v60  ;;  %v1860_v40 = vadd.f32 %v1856_v30, %v1850_v19  ;;  %v1861_v41 = vadd.f32 %v1857_v31, %v1851_v20 }
 0x1a9   :  { %v1842_v42 = vadd.f32 %v1838_v8, %v1806_v9  ;;  %v1843_v43 = vadd.f32 %v1839_v10, %v1807_v56  ;;  %v1844_v44 = vadd.f32 %v1840_v11, %v1808_v58  ;;  %v1884_v45 = vmul.f32 %v3331_v23, %v1883_v21 }
 0x1aa   :  { %v1864_v46 = vadd.f32 %v1863_v22, %v1858_v37  ;;  %v1865_v4 = vadd.f32 %v1863_v22, %v1859_v38  ;;  %v1866_v47 = vadd.f32 %v1863_v22, %v1860_v40  ;;  %v1867_v48 = vadd.f32 %v1863_v22, %v1861_v41 }
 0x1ab   :  { %v1885_v5 = vmul.f32 %v3334_v27, %v1883_v21  ;;  %v1886_v24 = vmul.f32 %v3337_v29, %v1883_v21  ;;  %v1887_v6 = vmul.f32 %v3340_v35, %v1883_v21  ;;  %v1889_v7 = vstv %s3400_s5 }
 0x1ac   :  { %v1869_v36 = vmax.f32 %v1864_v46, 0.0  ;;  %v1870_v32 = vmax.f32 %v1865_v4, 0.0  ;;  %v1871_v39 = vmax.f32 %v1866_v47, 0.0  ;;  %v1872_v49 = vmax.f32 %v1867_v48, 0.0 }
 0x1ad   :  { %v1890_v50 = vmul.f32 %v3316_v3, %v1889_v7  ;;  %v1891_v23 = vmul.f32 %v3319_v12, %v1889_v7  ;;  %v1892_v51 = vmul.f32 %v3322_v14, %v1889_v7  ;;  %v1893_v52 = vmul.f32 %v3325_v15, %v1889_v7 }
 0x1ae   :  { %v1874_v53 = vmul.f32 %v1873_v26, %v1869_v36  ;;  %v1875_v55 = vmul.f32 %v1873_v26, %v1870_v32  ;;  %v1876_v27 = vmul.f32 %v1873_v26, %v1871_v39  ;;  %v1899_v57 = vstv %s3411_s27 }
 0x1af   :  { %v1894_v29 = vadd.f32 %v1890_v50, %v1884_v45  ;;  %v1895_v59 = vadd.f32 %v1891_v23, %v1885_v5  ;;  %v1896_v35 = vadd.f32 %v1892_v51, %v1886_v24  ;;  %v1897_v61 = vadd.f32 %v1893_v52, %v1887_v6 }
 0x1b0   :  { %v1845_v0 = vadd.f32 %v1841_v34, %v1809_v33  ;;  %v1877_v62 = vmul.f32 %v1873_v26, %v1872_v49  ;;  %v1878_v56 = vadd.f32 %v1874_v53, %v1842_v42  ;;  %v1879_v12 = vadd.f32 %v1875_v55, %v1843_v43 }
 0x1b1   :  { %v1900_v2 = vadd.f32 %v1899_v57, %v1894_v29  ;;  %v1901_v54 = vadd.f32 %v1899_v57, %v1895_v59  ;;  %v1902_v9 = vadd.f32 %v1899_v57, %v1896_v35  ;;  %v1903_v3 = vadd.f32 %v1899_v57, %v1897_v61 }
 0x1b2   :  { %v1880_v58 = vadd.f32 %v1876_v27, %v1844_v44  ;;  %v1909_v14 = vstv %s2140_s28  ;;  %v1881_v17 = vadd.f32 %v1877_v62, %v1845_v0 }
 0x1b3   :  { %v1905_v13 = vmax.f32 %v1900_v2, 0.0  ;;  %v1906_v15 = vmax.f32 %v1901_v54, 0.0  ;;  %v1907_v1 = vmax.f32 %v1902_v9, 0.0  ;;  %v1908_v16 = vmax.f32 %v1903_v3, 0.0 }
 0x1b5   :  { %v1910_v18 = vmul.f32 %v1909_v14, %v1905_v13  ;;  %v1911_v60 = vmul.f32 %v1909_v14, %v1906_v15  ;;  %v1912_v19 = vmul.f32 %v1909_v14, %v1907_v1  ;;  %v1913_v20 = vmul.f32 %v1909_v14, %v1908_v16 }
 0x1b7   :  { %v1914_v63 = vadd.f32 %v1910_v18, %v1878_v56  ;;  %v1915_v8 = vadd.f32 %v1911_v60, %v1879_v12  ;;  %v1916_v10 = vadd.f32 %v1912_v19, %v1880_v58  ;;  %v1917_v11 = vadd.f32 %v1913_v20, %v1881_v17 }
 0x1b9   :  { %1918 = vst [vmem:[#allocation15] sm:$0xff] %v1914_v63 }
 0x1ba   :  { %1919 = vst [vmem:[#allocation15 + $0x8] sm:$0xff] %v1915_v8 }
 0x1bb   :  { %1920 = vst [vmem:[#allocation15 + $0x10] sm:$0xff] %v1916_v10 }
 0x1bc   :  { %1921 = vst [vmem:[#allocation15 + $0x18] sm:$0xff] %v1917_v11 }
 0x1bd   :  { %1934 = dma.vmem_to_hbm [thread:$0]  %s1927_s30, 512, %s1929_s12, [#allocation5], %s2308_s10, %s2308_s10, %s2309_s11  }
 0x1be   :  { %2304 = dma.done.wait [#allocation5], 512  }
 0x1bf   :  { %2305 = vsyncadd [#allocation5], 4294966784 }
 0x1c0   :  { %1939 = vsyncpa [#allocation4], 1 }
 0x1c1   :  { %1940 = vsyncpa [#allocation8], 1 }
 0x1c2   :  { %1941 = vsyncpa [#allocation5], 1 }
 0x1c3   :  { %1942 = vsyncpa [#allocation6], 1 }
 0x1c4   :  { %1943 = vsyncpa [#allocation11], 1 }
 0x1c5   :  { %1944 = vsyncpa [#allocation14], 1 }

</bundles_post_ra>
